<compile_context>
chip_gen: v6e
topology: v6e:2x2x1
jax: 0.10.0
libtpu: 0.0.40
codegen_flags: <defaults>
</compile_context>

<pallas_src>
import math
import functools

import jax
import jax.numpy as jnp
from jax import lax
from jax.experimental import pallas as pl
from jax.experimental.pallas import tpu as pltpu


# ----------------------------------------------------------------------------
# In-kernel helpers (operate on plain jnp values)
# ----------------------------------------------------------------------------

_EPS = 1e-5


def _mm(a, w):
    """2-D matmul on the MXU; activations cast to the weight dtype, f32 accumulation."""
    return jnp.dot(a.astype(w.dtype), w, preferred_element_type=jnp.float32)


def _mm_t(a, w):
    """Transposed-LHS matmul: (S, F)^T @ (S, E) -> (F, E); contraction over dim 0 of both."""
    return lax.dot_general(a.astype(w.dtype), w, (((0,), (0,)), ((), ())),
                           preferred_element_type=jnp.float32)


def _mean_all_2d(x):
    """Mean over all elements of a 2-D slab, returned as (1, 1) (staged reductions)."""
    return jnp.mean(jnp.mean(x, axis=-1, keepdims=True), axis=-2, keepdims=True)


def _bn_slab(x, g, b):
    """BatchNorm over ALL elements of a 2-D slab (biased variance); g, b are scalars."""
    m = _mean_all_2d(x)
    xc = x - m
    v = _mean_all_2d(xc * xc)
    return xc * lax.rsqrt(v + _EPS) * g + b


def _layernorm_rows(x, g, b):
    """LayerNorm over the last dim of x (per row); g, b are (1, E)."""
    m = jnp.mean(x, axis=-1, keepdims=True)
    xc = x - m
    v = jnp.mean(xc * xc, axis=-1, keepdims=True)
    return xc * lax.rsqrt(v + _EPS) * g + b


def _pick_bt(batch, max_bt=8):
    """Largest divisor of `batch` <= max_bt that keeps >= 2 parallel grid steps (v7x: 2 TCs)."""
    best = 1
    for cand in range(1, min(batch, max_bt) + 1):
        if batch % cand == 0 and (batch < 2 or batch // cand >= 2):
            best = cand
    return best


def _pad_lanes(w, b, lane=128):
    """Pad the output dim of a (K, N) weight / (1, N) bias to a multiple of 128 lanes."""
    n = w.shape[1]
    npad = max(lane, ((n + lane - 1) // lane) * lane)
    if npad != n:
        w = jnp.pad(w, ((0, 0), (0, npad - n)))
        b = jnp.pad(b, ((0, 0), (0, npad - n)))
    return w, b, n


# ----------------------------------------------------------------------------
# Fused trunk kernel: Linear -> BatchNorm1d(batch) -> +PE -> BatchNorm1d(batch)
# ----------------------------------------------------------------------------

def _trunk_kernel(x_ref, w_ref, b_ref, pe_ref, g1_ref, b1_ref, g2_ref, b2_ref, o_ref,
                  *, bt, contract_time):
    i = pl.program_id(0)
    w = w_ref[...]
    bias = b_ref[...]
    pe = pe_ref[...]

    if contract_time:
        # trunk_net2: contract over the time axis in-kernel (avoids a JAX-side transpose of x).
        for lb in range(bt):
            idx = i * bt + lb
            slab = _mm_t(x_ref[lb], w) + bias                 # (F, E)
            slab = _bn_slab(slab, g1_ref[idx], b1_ref[idx]) + pe
            slab = _bn_slab(slab, g2_ref[idx], b2_ref[idx])
            o_ref[lb] = slab
    else:
        xb = x_ref[...]                                       # (bt, S, F)
        btl, S, F = xb.shape
        E = w.shape[1]
        h = _mm(xb.reshape(btl * S, F), w).reshape(btl, S, E) + bias
        for lb in range(bt):
            idx = i * bt + lb
            slab = _bn_slab(h[lb], g1_ref[idx], b1_ref[idx]) + pe
            slab = _bn_slab(slab, g2_ref[idx], b2_ref[idx])
            o_ref[lb] = slab


def trunk_forward(x, tp, pe_slice, *, contract_time, bt):
    """x: (B, S, F) -> (B, S, E)  [contract_time=False]  or  (B, F, E)  [contract_time=True]."""
    B, S, F = x.shape
    E = tp["w"].shape[1]
    N = F if contract_time else S
    nb = B // bt
    kern = functools.partial(_trunk_kernel, bt=bt, contract_time=contract_time)
    smem = pl.BlockSpec(memory_space=pltpu.MemorySpace.SMEM)
    return pl.pallas_call(
        kern,
        out_shape=jax.ShapeDtypeStruct((B, N, E), jnp.float32),
        grid=(nb,),
        in_specs=[
            pl.BlockSpec((bt, S, F), lambda i: (i, 0, 0)),
            pl.BlockSpec(tp["w"].shape, lambda i: (0, 0)),
            pl.BlockSpec((1, E), lambda i: (0, 0)),
            pl.BlockSpec((N, E), lambda i: (0, 0)),
            smem, smem, smem, smem,
        ],
        out_specs=pl.BlockSpec((bt, N, E), lambda i: (i, 0, 0)),
        compiler_params=pltpu.CompilerParams(dimension_semantics=("parallel",)),
    )(x, tp["w"], tp["b"], pe_slice, tp["g1"], tp["b1"], tp["g2"], tp["b2"])


# ----------------------------------------------------------------------------
# Fused transformer encoder STACK (post-norm), grid = (batch_blocks, nlayers).
# Activation stays resident in a VMEM scratch across the layer axis.
# ----------------------------------------------------------------------------

def _encoder_stack_kernel(x_ref, wqkv_ref, bqkv_ref, wo_ref, bo_ref,
                          ln1g_ref, ln1b_ref, w1_ref, b1_ref, w2_ref, b2_ref,
                          ln2g_ref, ln2b_ref,
                          o_ref, attn_ref, act_ref, *, bt, nhead):
    l = pl.program_id(1)
    nl = pl.num_programs(1)

    @pl.when(l == 0)
    def _():
        act_ref[...] = x_ref[...]

    xb = act_ref[...]                                        # (bt, S, E)
    _, S, E = xb.shape
    D = E // nhead
    x2d = xb.reshape(bt * S, E)

    # Fused QKV projection (1/sqrt(D) scale pre-folded into the Q columns).
    wqkv = wqkv_ref[0]                                       # (E, 3E)
    qkv = (_mm(x2d, wqkv) + bqkv_ref[0]).reshape(bt, S, 3 * E)

    head_outs = []
    p_sum = jnp.zeros((bt, S, S), jnp.float32)
    for h in range(nhead):
        q = qkv[..., h * D:(h + 1) * D]                      # (bt, S, D)
        k = qkv[..., E + h * D:E + (h + 1) * D]
        v = qkv[..., 2 * E + h * D:2 * E + (h + 1) * D]
        s = jnp.einsum("bqd,bkd->bqk", q, k, preferred_element_type=jnp.float32)
        s = s - jnp.max(s, axis=-1, keepdims=True)
        p = jnp.exp(s)
        p = p / jnp.sum(p, axis=-1, keepdims=True)           # exact divide (attention is exported)
        head_outs.append(jnp.einsum("bqk,bkd->bqd", p, v,
                                    preferred_element_type=jnp.float32))
        p_sum = p_sum + p

    concat = jnp.concatenate(head_outs, axis=-1)             # (bt, S, E)
    attn_out = _mm(concat.reshape(bt * S, E), wo_ref[0]) + bo_ref[0]

    # Residual + LayerNorm (post-norm), dropout = identity.
    h1 = _layernorm_rows(x2d + attn_out, ln1g_ref[0], ln1b_ref[0])

    # Feed-forward + residual + LayerNorm.
    ff = jnp.maximum(_mm(h1, w1_ref[0]) + b1_ref[0], 0.0)
    ff = _mm(ff, w2_ref[0]) + b2_ref[0]
    h2 = _layernorm_rows(h1 + ff, ln2g_ref[0], ln2b_ref[0])
    h2_3d = h2.reshape(bt, S, E)

    act_ref[...] = h2_3d                                      # carry to the next layer

    @pl.when(l == nl - 1)
    def _():
        o_ref[...] = h2_3d
        attn_ref[...] = p_sum * (1.0 / nhead)                 # head-averaged, last layer only


def encoder_stack_forward(x, ep, *, nhead, bt):
    """x: (B, S, E) -> (out (B, S, E), head-averaged last-layer attention (B, S, S))."""
    B, S, E = x.shape
    L = ep["wqkv"].shape[0]
    nhid = ep["w1"].shape[2]
    nb = B // bt
    kern = functools.partial(_encoder_stack_kernel, bt=bt, nhead=nhead)
    out, attn = pl.pallas_call(
        kern,
        out_shape=(jax.ShapeDtypeStruct((B, S, E), jnp.float32),
                   jax.ShapeDtypeStruct((B, S, S), jnp.float32)),
        grid=(nb, L),
        in_specs=[
            pl.BlockSpec((bt, S, E), lambda b, l: (b, 0, 0)),
            pl.BlockSpec((1, E, 3 * E), lambda b, l: (l, 0, 0)),
            pl.BlockSpec((1, 1, 3 * E), lambda b, l: (l, 0, 0)),
            pl.BlockSpec((1, E, E), lambda b, l: (l, 0, 0)),
            pl.BlockSpec((1, 1, E), lambda b, l: (l, 0, 0)),
            pl.BlockSpec((1, 1, E), lambda b, l: (l, 0, 0)),
            pl.BlockSpec((1, 1, E), lambda b, l: (l, 0, 0)),
            pl.BlockSpec((1, E, nhid), lambda b, l: (l, 0, 0)),
            pl.BlockSpec((1, 1, nhid), lambda b, l: (l, 0, 0)),
            pl.BlockSpec((1, nhid, E), lambda b, l: (l, 0, 0)),
            pl.BlockSpec((1, 1, E), lambda b, l: (l, 0, 0)),
            pl.BlockSpec((1, 1, E), lambda b, l: (l, 0, 0)),
            pl.BlockSpec((1, 1, E), lambda b, l: (l, 0, 0)),
        ],
        out_specs=(pl.BlockSpec((bt, S, E), lambda b, l: (b, 0, 0)),
                   pl.BlockSpec((bt, S, S), lambda b, l: (b, 0, 0))),
        scratch_shapes=[pltpu.VMEM((bt, S, E), jnp.float32)],
        compiler_params=pltpu.CompilerParams(
            dimension_semantics=("parallel", "arbitrary"),
            vmem_limit_bytes=48 * 1024 * 1024),
    )(x, ep["wqkv"], ep["bqkv"], ep["wo"], ep["bo"],
      ep["ln1_g"], ep["ln1_b"], ep["w1"], ep["b1"], ep["w2"], ep["b2"],
      ep["ln2_g"], ep["ln2_b"])
    return out, attn


# ----------------------------------------------------------------------------
# Fused task heads (include the model-level BatchNorm1d(batch) on x1)
# ----------------------------------------------------------------------------

def _class_head_kernel(x_ref, bng_ref, bnb_ref,
                       w1_ref, b1_ref, g1_ref, s1_ref,
                       w2_ref, b2_ref, g2_ref, s2_ref,
                       w3_ref, b3_ref, o_ref, *, bt):
    i = pl.program_id(0)
    for lb in range(bt):
        idx = i * bt + lb
        xb = x_ref[lb]                                       # (S, E)
        # Model-level BatchNorm1d(batch): stats over the whole (S, E) slab, applied to the last row.
        m = _mean_all_2d(xb)
        v = _mean_all_2d((xb - m) ** 2)
        last = xb[xb.shape[0] - 1:, :]                       # (1, E) last time step
        h = (last - m) * lax.rsqrt(v + _EPS) * bng_ref[idx] + bnb_ref[idx]
        h = jnp.maximum(_mm(h, w1_ref[...]) + b1_ref[...], 0.0)
        # Permute ∘ BatchNorm1d(batch) ∘ Permute == per-batch-element normalization over features.
        h = _bn_slab(h, g1_ref[idx], s1_ref[idx])            # Dropout = identity
        h = jnp.maximum(_mm(h, w2_ref[...]) + b2_ref[...], 0.0)
        h = _bn_slab(h, g2_ref[idx], s2_ref[idx])
        o_ref[lb] = _mm(h, w3_ref[...]) + b3_ref[...]        # lane-dense (1, 128-padded)


def class_head_forward(x1, params, *, bt):
    B, S, E = x1.shape
    cn = params["class_net"]
    nh = cn["w1"].shape[1]
    w3p, b3p, ncls = _pad_lanes(cn["w3"], cn["b3"])
    npad = w3p.shape[1]
    nb = B // bt
    smem = pl.BlockSpec(memory_space=pltpu.MemorySpace.SMEM)
    out = pl.pallas_call(
        functools.partial(_class_head_kernel, bt=bt),
        out_shape=jax.ShapeDtypeStruct((B, 1, npad), jnp.float32),
        grid=(nb,),
        in_specs=[
            pl.BlockSpec((bt, S, E), lambda i: (i, 0, 0)),
            smem, smem,
            pl.BlockSpec((E, nh), lambda i: (0, 0)),
            pl.BlockSpec((1, nh), lambda i: (0, 0)),
            smem, smem,
            pl.BlockSpec((nh, nh), lambda i: (0, 0)),
            pl.BlockSpec((1, nh), lambda i: (0, 0)),
            smem, smem,
            pl.BlockSpec((nh, npad), lambda i: (0, 0)),
            pl.BlockSpec((1, npad), lambda i: (0, 0)),
        ],
        out_specs=pl.BlockSpec((bt, 1, npad), lambda i: (i, 0, 0)),
        compiler_params=pltpu.CompilerParams(dimension_semantics=("parallel",)),
    )(x1, params["bn_g"], params["bn_b"],
      cn["w1"], cn["b1"], cn["bn1_g"], cn["bn1_b"],
      cn["w2"], cn["b2"], cn["bn2_g"], cn["bn2_b"],
      w3p, b3p)
    return out[:, 0, :ncls]


def _tar_head_kernel(x_ref, bng_ref, bnb_ref,
                     w1_ref, b1_ref, g1_ref, s1_ref,
                     w2_ref, b2_ref, g2_ref, s2_ref,
                     w3_ref, b3_ref, o_ref, *, bt):
    i = pl.program_id(0)
    for lb in range(bt):
        idx = i * bt + lb
        xb = x_ref[lb]                                       # (S, E)
        h = _bn_slab(xb, bng_ref[idx], bnb_ref[idx])         # model-level BatchNorm1d(batch)
        h = _mm(h, w1_ref[...]) + b1_ref[...]
        h = _bn_slab(h, g1_ref[idx], s1_ref[idx])
        h = _mm(h, w2_ref[...]) + b2_ref[...]
        h = _bn_slab(h, g2_ref[idx], s2_ref[idx])
        o_ref[lb] = _mm(h, w3_ref[...]) + b3_ref[...]        # lane-dense (S, 128-padded)


def tar_head_forward(x1, params, *, bt):
    B, S, E = x1.shape
    tp = params["tar"]
    nt = tp["w1"].shape[1]
    w3p, b3p, fout = _pad_lanes(tp["w3"], tp["b3"])
    fpad = w3p.shape[1]
    nb = B // bt
    smem = pl.BlockSpec(memory_space=pltpu.MemorySpace.SMEM)
    out = pl.pallas_call(
        functools.partial(_tar_head_kernel, bt=bt),
        out_shape=jax.ShapeDtypeStruct((B, S, fpad), jnp.float32),
        grid=(nb,),
        in_specs=[
            pl.BlockSpec((bt, S, E), lambda i: (i, 0, 0)),
            smem, smem,
            pl.BlockSpec((E, nt), lambda i: (0, 0)),
            pl.BlockSpec((1, nt), lambda i: (0, 0)),
            smem, smem,
            pl.BlockSpec((nt, nt), lambda i: (0, 0)),
            pl.BlockSpec((1, nt), lambda i: (0, 0)),
            smem, smem,
            pl.BlockSpec((nt, fpad), lambda i: (0, 0)),
            pl.BlockSpec((1, fpad), lambda i: (0, 0)),
        ],
        out_specs=pl.BlockSpec((bt, S, fpad), lambda i: (i, 0, 0)),
        compiler_params=pltpu.CompilerParams(dimension_semantics=("parallel",)),
    )(x1, params["bn_g"], params["bn_b"],
      tp["w1"], tp["b1"], tp["bn1_g"], tp["bn1_b"],
      tp["w2"], tp["b2"], tp["bn2_g"], tp["bn2_b"],
      w3p, b3p)
    return out[..., :fout]


# ----------------------------------------------------------------------------
# Model forward (batch-major layout everywhere; no JAX-side transposes / relayouts)
# ----------------------------------------------------------------------------

def positional_encoding(max_len, d_model):
    position = jnp.arange(max_len, dtype=jnp.float32)[:, None]
    div_term = jnp.exp(jnp.arange(0, d_model, 2, dtype=jnp.float32) * (-math.log(10000.0) / d_model))
    pe = jnp.zeros((max_len, d_model), dtype=jnp.float32)
    pe = pe.at[:, 0::2].set(jnp.sin(position * div_term))
    cos = jnp.cos(position * div_term)
    if d_model % 2 == 0:
        pe = pe.at[:, 1::2].set(cos)
    else:
        pe = pe.at[:, 1::2].set(cos[:, :-1])
    return pe  # (max_len, d_model)


def multitask_transformer_forward(params, x, task_type="classification", *, nhead):
    # x: (batch, seq_len, input_size)
    B, S, F = x.shape
    pe = params["pe"]
    bt = _pick_bt(B)

    # Trunk nets (Linear + BN + PosEnc + BN fused; t2 contracts over time in-kernel).
    x1 = trunk_forward(x, params["t1"], pe[:S], contract_time=False, bt=bt)   # (B, S, E)
    x2 = trunk_forward(x, params["t2"], pe[:F], contract_time=True, bt=bt)    # (B, F, E)

    # Shared transformer encoder stack (single pallas_call over (batch_blocks, nlayers)).
    x1, attn1 = encoder_stack_forward(x1, params["encoder"], nhead=nhead, bt=bt)   # attn1: (B, S, S)
    _, attn2 = encoder_stack_forward(x2, params["encoder"], nhead=nhead, bt=bt)    # attn2: (B, F, F)

    time_weights_sum = jnp.sum(attn1, axis=1) - jnp.diagonal(attn1, axis1=1, axis2=2)     # (B, S)
    feature_weights_sum = jnp.sum(attn2, axis=1) - jnp.diagonal(attn2, axis1=1, axis2=2)  # (B, F)
    attn = time_weights_sum[:, :, None] * feature_weights_sum[:, None, :]                 # (B, S, F)

    if task_type == "reconstruction":
        output = tar_head_forward(x1, params, bt=bt)      # (B, S, F); model batch_norm fused inside
    elif task_type == "classification":
        output = class_head_forward(x1, params, bt=bt)    # (B, nclasses); model batch_norm fused inside
    else:
        # TODO(synk): reg_net head is not constructed when task_type == 'classification' in the reference.
        raise NotImplementedError("regression head not constructed for this configuration")
    return output, attn


# ----------------------------------------------------------------------------
# Deterministic parameter initialization (shapes match the torch module)
# ----------------------------------------------------------------------------

def init_params(key, *, nclasses, seq_len, batch, input_size, emb_size,
                nhead, nhid, nhid_tar, nhid_task, nlayers, dtype=jnp.float32):
    """dtype controls matmul-weight storage (use jnp.bfloat16 on v6e/v7x if desired);
    BN/LN params, biases and all element-wise math stay float32."""
    assert emb_size % nhead == 0
    keys = iter(jax.random.split(key, 256))
    nk = lambda: next(keys)
    D = emb_size // nhead

    def lin(k_in, k_out):
        w = jax.random.normal(nk(), (k_in, k_out), jnp.float32) / math.sqrt(k_in)
        return w.astype(dtype), jnp.zeros((1, k_out), jnp.float32)

    def bn_batch():
        # Per-batch-element affine params as flat (B,) arrays -> SMEM scalars inside kernels.
        return jnp.ones((batch,), jnp.float32), jnp.zeros((batch,), jnp.float32)

    params = {"masking_threshold": jnp.float32(0.15)}  # present in the module; unused in forward
    params["pe"] = positional_encoding(max(5000, seq_len, input_size), emb_size)

    for name, k_in in (("t1", input_size), ("t2", seq_len)):
        t = {}
        t["w"], t["b"] = lin(k_in, emb_size)
        t["g1"], t["b1"] = bn_batch()
        t["g2"], t["b2"] = bn_batch()
        params[name] = t

    scale = 1.0 / math.sqrt(D)
    wqkv_l, bqkv_l, wo_l, bo_l = [], [], [], []
    w1_l, b1_l, w2_l, b2_l = [], [], [], []
    ln1g_l, ln1b_l, ln2g_l, ln2b_l = [], [], [], []
    for _ in range(nlayers):
        wq, bq = lin(emb_size, emb_size)
        wk, bk = lin(emb_size, emb_size)
        wv, bv = lin(emb_size, emb_size)
        wo, bo = lin(emb_size, emb_size)
        # Fused QKV projection; fold the 1/sqrt(D) attention scale into the Q columns.
        wqkv_l.append(jnp.concatenate([wq * scale, wk, wv], axis=1))      # (E, 3E)
        bqkv_l.append(jnp.concatenate([bq * scale, bk, bv], axis=1))      # (1, 3E)
        wo_l.append(wo)
        bo_l.append(bo)
        w1, b1 = lin(emb_size, nhid)
        w2, b2 = lin(nhid, emb_size)
        w1_l.append(w1); b1_l.append(b1); w2_l.append(w2); b2_l.append(b2)
        ln1g_l.append(jnp.ones((1, emb_size), jnp.float32))
        ln1b_l.append(jnp.zeros((1, emb_size), jnp.float32))
        ln2g_l.append(jnp.ones((1, emb_size), jnp.float32))
        ln2b_l.append(jnp.zeros((1, emb_size), jnp.float32))
    params["encoder"] = {
        "wqkv": jnp.stack(wqkv_l), "bqkv": jnp.stack(bqkv_l),
        "wo": jnp.stack(wo_l), "bo": jnp.stack(bo_l),
        "ln1_g": jnp.stack(ln1g_l), "ln1_b": jnp.stack(ln1b_l),
        "w1": jnp.stack(w1_l), "b1": jnp.stack(b1_l),
        "w2": jnp.stack(w2_l), "b2": jnp.stack(b2_l),
        "ln2_g": jnp.stack(ln2g_l), "ln2_b": jnp.stack(ln2b_l),
    }

    params["bn_g"], params["bn_b"] = bn_batch()   # model-level batch_norm

    tar = {}
    tar["w1"], tar["b1"] = lin(emb_size, nhid_tar)
    tar["bn1_g"], tar["bn1_b"] = bn_batch()
    tar["w2"], tar["b2"] = lin(nhid_tar, nhid_tar)
    tar["bn2_g"], tar["bn2_b"] = bn_batch()
    tar["w3"], tar["b3"] = lin(nhid_tar, input_size)
    params["tar"] = tar

    cn = {}
    cn["w1"], cn["b1"] = lin(emb_size, nhid_task)
    cn["bn1_g"], cn["bn1_b"] = bn_batch()
    cn["w2"], cn["b2"] = lin(nhid_task, nhid_task)
    cn["bn2_g"], cn["bn2_b"] = bn_batch()
    cn["w3"], cn["b3"] = lin(nhid_task, nclasses)
    params["class_net"] = cn
    return params


# ----------------------------------------------------------------------------
# Demo
# ----------------------------------------------------------------------------

if __name__ == "__main__":
    batch, seq_len, input_size = 2, 8, 16
    emb_size, nhead, nhid = 32, 4, 64
    nhid_tar, nhid_task, nlayers, nclasses = 32, 32, 2, 4

    key = jax.random.PRNGKey(0)
    pkey, xkey = jax.random.split(key)
    params = init_params(
        pkey, nclasses=nclasses, seq_len=seq_len, batch=batch, input_size=input_size,
        emb_size=emb_size, nhead=nhead, nhid=nhid, nhid_tar=nhid_tar,
        nhid_task=nhid_task, nlayers=nlayers,
    )
    x = jax.random.normal(xkey, (batch, seq_len, input_size), jnp.float32)

    fwd = jax.jit(multitask_transformer_forward, static_argnames=("task_type", "nhead"))
    out_cls, attn = fwd(params, x, task_type="classification", nhead=nhead)
    out_rec, _ = fwd(params, x, task_type="reconstruction", nhead=nhead)
    jax.block_until_ready((out_cls, out_rec, attn))

    assert out_cls.shape == (batch, nclasses)
    assert out_rec.shape == (batch, seq_len, input_size)
    assert attn.shape == (batch, seq_len, input_size)
    assert bool(jnp.all(jnp.isfinite(out_cls)))
    assert bool(jnp.all(jnp.isfinite(out_rec)))
    assert bool(jnp.all(jnp.isfinite(attn)))
    print("KERNEL_OK")
</pallas_src>

<mosaic_0001>
module attributes {stable_mosaic.version = 11 : i64} {
  func.func @_trunk_kernel(%arg0: i32, %arg1: memref<1x8x16xf32, #tpu.memory_space<vmem>>, %arg2: memref<16x32xf32, #tpu.memory_space<vmem>>, %arg3: memref<1x32xf32, #tpu.memory_space<vmem>>, %arg4: memref<8x32xf32, #tpu.memory_space<vmem>>, %arg5: memref<2xf32, #tpu.memory_space<smem>>, %arg6: memref<2xf32, #tpu.memory_space<smem>>, %arg7: memref<2xf32, #tpu.memory_space<smem>>, %arg8: memref<2xf32, #tpu.memory_space<smem>>, %arg9: memref<1x8x32xf32, #tpu.memory_space<vmem>>) attributes {dimension_semantics = [#tpu.dimension_semantics<parallel>], iteration_bounds = array<i64: 2>, scalar_prefetch = 0 : i64, scratch_operands = 0 : i64, tpu.core_type = #tpu.core_type<tc>, window_params = [{transform_indices = @transform_0, window_bounds = array<i64: 1, 8, 16>}, {pipeline_mode = #tpu.pipeline_mode<synchronous>, transform_indices = @transform_1, window_bounds = array<i64: 16, 32>}, {pipeline_mode = #tpu.pipeline_mode<synchronous>, transform_indices = @transform_2, window_bounds = array<i64: 1, 32>}, {pipeline_mode = #tpu.pipeline_mode<synchronous>, transform_indices = @transform_3, window_bounds = array<i64: 8, 32>}, {transform_indices = @transform_4, window_bounds = array<i64: 2>}, {transform_indices = @transform_5, window_bounds = array<i64: 2>}, {transform_indices = @transform_6, window_bounds = array<i64: 2>}, {transform_indices = @transform_7, window_bounds = array<i64: 2>}, {transform_indices = @transform_8, window_bounds = array<i64: 1, 8, 32>}]} {
    %c0 = arith.constant 0 : index
    %c0_0 = arith.constant 0 : index
    %0 = vector.load %arg2[%c0, %c0_0] : memref<16x32xf32, #tpu.memory_space<vmem>>, vector<16x32xf32>
    %c0_1 = arith.constant 0 : index
    %c0_2 = arith.constant 0 : index
    %1 = vector.load %arg3[%c0_1, %c0_2] : memref<1x32xf32, #tpu.memory_space<vmem>>, vector<1x32xf32>
    %c0_3 = arith.constant 0 : index
    %c0_4 = arith.constant 0 : index
    %2 = vector.load %arg4[%c0_3, %c0_4] : memref<8x32xf32, #tpu.memory_space<vmem>>, vector<8x32xf32>
    %c0_5 = arith.constant 0 : index
    %c0_6 = arith.constant 0 : index
    %c0_7 = arith.constant 0 : index
    %3 = vector.load %arg1[%c0_5, %c0_6, %c0_7] : memref<1x8x16xf32, #tpu.memory_space<vmem>>, vector<1x8x16xf32>
    %4 = vector.shape_cast %3 : vector<1x8x16xf32> to vector<8x16xf32>
    %cst = arith.constant dense<0.000000e+00> : vector<8x32xf32>
    %5 = tpu.matmul %4, %0, %cst {dimension_numbers = #tpu.dot_dimension_numbers<[1], [0], [0], [1], [0, 0, 1, 1], [], []>} : vector<8x16xf32>, vector<16x32xf32>, vector<8x32xf32> -> vector<8x32xf32>
    %6 = vector.shape_cast %5 : vector<8x32xf32> to vector<1x8x32xf32>
    %7 = vector.shape_cast %1 : vector<1x32xf32> to vector<1x1x32xf32>
    %8 = vector.broadcast %7 : vector<1x1x32xf32> to vector<1x8x32xf32>
    %9 = arith.addf %6, %8 : vector<1x8x32xf32>
    %c1_i32 = arith.constant 1 : i32
    %10 = arith.muli %arg0, %c1_i32 : i32
    %c0_i32 = arith.constant 0 : i32
    %11 = arith.addi %10, %c0_i32 : i32
    %12 = vector.shape_cast %9 : vector<1x8x32xf32> to vector<8x32xf32>
    %13 = arith.index_cast %11 : i32 to index
    %14 = memref.load %arg5[%13] : memref<2xf32, #tpu.memory_space<smem>>
    %15 = arith.index_cast %11 : i32 to index
    %16 = memref.load %arg6[%15] : memref<2xf32, #tpu.memory_space<smem>>
    %cst_8 = arith.constant dense<0.000000e+00> : vector<8xf32>
    %17 = vector.multi_reduction <add>, %12, %cst_8 [1] : vector<8x32xf32> to vector<8xf32>
    %18 = vector.shape_cast %17 : vector<8xf32> to vector<8x1xf32>
    %cst_9 = arith.constant 3.200000e+01 : f32
    %19 = vector.broadcast %cst_9 : f32 to vector<8x1xf32>
    %20 = arith.divf %18, %19 : vector<8x1xf32>
    %cst_10 = arith.constant dense<0.000000e+00> : vector<1xf32>
    %21 = vector.multi_reduction <add>, %20, %cst_10 [0] : vector<8x1xf32> to vector<1xf32>
    %22 = vector.shape_cast %21 : vector<1xf32> to vector<1x1xf32>
    %cst_11 = arith.constant 8.000000e+00 : f32
    %23 = vector.broadcast %cst_11 : f32 to vector<1x1xf32>
    %24 = arith.divf %22, %23 : vector<1x1xf32>
    %25 = vector.broadcast %24 : vector<1x1xf32> to vector<8x32xf32>
    %26 = arith.subf %12, %25 : vector<8x32xf32>
    %27 = arith.mulf %26, %26 : vector<8x32xf32>
    %cst_12 = arith.constant dense<0.000000e+00> : vector<8xf32>
    %28 = vector.multi_reduction <add>, %27, %cst_12 [1] : vector<8x32xf32> to vector<8xf32>
    %29 = vector.shape_cast %28 : vector<8xf32> to vector<8x1xf32>
    %cst_13 = arith.constant 3.200000e+01 : f32
    %30 = vector.broadcast %cst_13 : f32 to vector<8x1xf32>
    %31 = arith.divf %29, %30 : vector<8x1xf32>
    %cst_14 = arith.constant dense<0.000000e+00> : vector<1xf32>
    %32 = vector.multi_reduction <add>, %31, %cst_14 [0] : vector<8x1xf32> to vector<1xf32>
    %33 = vector.shape_cast %32 : vector<1xf32> to vector<1x1xf32>
    %cst_15 = arith.constant 8.000000e+00 : f32
    %34 = vector.broadcast %cst_15 : f32 to vector<1x1xf32>
    %35 = arith.divf %33, %34 : vector<1x1xf32>
    %cst_16 = arith.constant 9.99999974E-6 : f32
    %36 = vector.broadcast %cst_16 : f32 to vector<1x1xf32>
    %37 = arith.addf %35, %36 : vector<1x1xf32>
    %38 = math.rsqrt %37 : vector<1x1xf32>
    %39 = vector.broadcast %38 : vector<1x1xf32> to vector<8x32xf32>
    %40 = arith.mulf %26, %39 : vector<8x32xf32>
    %41 = vector.broadcast %14 : f32 to vector<8x32xf32>
    %42 = arith.mulf %40, %41 : vector<8x32xf32>
    %43 = vector.broadcast %16 : f32 to vector<8x32xf32>
    %44 = arith.addf %42, %43 : vector<8x32xf32>
    %45 = arith.addf %44, %2 : vector<8x32xf32>
    %46 = arith.index_cast %11 : i32 to index
    %47 = memref.load %arg7[%46] : memref<2xf32, #tpu.memory_space<smem>>
    %48 = arith.index_cast %11 : i32 to index
    %49 = memref.load %arg8[%48] : memref<2xf32, #tpu.memory_space<smem>>
    %cst_17 = arith.constant dense<0.000000e+00> : vector<8xf32>
    %50 = vector.multi_reduction <add>, %45, %cst_17 [1] : vector<8x32xf32> to vector<8xf32>
    %51 = vector.shape_cast %50 : vector<8xf32> to vector<8x1xf32>
    %cst_18 = arith.constant 3.200000e+01 : f32
    %52 = vector.broadcast %cst_18 : f32 to vector<8x1xf32>
    %53 = arith.divf %51, %52 : vector<8x1xf32>
    %cst_19 = arith.constant dense<0.000000e+00> : vector<1xf32>
    %54 = vector.multi_reduction <add>, %53, %cst_19 [0] : vector<8x1xf32> to vector<1xf32>
    %55 = vector.shape_cast %54 : vector<1xf32> to vector<1x1xf32>
    %cst_20 = arith.constant 8.000000e+00 : f32
    %56 = vector.broadcast %cst_20 : f32 to vector<1x1xf32>
    %57 = arith.divf %55, %56 : vector<1x1xf32>
    %58 = vector.broadcast %57 : vector<1x1xf32> to vector<8x32xf32>
    %59 = arith.subf %45, %58 : vector<8x32xf32>
    %60 = arith.mulf %59, %59 : vector<8x32xf32>
    %cst_21 = arith.constant dense<0.000000e+00> : vector<8xf32>
    %61 = vector.multi_reduction <add>, %60, %cst_21 [1] : vector<8x32xf32> to vector<8xf32>
    %62 = vector.shape_cast %61 : vector<8xf32> to vector<8x1xf32>
    %cst_22 = arith.constant 3.200000e+01 : f32
    %63 = vector.broadcast %cst_22 : f32 to vector<8x1xf32>
    %64 = arith.divf %62, %63 : vector<8x1xf32>
    %cst_23 = arith.constant dense<0.000000e+00> : vector<1xf32>
    %65 = vector.multi_reduction <add>, %64, %cst_23 [0] : vector<8x1xf32> to vector<1xf32>
    %66 = vector.shape_cast %65 : vector<1xf32> to vector<1x1xf32>
    %cst_24 = arith.constant 8.000000e+00 : f32
    %67 = vector.broadcast %cst_24 : f32 to vector<1x1xf32>
    %68 = arith.divf %66, %67 : vector<1x1xf32>
    %cst_25 = arith.constant 9.99999974E-6 : f32
    %69 = vector.broadcast %cst_25 : f32 to vector<1x1xf32>
    %70 = arith.addf %68, %69 : vector<1x1xf32>
    %71 = math.rsqrt %70 : vector<1x1xf32>
    %72 = vector.broadcast %71 : vector<1x1xf32> to vector<8x32xf32>
    %73 = arith.mulf %59, %72 : vector<8x32xf32>
    %74 = vector.broadcast %47 : f32 to vector<8x32xf32>
    %75 = arith.mulf %73, %74 : vector<8x32xf32>
    %76 = vector.broadcast %49 : f32 to vector<8x32xf32>
    %77 = arith.addf %75, %76 : vector<8x32xf32>
    %c0_26 = arith.constant 0 : index
    %c0_27 = arith.constant 0 : index
    %c0_28 = arith.constant 0 : index
    %78 = vector.load %arg9[%c0_26, %c0_27, %c0_28] : memref<1x8x32xf32, #tpu.memory_space<vmem>>, vector<1x8x32xf32>
    %79 = vector.shape_cast %78 : vector<1x8x32xf32> to vector<8x32xf32>
    %80 = vector.shape_cast %77 : vector<8x32xf32> to vector<1x8x32xf32>
    tpu.vector_store %arg9[%c0_26, %c0_27, %c0_28], %80 {strides = array<i32>} : memref<1x8x32xf32, #tpu.memory_space<vmem>>, vector<1x8x32xf32>,
    return
  }
  func.func @transform_0(%arg0: i32) -> (i32, i32, i32) {
    %c0_i32 = arith.constant 0 : i32
    %c0_i32_0 = arith.constant 0 : i32
    %c0_i32_1 = arith.constant 0 : i32
    return %arg0, %c0_i32, %c0_i32_0 : i32, i32, i32
  }
  func.func @transform_1(%arg0: i32) -> (i32, i32) {
    %c0_i32 = arith.constant 0 : i32
    %c0_i32_0 = arith.constant 0 : i32
    %c0_i32_1 = arith.constant 0 : i32
    return %c0_i32, %c0_i32_0 : i32, i32
  }
  func.func @transform_2(%arg0: i32) -> (i32, i32) {
    %c0_i32 = arith.constant 0 : i32
    %c0_i32_0 = arith.constant 0 : i32
    %c0_i32_1 = arith.constant 0 : i32
    return %c0_i32, %c0_i32_0 : i32, i32
  }
  func.func @transform_3(%arg0: i32) -> (i32, i32) {
    %c0_i32 = arith.constant 0 : i32
    %c0_i32_0 = arith.constant 0 : i32
    %c0_i32_1 = arith.constant 0 : i32
    return %c0_i32, %c0_i32_0 : i32, i32
  }
  func.func @transform_4(%arg0: i32) -> i32 {
    %c0_i32 = arith.constant 0 : i32
    %c0_i32_0 = arith.constant 0 : i32
    return %c0_i32 : i32
  }
  func.func @transform_5(%arg0: i32) -> i32 {
    %c0_i32 = arith.constant 0 : i32
    %c0_i32_0 = arith.constant 0 : i32
    return %c0_i32 : i32
  }
  func.func @transform_6(%arg0: i32) -> i32 {
    %c0_i32 = arith.constant 0 : i32
    %c0_i32_0 = arith.constant 0 : i32
    return %c0_i32 : i32
  }
  func.func @transform_7(%arg0: i32) -> i32 {
    %c0_i32 = arith.constant 0 : i32
    %c0_i32_0 = arith.constant 0 : i32
    return %c0_i32 : i32
  }
  func.func @transform_8(%arg0: i32) -> (i32, i32, i32) {
    %c0_i32 = arith.constant 0 : i32
    %c0_i32_0 = arith.constant 0 : i32
    %c0_i32_1 = arith.constant 0 : i32
    return %arg0, %c0_i32, %c0_i32_0 : i32, i32, i32
  }
}

module attributes {stable_mosaic.version = 11 : i64} {
  func.func @_trunk_kernel(%arg0: i32, %arg1: memref<1x8x16xf32, #tpu.memory_space<vmem>>, %arg2: memref<8x32xf32, #tpu.memory_space<vmem>>, %arg3: memref<1x32xf32, #tpu.memory_space<vmem>>, %arg4: memref<16x32xf32, #tpu.memory_space<vmem>>, %arg5: memref<2xf32, #tpu.memory_space<smem>>, %arg6: memref<2xf32, #tpu.memory_space<smem>>, %arg7: memref<2xf32, #tpu.memory_space<smem>>, %arg8: memref<2xf32, #tpu.memory_space<smem>>, %arg9: memref<1x16x32xf32, #tpu.memory_space<vmem>>) attributes {dimension_semantics = [#tpu.dimension_semantics<parallel>], iteration_bounds = array<i64: 2>, scalar_prefetch = 0 : i64, scratch_operands = 0 : i64, tpu.core_type = #tpu.core_type<tc>, window_params = [{transform_indices = @transform_0, window_bounds = array<i64: 1, 8, 16>}, {pipeline_mode = #tpu.pipeline_mode<synchronous>, transform_indices = @transform_1, window_bounds = array<i64: 8, 32>}, {pipeline_mode = #tpu.pipeline_mode<synchronous>, transform_indices = @transform_2, window_bounds = array<i64: 1, 32>}, {pipeline_mode = #tpu.pipeline_mode<synchronous>, transform_indices = @transform_3, window_bounds = array<i64: 16, 32>}, {transform_indices = @transform_4, window_bounds = array<i64: 2>}, {transform_indices = @transform_5, window_bounds = array<i64: 2>}, {transform_indices = @transform_6, window_bounds = array<i64: 2>}, {transform_indices = @transform_7, window_bounds = array<i64: 2>}, {transform_indices = @transform_8, window_bounds = array<i64: 1, 16, 32>}]} {
    %c0 = arith.constant 0 : index
    %c0_0 = arith.constant 0 : index
    %0 = vector.load %arg2[%c0, %c0_0] : memref<8x32xf32, #tpu.memory_space<vmem>>, vector<8x32xf32>
    %c0_1 = arith.constant 0 : index
    %c0_2 = arith.constant 0 : index
    %1 = vector.load %arg3[%c0_1, %c0_2] : memref<1x32xf32, #tpu.memory_space<vmem>>, vector<1x32xf32>
    %c0_3 = arith.constant 0 : index
    %c0_4 = arith.constant 0 : index
    %2 = vector.load %arg4[%c0_3, %c0_4] : memref<16x32xf32, #tpu.memory_space<vmem>>, vector<16x32xf32>
    %c1_i32 = arith.constant 1 : i32
    %3 = arith.muli %arg0, %c1_i32 : i32
    %c0_i32 = arith.constant 0 : i32
    %4 = arith.addi %3, %c0_i32 : i32
    %c0_5 = arith.constant 0 : index
    %c0_6 = arith.constant 0 : index
    %c0_7 = arith.constant 0 : index
    %5 = vector.load %arg1[%c0_5, %c0_6, %c0_7] : memref<1x8x16xf32, #tpu.memory_space<vmem>>, vector<1x8x16xf32>
    %6 = vector.shape_cast %5 : vector<1x8x16xf32> to vector<8x16xf32>
    %cst = arith.constant dense<0.000000e+00> : vector<16x32xf32>
    %7 = tpu.matmul %6, %0, %cst {dimension_numbers = #tpu.dot_dimension_numbers<[0], [0], [1], [1], [0, 1, 1, 1], [], []>} : vector<8x16xf32>, vector<8x32xf32>, vector<16x32xf32> -> vector<16x32xf32>
    %8 = vector.broadcast %1 : vector<1x32xf32> to vector<16x32xf32>
    %9 = arith.addf %7, %8 : vector<16x32xf32>
    %10 = arith.index_cast %4 : i32 to index
    %11 = memref.load %arg5[%10] : memref<2xf32, #tpu.memory_space<smem>>
    %12 = arith.index_cast %4 : i32 to index
    %13 = memref.load %arg6[%12] : memref<2xf32, #tpu.memory_space<smem>>
    %cst_8 = arith.constant dense<0.000000e+00> : vector<16xf32>
    %14 = vector.multi_reduction <add>, %9, %cst_8 [1] : vector<16x32xf32> to vector<16xf32>
    %15 = vector.shape_cast %14 : vector<16xf32> to vector<16x1xf32>
    %cst_9 = arith.constant 3.200000e+01 : f32
    %16 = vector.broadcast %cst_9 : f32 to vector<16x1xf32>
    %17 = arith.divf %15, %16 : vector<16x1xf32>
    %cst_10 = arith.constant dense<0.000000e+00> : vector<1xf32>
    %18 = vector.multi_reduction <add>, %17, %cst_10 [0] : vector<16x1xf32> to vector<1xf32>
    %19 = vector.shape_cast %18 : vector<1xf32> to vector<1x1xf32>
    %cst_11 = arith.constant 1.600000e+01 : f32
    %20 = vector.broadcast %cst_11 : f32 to vector<1x1xf32>
    %21 = arith.divf %19, %20 : vector<1x1xf32>
    %22 = vector.broadcast %21 : vector<1x1xf32> to vector<16x32xf32>
    %23 = arith.subf %9, %22 : vector<16x32xf32>
    %24 = arith.mulf %23, %23 : vector<16x32xf32>
    %cst_12 = arith.constant dense<0.000000e+00> : vector<16xf32>
    %25 = vector.multi_reduction <add>, %24, %cst_12 [1] : vector<16x32xf32> to vector<16xf32>
    %26 = vector.shape_cast %25 : vector<16xf32> to vector<16x1xf32>
    %cst_13 = arith.constant 3.200000e+01 : f32
    %27 = vector.broadcast %cst_13 : f32 to vector<16x1xf32>
    %28 = arith.divf %26, %27 : vector<16x1xf32>
    %cst_14 = arith.constant dense<0.000000e+00> : vector<1xf32>
    %29 = vector.multi_reduction <add>, %28, %cst_14 [0] : vector<16x1xf32> to vector<1xf32>
    %30 = vector.shape_cast %29 : vector<1xf32> to vector<1x1xf32>
    %cst_15 = arith.constant 1.600000e+01 : f32
    %31 = vector.broadcast %cst_15 : f32 to vector<1x1xf32>
    %32 = arith.divf %30, %31 : vector<1x1xf32>
    %cst_16 = arith.constant 9.99999974E-6 : f32
    %33 = vector.broadcast %cst_16 : f32 to vector<1x1xf32>
    %34 = arith.addf %32, %33 : vector<1x1xf32>
    %35 = math.rsqrt %34 : vector<1x1xf32>
    %36 = vector.broadcast %35 : vector<1x1xf32> to vector<16x32xf32>
    %37 = arith.mulf %23, %36 : vector<16x32xf32>
    %38 = vector.broadcast %11 : f32 to vector<16x32xf32>
    %39 = arith.mulf %37, %38 : vector<16x32xf32>
    %40 = vector.broadcast %13 : f32 to vector<16x32xf32>
    %41 = arith.addf %39, %40 : vector<16x32xf32>
    %42 = arith.addf %41, %2 : vector<16x32xf32>
    %43 = arith.index_cast %4 : i32 to index
    %44 = memref.load %arg7[%43] : memref<2xf32, #tpu.memory_space<smem>>
    %45 = arith.index_cast %4 : i32 to index
    %46 = memref.load %arg8[%45] : memref<2xf32, #tpu.memory_space<smem>>
    %cst_17 = arith.constant dense<0.000000e+00> : vector<16xf32>
    %47 = vector.multi_reduction <add>, %42, %cst_17 [1] : vector<16x32xf32> to vector<16xf32>
    %48 = vector.shape_cast %47 : vector<16xf32> to vector<16x1xf32>
    %cst_18 = arith.constant 3.200000e+01 : f32
    %49 = vector.broadcast %cst_18 : f32 to vector<16x1xf32>
    %50 = arith.divf %48, %49 : vector<16x1xf32>
    %cst_19 = arith.constant dense<0.000000e+00> : vector<1xf32>
    %51 = vector.multi_reduction <add>, %50, %cst_19 [0] : vector<16x1xf32> to vector<1xf32>
    %52 = vector.shape_cast %51 : vector<1xf32> to vector<1x1xf32>
    %cst_20 = arith.constant 1.600000e+01 : f32
    %53 = vector.broadcast %cst_20 : f32 to vector<1x1xf32>
    %54 = arith.divf %52, %53 : vector<1x1xf32>
    %55 = vector.broadcast %54 : vector<1x1xf32> to vector<16x32xf32>
    %56 = arith.subf %42, %55 : vector<16x32xf32>
    %57 = arith.mulf %56, %56 : vector<16x32xf32>
    %cst_21 = arith.constant dense<0.000000e+00> : vector<16xf32>
    %58 = vector.multi_reduction <add>, %57, %cst_21 [1] : vector<16x32xf32> to vector<16xf32>
    %59 = vector.shape_cast %58 : vector<16xf32> to vector<16x1xf32>
    %cst_22 = arith.constant 3.200000e+01 : f32
    %60 = vector.broadcast %cst_22 : f32 to vector<16x1xf32>
    %61 = arith.divf %59, %60 : vector<16x1xf32>
    %cst_23 = arith.constant dense<0.000000e+00> : vector<1xf32>
    %62 = vector.multi_reduction <add>, %61, %cst_23 [0] : vector<16x1xf32> to vector<1xf32>
    %63 = vector.shape_cast %62 : vector<1xf32> to vector<1x1xf32>
    %cst_24 = arith.constant 1.600000e+01 : f32
    %64 = vector.broadcast %cst_24 : f32 to vector<1x1xf32>
    %65 = arith.divf %63, %64 : vector<1x1xf32>
    %cst_25 = arith.constant 9.99999974E-6 : f32
    %66 = vector.broadcast %cst_25 : f32 to vector<1x1xf32>
    %67 = arith.addf %65, %66 : vector<1x1xf32>
    %68 = math.rsqrt %67 : vector<1x1xf32>
    %69 = vector.broadcast %68 : vector<1x1xf32> to vector<16x32xf32>
    %70 = arith.mulf %56, %69 : vector<16x32xf32>
    %71 = vector.broadcast %44 : f32 to vector<16x32xf32>
    %72 = arith.mulf %70, %71 : vector<16x32xf32>
    %73 = vector.broadcast %46 : f32 to vector<16x32xf32>
    %74 = arith.addf %72, %73 : vector<16x32xf32>
    %c0_26 = arith.constant 0 : index
    %c0_27 = arith.constant 0 : index
    %c0_28 = arith.constant 0 : index
    %75 = vector.load %arg9[%c0_26, %c0_27, %c0_28] : memref<1x16x32xf32, #tpu.memory_space<vmem>>, vector<1x16x32xf32>
    %76 = vector.shape_cast %75 : vector<1x16x32xf32> to vector<16x32xf32>
    %77 = vector.shape_cast %74 : vector<16x32xf32> to vector<1x16x32xf32>
    tpu.vector_store %arg9[%c0_26, %c0_27, %c0_28], %77 {strides = array<i32>} : memref<1x16x32xf32, #tpu.memory_space<vmem>>, vector<1x16x32xf32>,
    return
  }
  func.func @transform_0(%arg0: i32) -> (i32, i32, i32) {
    %c0_i32 = arith.constant 0 : i32
    %c0_i32_0 = arith.constant 0 : i32
    %c0_i32_1 = arith.constant 0 : i32
    return %arg0, %c0_i32, %c0_i32_0 : i32, i32, i32
  }
  func.func @transform_1(%arg0: i32) -> (i32, i32) {
    %c0_i32 = arith.constant 0 : i32
    %c0_i32_0 = arith.constant 0 : i32
    %c0_i32_1 = arith.constant 0 : i32
    return %c0_i32, %c0_i32_0 : i32, i32
  }
  func.func @transform_2(%arg0: i32) -> (i32, i32) {
    %c0_i32 = arith.constant 0 : i32
    %c0_i32_0 = arith.constant 0 : i32
    %c0_i32_1 = arith.constant 0 : i32
    return %c0_i32, %c0_i32_0 : i32, i32
  }
  func.func @transform_3(%arg0: i32) -> (i32, i32) {
    %c0_i32 = arith.constant 0 : i32
    %c0_i32_0 = arith.constant 0 : i32
    %c0_i32_1 = arith.constant 0 : i32
    return %c0_i32, %c0_i32_0 : i32, i32
  }
  func.func @transform_4(%arg0: i32) -> i32 {
    %c0_i32 = arith.constant 0 : i32
    %c0_i32_0 = arith.constant 0 : i32
    return %c0_i32 : i32
  }
  func.func @transform_5(%arg0: i32) -> i32 {
    %c0_i32 = arith.constant 0 : i32
    %c0_i32_0 = arith.constant 0 : i32
    return %c0_i32 : i32
  }
  func.func @transform_6(%arg0: i32) -> i32 {
    %c0_i32 = arith.constant 0 : i32
    %c0_i32_0 = arith.constant 0 : i32
    return %c0_i32 : i32
  }
  func.func @transform_7(%arg0: i32) -> i32 {
    %c0_i32 = arith.constant 0 : i32
    %c0_i32_0 = arith.constant 0 : i32
    return %c0_i32 : i32
  }
  func.func @transform_8(%arg0: i32) -> (i32, i32, i32) {
    %c0_i32 = arith.constant 0 : i32
    %c0_i32_0 = arith.constant 0 : i32
    %c0_i32_1 = arith.constant 0 : i32
    return %arg0, %c0_i32, %c0_i32_0 : i32, i32, i32
  }
}

module attributes {stable_mosaic.version = 11 : i64} {
  func.func @_encoder_stack_kernel(%arg0: i32, %arg1: i32, %arg2: memref<1x8x32xf32, #tpu.memory_space<vmem>>, %arg3: memref<1x32x96xf32, #tpu.memory_space<vmem>>, %arg4: memref<1x1x96xf32, #tpu.memory_space<vmem>>, %arg5: memref<1x32x32xf32, #tpu.memory_space<vmem>>, %arg6: memref<1x1x32xf32, #tpu.memory_space<vmem>>, %arg7: memref<1x1x32xf32, #tpu.memory_space<vmem>>, %arg8: memref<1x1x32xf32, #tpu.memory_space<vmem>>, %arg9: memref<1x32x64xf32, #tpu.memory_space<vmem>>, %arg10: memref<1x1x64xf32, #tpu.memory_space<vmem>>, %arg11: memref<1x64x32xf32, #tpu.memory_space<vmem>>, %arg12: memref<1x1x32xf32, #tpu.memory_space<vmem>>, %arg13: memref<1x1x32xf32, #tpu.memory_space<vmem>>, %arg14: memref<1x1x32xf32, #tpu.memory_space<vmem>>, %arg15: memref<1x8x32xf32, #tpu.memory_space<vmem>>, %arg16: memref<1x8x8xf32, #tpu.memory_space<vmem>>, %arg17: memref<1x8x32xf32, #tpu.memory_space<vmem>>) attributes {dimension_semantics = [#tpu.dimension_semantics<parallel>, #tpu.dimension_semantics<arbitrary>], iteration_bounds = array<i64: 2, 2>, scalar_prefetch = 0 : i64, scratch_operands = 1 : i64, tpu.core_type = #tpu.core_type<tc>, window_params = [{transform_indices = @transform_0, window_bounds = array<i64: 1, 8, 32>}, {transform_indices = @transform_1, window_bounds = array<i64: 1, 32, 96>}, {transform_indices = @transform_2, window_bounds = array<i64: 1, 1, 96>}, {transform_indices = @transform_3, window_bounds = array<i64: 1, 32, 32>}, {transform_indices = @transform_4, window_bounds = array<i64: 1, 1, 32>}, {transform_indices = @transform_5, window_bounds = array<i64: 1, 1, 32>}, {transform_indices = @transform_6, window_bounds = array<i64: 1, 1, 32>}, {transform_indices = @transform_7, window_bounds = array<i64: 1, 32, 64>}, {transform_indices = @transform_8, window_bounds = array<i64: 1, 1, 64>}, {transform_indices = @transform_9, window_bounds = array<i64: 1, 64, 32>}, {transform_indices = @transform_10, window_bounds = array<i64: 1, 1, 32>}, {transform_indices = @transform_11, window_bounds = array<i64: 1, 1, 32>}, {transform_indices = @transform_12, window_bounds = array<i64: 1, 1, 32>}, {transform_indices = @transform_13, window_bounds = array<i64: 1, 8, 32>}, {transform_indices = @transform_14, window_bounds = array<i64: 1, 8, 8>}]} {
    %c0_i32 = arith.constant 0 : i32
    %0 = arith.cmpi eq, %arg1, %c0_i32 : i32
    %1 = arith.extui %0 : i1 to i32
    %c0_i32_0 = arith.constant 0 : i32
    %2 = arith.cmpi ne, %1, %c0_i32_0 : i32
    scf.if %2 {
      %c0_74 = arith.constant 0 : index
      %c0_75 = arith.constant 0 : index
      %c0_76 = arith.constant 0 : index
      %154 = vector.load %arg2[%c0_74, %c0_75, %c0_76] : memref<1x8x32xf32, #tpu.memory_space<vmem>>, vector<1x8x32xf32>
      %c0_77 = arith.constant 0 : index
      %c0_78 = arith.constant 0 : index
      %c0_79 = arith.constant 0 : index
      %155 = vector.load %arg17[%c0_77, %c0_78, %c0_79] : memref<1x8x32xf32, #tpu.memory_space<vmem>>, vector<1x8x32xf32>
      tpu.vector_store %arg17[%c0_77, %c0_78, %c0_79], %154 {strides = array<i32>} : memref<1x8x32xf32, #tpu.memory_space<vmem>>, vector<1x8x32xf32>,
    } else {
    }
    %c0 = arith.constant 0 : index
    %c0_1 = arith.constant 0 : index
    %c0_2 = arith.constant 0 : index
    %3 = vector.load %arg17[%c0, %c0_1, %c0_2] : memref<1x8x32xf32, #tpu.memory_space<vmem>>, vector<1x8x32xf32>
    %4 = vector.shape_cast %3 : vector<1x8x32xf32> to vector<8x32xf32>
    %c0_3 = arith.constant 0 : index
    %c0_4 = arith.constant 0 : index
    %c0_5 = arith.constant 0 : index
    %5 = vector.load %arg3[%c0_3, %c0_4, %c0_5] : memref<1x32x96xf32, #tpu.memory_space<vmem>>, vector<1x32x96xf32>
    %6 = vector.shape_cast %5 : vector<1x32x96xf32> to vector<32x96xf32>
    %cst = arith.constant dense<0.000000e+00> : vector<8x96xf32>
    %7 = tpu.matmul %4, %6, %cst {dimension_numbers = #tpu.dot_dimension_numbers<[1], [0], [0], [1], [0, 0, 1, 1], [], []>} : vector<8x32xf32>, vector<32x96xf32>, vector<8x96xf32> -> vector<8x96xf32>
    %c0_6 = arith.constant 0 : index
    %c0_7 = arith.constant 0 : index
    %c0_8 = arith.constant 0 : index
    %8 = vector.load %arg4[%c0_6, %c0_7, %c0_8] : memref<1x1x96xf32, #tpu.memory_space<vmem>>, vector<1x1x96xf32>
    %9 = vector.shape_cast %8 : vector<1x1x96xf32> to vector<1x96xf32>
    %10 = vector.broadcast %9 : vector<1x96xf32> to vector<8x96xf32>
    %11 = arith.addf %7, %10 : vector<8x96xf32>
    %12 = vector.shape_cast %11 : vector<8x96xf32> to vector<1x8x96xf32>
    %cst_9 = arith.constant 0.000000e+00 : f32
    %13 = vector.broadcast %cst_9 : f32 to vector<1x8x8xf32>
    %14 = vector.extract_strided_slice %12 {offsets = [0, 0, 0], sizes = [1, 8, 8], strides = [1, 1, 1]} : vector<1x8x96xf32> to vector<1x8x8xf32>
    %15 = vector.extract_strided_slice %12 {offsets = [0, 0, 32], sizes = [1, 8, 8], strides = [1, 1, 1]} : vector<1x8x96xf32> to vector<1x8x8xf32>
    %16 = vector.extract_strided_slice %12 {offsets = [0, 0, 64], sizes = [1, 8, 8], strides = [1, 1, 1]} : vector<1x8x96xf32> to vector<1x8x8xf32>
    "tpu.trace_start"() <{level = 10 : i32, message = "bqd,bkd->bqk"}> : () -> ()
    %cst_10 = arith.constant dense<0.000000e+00> : vector<1x8x8xf32>
    %17 = tpu.matmul %14, %15, %cst_10 {dimension_numbers = #tpu.dot_dimension_numbers<[2], [2], [1], [1], [0, 0, 0, 1, 1, 1], [0], [0]>} : vector<1x8x8xf32>, vector<1x8x8xf32>, vector<1x8x8xf32> -> vector<1x8x8xf32>
    "tpu.trace_stop"() : () -> ()
    %cst_11 = arith.constant dense<0xFF800000> : vector<1x8xf32>
    %18 = vector.multi_reduction <maximumf>, %17, %cst_11 [2] : vector<1x8x8xf32> to vector<1x8xf32>
    %19 = vector.shape_cast %18 : vector<1x8xf32> to vector<1x8x1xf32>
    %20 = vector.broadcast %19 : vector<1x8x1xf32> to vector<1x8x8xf32>
    %21 = arith.subf %17, %20 : vector<1x8x8xf32>
    %22 = math.exp %21 : vector<1x8x8xf32>
    %cst_12 = arith.constant dense<0.000000e+00> : vector<1x8xf32>
    %23 = vector.multi_reduction <add>, %22, %cst_12 [2] : vector<1x8x8xf32> to vector<1x8xf32>
    %24 = vector.shape_cast %23 : vector<1x8xf32> to vector<1x8x1xf32>
    %25 = vector.broadcast %24 : vector<1x8x1xf32> to vector<1x8x8xf32>
    %26 = arith.divf %22, %25 : vector<1x8x8xf32>
    "tpu.trace_start"() <{level = 10 : i32, message = "bqk,bkd->bqd"}> : () -> ()
    %cst_13 = arith.constant dense<0.000000e+00> : vector<1x8x8xf32>
    %27 = tpu.matmul %26, %16, %cst_13 {dimension_numbers = #tpu.dot_dimension_numbers<[2], [1], [1], [2], [0, 0, 0, 1, 1, 2], [0], [0]>} : vector<1x8x8xf32>, vector<1x8x8xf32>, vector<1x8x8xf32> -> vector<1x8x8xf32>
    "tpu.trace_stop"() : () -> ()
    %28 = arith.addf %13, %26 : vector<1x8x8xf32>
    %29 = vector.extract_strided_slice %12 {offsets = [0, 0, 8], sizes = [1, 8, 8], strides = [1, 1, 1]} : vector<1x8x96xf32> to vector<1x8x8xf32>
    %30 = vector.extract_strided_slice %12 {offsets = [0, 0, 40], sizes = [1, 8, 8], strides = [1, 1, 1]} : vector<1x8x96xf32> to vector<1x8x8xf32>
    %31 = vector.extract_strided_slice %12 {offsets = [0, 0, 72], sizes = [1, 8, 8], strides = [1, 1, 1]} : vector<1x8x96xf32> to vector<1x8x8xf32>
    "tpu.trace_start"() <{level = 10 : i32, message = "bqd,bkd->bqk"}> : () -> ()
    %cst_14 = arith.constant dense<0.000000e+00> : vector<1x8x8xf32>
    %32 = tpu.matmul %29, %30, %cst_14 {dimension_numbers = #tpu.dot_dimension_numbers<[2], [2], [1], [1], [0, 0, 0, 1, 1, 1], [0], [0]>} : vector<1x8x8xf32>, vector<1x8x8xf32>, vector<1x8x8xf32> -> vector<1x8x8xf32>
    "tpu.trace_stop"() : () -> ()
    %cst_15 = arith.constant dense<0xFF800000> : vector<1x8xf32>
    %33 = vector.multi_reduction <maximumf>, %32, %cst_15 [2] : vector<1x8x8xf32> to vector<1x8xf32>
    %34 = vector.shape_cast %33 : vector<1x8xf32> to vector<1x8x1xf32>
    %35 = vector.broadcast %34 : vector<1x8x1xf32> to vector<1x8x8xf32>
    %36 = arith.subf %32, %35 : vector<1x8x8xf32>
    %37 = math.exp %36 : vector<1x8x8xf32>
    %cst_16 = arith.constant dense<0.000000e+00> : vector<1x8xf32>
    %38 = vector.multi_reduction <add>, %37, %cst_16 [2] : vector<1x8x8xf32> to vector<1x8xf32>
    %39 = vector.shape_cast %38 : vector<1x8xf32> to vector<1x8x1xf32>
    %40 = vector.broadcast %39 : vector<1x8x1xf32> to vector<1x8x8xf32>
    %41 = arith.divf %37, %40 : vector<1x8x8xf32>
    "tpu.trace_start"() <{level = 10 : i32, message = "bqk,bkd->bqd"}> : () -> ()
    %cst_17 = arith.constant dense<0.000000e+00> : vector<1x8x8xf32>
    %42 = tpu.matmul %41, %31, %cst_17 {dimension_numbers = #tpu.dot_dimension_numbers<[2], [1], [1], [2], [0, 0, 0, 1, 1, 2], [0], [0]>} : vector<1x8x8xf32>, vector<1x8x8xf32>, vector<1x8x8xf32> -> vector<1x8x8xf32>
    "tpu.trace_stop"() : () -> ()
    %43 = arith.addf %28, %41 : vector<1x8x8xf32>
    %44 = vector.extract_strided_slice %12 {offsets = [0, 0, 16], sizes = [1, 8, 8], strides = [1, 1, 1]} : vector<1x8x96xf32> to vector<1x8x8xf32>
    %45 = vector.extract_strided_slice %12 {offsets = [0, 0, 48], sizes = [1, 8, 8], strides = [1, 1, 1]} : vector<1x8x96xf32> to vector<1x8x8xf32>
    %46 = vector.extract_strided_slice %12 {offsets = [0, 0, 80], sizes = [1, 8, 8], strides = [1, 1, 1]} : vector<1x8x96xf32> to vector<1x8x8xf32>
    "tpu.trace_start"() <{level = 10 : i32, message = "bqd,bkd->bqk"}> : () -> ()
    %cst_18 = arith.constant dense<0.000000e+00> : vector<1x8x8xf32>
    %47 = tpu.matmul %44, %45, %cst_18 {dimension_numbers = #tpu.dot_dimension_numbers<[2], [2], [1], [1], [0, 0, 0, 1, 1, 1], [0], [0]>} : vector<1x8x8xf32>, vector<1x8x8xf32>, vector<1x8x8xf32> -> vector<1x8x8xf32>
    "tpu.trace_stop"() : () -> ()
    %cst_19 = arith.constant dense<0xFF800000> : vector<1x8xf32>
    %48 = vector.multi_reduction <maximumf>, %47, %cst_19 [2] : vector<1x8x8xf32> to vector<1x8xf32>
    %49 = vector.shape_cast %48 : vector<1x8xf32> to vector<1x8x1xf32>
    %50 = vector.broadcast %49 : vector<1x8x1xf32> to vector<1x8x8xf32>
    %51 = arith.subf %47, %50 : vector<1x8x8xf32>
    %52 = math.exp %51 : vector<1x8x8xf32>
    %cst_20 = arith.constant dense<0.000000e+00> : vector<1x8xf32>
    %53 = vector.multi_reduction <add>, %52, %cst_20 [2] : vector<1x8x8xf32> to vector<1x8xf32>
    %54 = vector.shape_cast %53 : vector<1x8xf32> to vector<1x8x1xf32>
    %55 = vector.broadcast %54 : vector<1x8x1xf32> to vector<1x8x8xf32>
    %56 = arith.divf %52, %55 : vector<1x8x8xf32>
    "tpu.trace_start"() <{level = 10 : i32, message = "bqk,bkd->bqd"}> : () -> ()
    %cst_21 = arith.constant dense<0.000000e+00> : vector<1x8x8xf32>
    %57 = tpu.matmul %56, %46, %cst_21 {dimension_numbers = #tpu.dot_dimension_numbers<[2], [1], [1], [2], [0, 0, 0, 1, 1, 2], [0], [0]>} : vector<1x8x8xf32>, vector<1x8x8xf32>, vector<1x8x8xf32> -> vector<1x8x8xf32>
    "tpu.trace_stop"() : () -> ()
    %58 = arith.addf %43, %56 : vector<1x8x8xf32>
    %59 = vector.extract_strided_slice %12 {offsets = [0, 0, 24], sizes = [1, 8, 8], strides = [1, 1, 1]} : vector<1x8x96xf32> to vector<1x8x8xf32>
    %60 = vector.extract_strided_slice %12 {offsets = [0, 0, 56], sizes = [1, 8, 8], strides = [1, 1, 1]} : vector<1x8x96xf32> to vector<1x8x8xf32>
    %61 = vector.extract_strided_slice %12 {offsets = [0, 0, 88], sizes = [1, 8, 8], strides = [1, 1, 1]} : vector<1x8x96xf32> to vector<1x8x8xf32>
    "tpu.trace_start"() <{level = 10 : i32, message = "bqd,bkd->bqk"}> : () -> ()
    %cst_22 = arith.constant dense<0.000000e+00> : vector<1x8x8xf32>
    %62 = tpu.matmul %59, %60, %cst_22 {dimension_numbers = #tpu.dot_dimension_numbers<[2], [2], [1], [1], [0, 0, 0, 1, 1, 1], [0], [0]>} : vector<1x8x8xf32>, vector<1x8x8xf32>, vector<1x8x8xf32> -> vector<1x8x8xf32>
    "tpu.trace_stop"() : () -> ()
    %cst_23 = arith.constant dense<0xFF800000> : vector<1x8xf32>
    %63 = vector.multi_reduction <maximumf>, %62, %cst_23 [2] : vector<1x8x8xf32> to vector<1x8xf32>
    %64 = vector.shape_cast %63 : vector<1x8xf32> to vector<1x8x1xf32>
    %65 = vector.broadcast %64 : vector<1x8x1xf32> to vector<1x8x8xf32>
    %66 = arith.subf %62, %65 : vector<1x8x8xf32>
    %67 = math.exp %66 : vector<1x8x8xf32>
    %cst_24 = arith.constant dense<0.000000e+00> : vector<1x8xf32>
    %68 = vector.multi_reduction <add>, %67, %cst_24 [2] : vector<1x8x8xf32> to vector<1x8xf32>
    %69 = vector.shape_cast %68 : vector<1x8xf32> to vector<1x8x1xf32>
    %70 = vector.broadcast %69 : vector<1x8x1xf32> to vector<1x8x8xf32>
    %71 = arith.divf %67, %70 : vector<1x8x8xf32>
    "tpu.trace_start"() <{level = 10 : i32, message = "bqk,bkd->bqd"}> : () -> ()
    %cst_25 = arith.constant dense<0.000000e+00> : vector<1x8x8xf32>
    %72 = tpu.matmul %71, %61, %cst_25 {dimension_numbers = #tpu.dot_dimension_numbers<[2], [1], [1], [2], [0, 0, 0, 1, 1, 2], [0], [0]>} : vector<1x8x8xf32>, vector<1x8x8xf32>, vector<1x8x8xf32> -> vector<1x8x8xf32>
    "tpu.trace_stop"() : () -> ()
    %73 = arith.addf %58, %71 : vector<1x8x8xf32>
    %74 = tpu.concatenate %27, %42, %57, %72 in 2 : vector<1x8x8xf32>, vector<1x8x8xf32>, vector<1x8x8xf32>, vector<1x8x8xf32> -> vector<1x8x32xf32>
    %75 = vector.shape_cast %74 : vector<1x8x32xf32> to vector<8x32xf32>
    %c0_26 = arith.constant 0 : index
    %c0_27 = arith.constant 0 : index
    %c0_28 = arith.constant 0 : index
    %76 = vector.load %arg5[%c0_26, %c0_27, %c0_28] : memref<1x32x32xf32, #tpu.memory_space<vmem>>, vector<1x32x32xf32>
    %77 = vector.shape_cast %76 : vector<1x32x32xf32> to vector<32x32xf32>
    %cst_29 = arith.constant dense<0.000000e+00> : vector<8x32xf32>
    %78 = tpu.matmul %75, %77, %cst_29 {dimension_numbers = #tpu.dot_dimension_numbers<[1], [0], [0], [1], [0, 0, 1, 1], [], []>} : vector<8x32xf32>, vector<32x32xf32>, vector<8x32xf32> -> vector<8x32xf32>
    %c0_30 = arith.constant 0 : index
    %c0_31 = arith.constant 0 : index
    %c0_32 = arith.constant 0 : index
    %79 = vector.load %arg6[%c0_30, %c0_31, %c0_32] : memref<1x1x32xf32, #tpu.memory_space<vmem>>, vector<1x1x32xf32>
    %80 = vector.shape_cast %79 : vector<1x1x32xf32> to vector<1x32xf32>
    %81 = vector.broadcast %80 : vector<1x32xf32> to vector<8x32xf32>
    %82 = arith.addf %78, %81 : vector<8x32xf32>
    %83 = arith.addf %4, %82 : vector<8x32xf32>
    %c0_33 = arith.constant 0 : index
    %c0_34 = arith.constant 0 : index
    %c0_35 = arith.constant 0 : index
    %84 = vector.load %arg7[%c0_33, %c0_34, %c0_35] : memref<1x1x32xf32, #tpu.memory_space<vmem>>, vector<1x1x32xf32>
    %85 = vector.shape_cast %84 : vector<1x1x32xf32> to vector<1x32xf32>
    %c0_36 = arith.constant 0 : index
    %c0_37 = arith.constant 0 : index
    %c0_38 = arith.constant 0 : index
    %86 = vector.load %arg8[%c0_36, %c0_37, %c0_38] : memref<1x1x32xf32, #tpu.memory_space<vmem>>, vector<1x1x32xf32>
    %87 = vector.shape_cast %86 : vector<1x1x32xf32> to vector<1x32xf32>
    %cst_39 = arith.constant dense<0.000000e+00> : vector<8xf32>
    %88 = vector.multi_reduction <add>, %83, %cst_39 [1] : vector<8x32xf32> to vector<8xf32>
    %89 = vector.shape_cast %88 : vector<8xf32> to vector<8x1xf32>
    %cst_40 = arith.constant 3.200000e+01 : f32
    %90 = vector.broadcast %cst_40 : f32 to vector<8x1xf32>
    %91 = arith.divf %89, %90 : vector<8x1xf32>
    %92 = vector.broadcast %91 : vector<8x1xf32> to vector<8x32xf32>
    %93 = arith.subf %83, %92 : vector<8x32xf32>
    %94 = arith.mulf %93, %93 : vector<8x32xf32>
    %cst_41 = arith.constant dense<0.000000e+00> : vector<8xf32>
    %95 = vector.multi_reduction <add>, %94, %cst_41 [1] : vector<8x32xf32> to vector<8xf32>
    %96 = vector.shape_cast %95 : vector<8xf32> to vector<8x1xf32>
    %cst_42 = arith.constant 3.200000e+01 : f32
    %97 = vector.broadcast %cst_42 : f32 to vector<8x1xf32>
    %98 = arith.divf %96, %97 : vector<8x1xf32>
    %cst_43 = arith.constant 9.99999974E-6 : f32
    %99 = vector.broadcast %cst_43 : f32 to vector<8x1xf32>
    %100 = arith.addf %98, %99 : vector<8x1xf32>
    %101 = math.rsqrt %100 : vector<8x1xf32>
    %102 = vector.broadcast %101 : vector<8x1xf32> to vector<8x32xf32>
    %103 = arith.mulf %93, %102 : vector<8x32xf32>
    %104 = vector.broadcast %85 : vector<1x32xf32> to vector<8x32xf32>
    %105 = arith.mulf %103, %104 : vector<8x32xf32>
    %106 = vector.broadcast %87 : vector<1x32xf32> to vector<8x32xf32>
    %107 = arith.addf %105, %106 : vector<8x32xf32>
    %c0_44 = arith.constant 0 : index
    %c0_45 = arith.constant 0 : index
    %c0_46 = arith.constant 0 : index
    %108 = vector.load %arg9[%c0_44, %c0_45, %c0_46] : memref<1x32x64xf32, #tpu.memory_space<vmem>>, vector<1x32x64xf32>
    %109 = vector.shape_cast %108 : vector<1x32x64xf32> to vector<32x64xf32>
    %cst_47 = arith.constant dense<0.000000e+00> : vector<8x64xf32>
    %110 = tpu.matmul %107, %109, %cst_47 {dimension_numbers = #tpu.dot_dimension_numbers<[1], [0], [0], [1], [0, 0, 1, 1], [], []>} : vector<8x32xf32>, vector<32x64xf32>, vector<8x64xf32> -> vector<8x64xf32>
    %c0_48 = arith.constant 0 : index
    %c0_49 = arith.constant 0 : index
    %c0_50 = arith.constant 0 : index
    %111 = vector.load %arg10[%c0_48, %c0_49, %c0_50] : memref<1x1x64xf32, #tpu.memory_space<vmem>>, vector<1x1x64xf32>
    %112 = vector.shape_cast %111 : vector<1x1x64xf32> to vector<1x64xf32>
    %113 = vector.broadcast %112 : vector<1x64xf32> to vector<8x64xf32>
    %114 = arith.addf %110, %113 : vector<8x64xf32>
    %cst_51 = arith.constant 0.000000e+00 : f32
    %115 = vector.broadcast %cst_51 : f32 to vector<8x64xf32>
    %116 = arith.maximumf %114, %115 : vector<8x64xf32>
    %c0_52 = arith.constant 0 : index
    %c0_53 = arith.constant 0 : index
    %c0_54 = arith.constant 0 : index
    %117 = vector.load %arg11[%c0_52, %c0_53, %c0_54] : memref<1x64x32xf32, #tpu.memory_space<vmem>>, vector<1x64x32xf32>
    %118 = vector.shape_cast %117 : vector<1x64x32xf32> to vector<64x32xf32>
    %cst_55 = arith.constant dense<0.000000e+00> : vector<8x32xf32>
    %119 = tpu.matmul %116, %118, %cst_55 {dimension_numbers = #tpu.dot_dimension_numbers<[1], [0], [0], [1], [0, 0, 1, 1], [], []>} : vector<8x64xf32>, vector<64x32xf32>, vector<8x32xf32> -> vector<8x32xf32>
    %c0_56 = arith.constant 0 : index
    %c0_57 = arith.constant 0 : index
    %c0_58 = arith.constant 0 : index
    %120 = vector.load %arg12[%c0_56, %c0_57, %c0_58] : memref<1x1x32xf32, #tpu.memory_space<vmem>>, vector<1x1x32xf32>
    %121 = vector.shape_cast %120 : vector<1x1x32xf32> to vector<1x32xf32>
    %122 = vector.broadcast %121 : vector<1x32xf32> to vector<8x32xf32>
    %123 = arith.addf %119, %122 : vector<8x32xf32>
    %124 = arith.addf %107, %123 : vector<8x32xf32>
    %c0_59 = arith.constant 0 : index
    %c0_60 = arith.constant 0 : index
    %c0_61 = arith.constant 0 : index
    %125 = vector.load %arg13[%c0_59, %c0_60, %c0_61] : memref<1x1x32xf32, #tpu.memory_space<vmem>>, vector<1x1x32xf32>
    %126 = vector.shape_cast %125 : vector<1x1x32xf32> to vector<1x32xf32>
    %c0_62 = arith.constant 0 : index
    %c0_63 = arith.constant 0 : index
    %c0_64 = arith.constant 0 : index
    %127 = vector.load %arg14[%c0_62, %c0_63, %c0_64] : memref<1x1x32xf32, #tpu.memory_space<vmem>>, vector<1x1x32xf32>
    %128 = vector.shape_cast %127 : vector<1x1x32xf32> to vector<1x32xf32>
    %cst_65 = arith.constant dense<0.000000e+00> : vector<8xf32>
    %129 = vector.multi_reduction <add>, %124, %cst_65 [1] : vector<8x32xf32> to vector<8xf32>
    %130 = vector.shape_cast %129 : vector<8xf32> to vector<8x1xf32>
    %cst_66 = arith.constant 3.200000e+01 : f32
    %131 = vector.broadcast %cst_66 : f32 to vector<8x1xf32>
    %132 = arith.divf %130, %131 : vector<8x1xf32>
    %133 = vector.broadcast %132 : vector<8x1xf32> to vector<8x32xf32>
    %134 = arith.subf %124, %133 : vector<8x32xf32>
    %135 = arith.mulf %134, %134 : vector<8x32xf32>
    %cst_67 = arith.constant dense<0.000000e+00> : vector<8xf32>
    %136 = vector.multi_reduction <add>, %135, %cst_67 [1] : vector<8x32xf32> to vector<8xf32>
    %137 = vector.shape_cast %136 : vector<8xf32> to vector<8x1xf32>
    %cst_68 = arith.constant 3.200000e+01 : f32
    %138 = vector.broadcast %cst_68 : f32 to vector<8x1xf32>
    %139 = arith.divf %137, %138 : vector<8x1xf32>
    %cst_69 = arith.constant 9.99999974E-6 : f32
    %140 = vector.broadcast %cst_69 : f32 to vector<8x1xf32>
    %141 = arith.addf %139, %140 : vector<8x1xf32>
    %142 = math.rsqrt %141 : vector<8x1xf32>
    %143 = vector.broadcast %142 : vector<8x1xf32> to vector<8x32xf32>
    %144 = arith.mulf %134, %143 : vector<8x32xf32>
    %145 = vector.broadcast %126 : vector<1x32xf32> to vector<8x32xf32>
    %146 = arith.mulf %144, %145 : vector<8x32xf32>
    %147 = vector.broadcast %128 : vector<1x32xf32> to vector<8x32xf32>
    %148 = arith.addf %146, %147 : vector<8x32xf32>
    %149 = vector.shape_cast %148 : vector<8x32xf32> to vector<1x8x32xf32>
    %c0_70 = arith.constant 0 : index
    %c0_71 = arith.constant 0 : index
    %c0_72 = arith.constant 0 : index
    %150 = vector.load %arg17[%c0_70, %c0_71, %c0_72] : memref<1x8x32xf32, #tpu.memory_space<vmem>>, vector<1x8x32xf32>
    tpu.vector_store %arg17[%c0_70, %c0_71, %c0_72], %149 {strides = array<i32>} : memref<1x8x32xf32, #tpu.memory_space<vmem>>, vector<1x8x32xf32>,
    %c1_i32 = arith.constant 1 : i32
    %151 = arith.cmpi eq, %arg1, %c1_i32 : i32
    %152 = arith.extui %151 : i1 to i32
    %c0_i32_73 = arith.constant 0 : i32
    %153 = arith.cmpi ne, %152, %c0_i32_73 : i32
    scf.if %153 {
      %c0_74 = arith.constant 0 : index
      %c0_75 = arith.constant 0 : index
      %c0_76 = arith.constant 0 : index
      %154 = vector.load %arg15[%c0_74, %c0_75, %c0_76] : memref<1x8x32xf32, #tpu.memory_space<vmem>>, vector<1x8x32xf32>
      tpu.vector_store %arg15[%c0_74, %c0_75, %c0_76], %149 {strides = array<i32>} : memref<1x8x32xf32, #tpu.memory_space<vmem>>, vector<1x8x32xf32>,
      %cst_77 = arith.constant 2.500000e-01 : f32
      %155 = vector.broadcast %cst_77 : f32 to vector<1x8x8xf32>
      %156 = arith.mulf %73, %155 : vector<1x8x8xf32>
      %c0_78 = arith.constant 0 : index
      %c0_79 = arith.constant 0 : index
      %c0_80 = arith.constant 0 : index
      %157 = vector.load %arg16[%c0_78, %c0_79, %c0_80] : memref<1x8x8xf32, #tpu.memory_space<vmem>>, vector<1x8x8xf32>
      tpu.vector_store %arg16[%c0_78, %c0_79, %c0_80], %156 {strides = array<i32>} : memref<1x8x8xf32, #tpu.memory_space<vmem>>, vector<1x8x8xf32>,
    } else {
    }
    return
  }
  func.func @transform_0(%arg0: i32, %arg1: i32) -> (i32, i32, i32) {
    %c0_i32 = arith.constant 0 : i32
    %c0_i32_0 = arith.constant 0 : i32
    %c0_i32_1 = arith.constant 0 : i32
    return %arg0, %c0_i32, %c0_i32_0 : i32, i32, i32
  }
  func.func @transform_1(%arg0: i32, %arg1: i32) -> (i32, i32, i32) {
    %c0_i32 = arith.constant 0 : i32
    %c0_i32_0 = arith.constant 0 : i32
    %c0_i32_1 = arith.constant 0 : i32
    return %arg1, %c0_i32, %c0_i32_0 : i32, i32, i32
  }
  func.func @transform_2(%arg0: i32, %arg1: i32) -> (i32, i32, i32) {
    %c0_i32 = arith.constant 0 : i32
    %c0_i32_0 = arith.constant 0 : i32
    %c0_i32_1 = arith.constant 0 : i32
    return %arg1, %c0_i32, %c0_i32_0 : i32, i32, i32
  }
  func.func @transform_3(%arg0: i32, %arg1: i32) -> (i32, i32, i32) {
    %c0_i32 = arith.constant 0 : i32
    %c0_i32_0 = arith.constant 0 : i32
    %c0_i32_1 = arith.constant 0 : i32
    return %arg1, %c0_i32, %c0_i32_0 : i32, i32, i32
  }
  func.func @transform_4(%arg0: i32, %arg1: i32) -> (i32, i32, i32) {
    %c0_i32 = arith.constant 0 : i32
    %c0_i32_0 = arith.constant 0 : i32
    %c0_i32_1 = arith.constant 0 : i32
    return %arg1, %c0_i32, %c0_i32_0 : i32, i32, i32
  }
  func.func @transform_5(%arg0: i32, %arg1: i32) -> (i32, i32, i32) {
    %c0_i32 = arith.constant 0 : i32
    %c0_i32_0 = arith.constant 0 : i32
    %c0_i32_1 = arith.constant 0 : i32
    return %arg1, %c0_i32, %c0_i32_0 : i32, i32, i32
  }
  func.func @transform_6(%arg0: i32, %arg1: i32) -> (i32, i32, i32) {
    %c0_i32 = arith.constant 0 : i32
    %c0_i32_0 = arith.constant 0 : i32
    %c0_i32_1 = arith.constant 0 : i32
    return %arg1, %c0_i32, %c0_i32_0 : i32, i32, i32
  }
  func.func @transform_7(%arg0: i32, %arg1: i32) -> (i32, i32, i32) {
    %c0_i32 = arith.constant 0 : i32
    %c0_i32_0 = arith.constant 0 : i32
    %c0_i32_1 = arith.constant 0 : i32
    return %arg1, %c0_i32, %c0_i32_0 : i32, i32, i32
  }
  func.func @transform_8(%arg0: i32, %arg1: i32) -> (i32, i32, i32) {
    %c0_i32 = arith.constant 0 : i32
    %c0_i32_0 = arith.constant 0 : i32
    %c0_i32_1 = arith.constant 0 : i32
    return %arg1, %c0_i32, %c0_i32_0 : i32, i32, i32
  }
  func.func @transform_9(%arg0: i32, %arg1: i32) -> (i32, i32, i32) {
    %c0_i32 = arith.constant 0 : i32
    %c0_i32_0 = arith.constant 0 : i32
    %c0_i32_1 = arith.constant 0 : i32
    return %arg1, %c0_i32, %c0_i32_0 : i32, i32, i32
  }
  func.func @transform_10(%arg0: i32, %arg1: i32) -> (i32, i32, i32) {
    %c0_i32 = arith.constant 0 : i32
    %c0_i32_0 = arith.constant 0 : i32
    %c0_i32_1 = arith.constant 0 : i32
    return %arg1, %c0_i32, %c0_i32_0 : i32, i32, i32
  }
  func.func @transform_11(%arg0: i32, %arg1: i32) -> (i32, i32, i32) {
    %c0_i32 = arith.constant 0 : i32
    %c0_i32_0 = arith.constant 0 : i32
    %c0_i32_1 = arith.constant 0 : i32
    return %arg1, %c0_i32, %c0_i32_0 : i32, i32, i32
  }
  func.func @transform_12(%arg0: i32, %arg1: i32) -> (i32, i32, i32) {
    %c0_i32 = arith.constant 0 : i32
    %c0_i32_0 = arith.constant 0 : i32
    %c0_i32_1 = arith.constant 0 : i32
    return %arg1, %c0_i32, %c0_i32_0 : i32, i32, i32
  }
  func.func @transform_13(%arg0: i32, %arg1: i32) -> (i32, i32, i32) {
    %c0_i32 = arith.constant 0 : i32
    %c0_i32_0 = arith.constant 0 : i32
    %c0_i32_1 = arith.constant 0 : i32
    return %arg0, %c0_i32, %c0_i32_0 : i32, i32, i32
  }
  func.func @transform_14(%arg0: i32, %arg1: i32) -> (i32, i32, i32) {
    %c0_i32 = arith.constant 0 : i32
    %c0_i32_0 = arith.constant 0 : i32
    %c0_i32_1 = arith.constant 0 : i32
    return %arg0, %c0_i32, %c0_i32_0 : i32, i32, i32
  }
}

module attributes {stable_mosaic.version = 11 : i64} {
  func.func @_encoder_stack_kernel(%arg0: i32, %arg1: i32, %arg2: memref<1x16x32xf32, #tpu.memory_space<vmem>>, %arg3: memref<1x32x96xf32, #tpu.memory_space<vmem>>, %arg4: memref<1x1x96xf32, #tpu.memory_space<vmem>>, %arg5: memref<1x32x32xf32, #tpu.memory_space<vmem>>, %arg6: memref<1x1x32xf32, #tpu.memory_space<vmem>>, %arg7: memref<1x1x32xf32, #tpu.memory_space<vmem>>, %arg8: memref<1x1x32xf32, #tpu.memory_space<vmem>>, %arg9: memref<1x32x64xf32, #tpu.memory_space<vmem>>, %arg10: memref<1x1x64xf32, #tpu.memory_space<vmem>>, %arg11: memref<1x64x32xf32, #tpu.memory_space<vmem>>, %arg12: memref<1x1x32xf32, #tpu.memory_space<vmem>>, %arg13: memref<1x1x32xf32, #tpu.memory_space<vmem>>, %arg14: memref<1x1x32xf32, #tpu.memory_space<vmem>>, %arg15: memref<1x16x32xf32, #tpu.memory_space<vmem>>, %arg16: memref<1x16x16xf32, #tpu.memory_space<vmem>>, %arg17: memref<1x16x32xf32, #tpu.memory_space<vmem>>) attributes {dimension_semantics = [#tpu.dimension_semantics<parallel>, #tpu.dimension_semantics<arbitrary>], iteration_bounds = array<i64: 2, 2>, scalar_prefetch = 0 : i64, scratch_operands = 1 : i64, tpu.core_type = #tpu.core_type<tc>, window_params = [{transform_indices = @transform_0, window_bounds = array<i64: 1, 16, 32>}, {transform_indices = @transform_1, window_bounds = array<i64: 1, 32, 96>}, {transform_indices = @transform_2, window_bounds = array<i64: 1, 1, 96>}, {transform_indices = @transform_3, window_bounds = array<i64: 1, 32, 32>}, {transform_indices = @transform_4, window_bounds = array<i64: 1, 1, 32>}, {transform_indices = @transform_5, window_bounds = array<i64: 1, 1, 32>}, {transform_indices = @transform_6, window_bounds = array<i64: 1, 1, 32>}, {transform_indices = @transform_7, window_bounds = array<i64: 1, 32, 64>}, {transform_indices = @transform_8, window_bounds = array<i64: 1, 1, 64>}, {transform_indices = @transform_9, window_bounds = array<i64: 1, 64, 32>}, {transform_indices = @transform_10, window_bounds = array<i64: 1, 1, 32>}, {transform_indices = @transform_11, window_bounds = array<i64: 1, 1, 32>}, {transform_indices = @transform_12, window_bounds = array<i64: 1, 1, 32>}, {transform_indices = @transform_13, window_bounds = array<i64: 1, 16, 32>}, {transform_indices = @transform_14, window_bounds = array<i64: 1, 16, 16>}]} {
    %c0_i32 = arith.constant 0 : i32
    %0 = arith.cmpi eq, %arg1, %c0_i32 : i32
    %1 = arith.extui %0 : i1 to i32
    %c0_i32_0 = arith.constant 0 : i32
    %2 = arith.cmpi ne, %1, %c0_i32_0 : i32
    scf.if %2 {
      %c0_74 = arith.constant 0 : index
      %c0_75 = arith.constant 0 : index
      %c0_76 = arith.constant 0 : index
      %154 = vector.load %arg2[%c0_74, %c0_75, %c0_76] : memref<1x16x32xf32, #tpu.memory_space<vmem>>, vector<1x16x32xf32>
      %c0_77 = arith.constant 0 : index
      %c0_78 = arith.constant 0 : index
      %c0_79 = arith.constant 0 : index
      %155 = vector.load %arg17[%c0_77, %c0_78, %c0_79] : memref<1x16x32xf32, #tpu.memory_space<vmem>>, vector<1x16x32xf32>
      tpu.vector_store %arg17[%c0_77, %c0_78, %c0_79], %154 {strides = array<i32>} : memref<1x16x32xf32, #tpu.memory_space<vmem>>, vector<1x16x32xf32>,
    } else {
    }
    %c0 = arith.constant 0 : index
    %c0_1 = arith.constant 0 : index
    %c0_2 = arith.constant 0 : index
    %3 = vector.load %arg17[%c0, %c0_1, %c0_2] : memref<1x16x32xf32, #tpu.memory_space<vmem>>, vector<1x16x32xf32>
    %4 = vector.shape_cast %3 : vector<1x16x32xf32> to vector<16x32xf32>
    %c0_3 = arith.constant 0 : index
    %c0_4 = arith.constant 0 : index
    %c0_5 = arith.constant 0 : index
    %5 = vector.load %arg3[%c0_3, %c0_4, %c0_5] : memref<1x32x96xf32, #tpu.memory_space<vmem>>, vector<1x32x96xf32>
    %6 = vector.shape_cast %5 : vector<1x32x96xf32> to vector<32x96xf32>
    %cst = arith.constant dense<0.000000e+00> : vector<16x96xf32>
    %7 = tpu.matmul %4, %6, %cst {dimension_numbers = #tpu.dot_dimension_numbers<[1], [0], [0], [1], [0, 0, 1, 1], [], []>} : vector<16x32xf32>, vector<32x96xf32>, vector<16x96xf32> -> vector<16x96xf32>
    %c0_6 = arith.constant 0 : index
    %c0_7 = arith.constant 0 : index
    %c0_8 = arith.constant 0 : index
    %8 = vector.load %arg4[%c0_6, %c0_7, %c0_8] : memref<1x1x96xf32, #tpu.memory_space<vmem>>, vector<1x1x96xf32>
    %9 = vector.shape_cast %8 : vector<1x1x96xf32> to vector<1x96xf32>
    %10 = vector.broadcast %9 : vector<1x96xf32> to vector<16x96xf32>
    %11 = arith.addf %7, %10 : vector<16x96xf32>
    %12 = vector.shape_cast %11 : vector<16x96xf32> to vector<1x16x96xf32>
    %cst_9 = arith.constant 0.000000e+00 : f32
    %13 = vector.broadcast %cst_9 : f32 to vector<1x16x16xf32>
    %14 = vector.extract_strided_slice %12 {offsets = [0, 0, 0], sizes = [1, 16, 8], strides = [1, 1, 1]} : vector<1x16x96xf32> to vector<1x16x8xf32>
    %15 = vector.extract_strided_slice %12 {offsets = [0, 0, 32], sizes = [1, 16, 8], strides = [1, 1, 1]} : vector<1x16x96xf32> to vector<1x16x8xf32>
    %16 = vector.extract_strided_slice %12 {offsets = [0, 0, 64], sizes = [1, 16, 8], strides = [1, 1, 1]} : vector<1x16x96xf32> to vector<1x16x8xf32>
    "tpu.trace_start"() <{level = 10 : i32, message = "bqd,bkd->bqk"}> : () -> ()
    %cst_10 = arith.constant dense<0.000000e+00> : vector<1x16x16xf32>
    %17 = tpu.matmul %14, %15, %cst_10 {dimension_numbers = #tpu.dot_dimension_numbers<[2], [2], [1], [1], [0, 0, 0, 1, 1, 1], [0], [0]>} : vector<1x16x8xf32>, vector<1x16x8xf32>, vector<1x16x16xf32> -> vector<1x16x16xf32>
    "tpu.trace_stop"() : () -> ()
    %cst_11 = arith.constant dense<0xFF800000> : vector<1x16xf32>
    %18 = vector.multi_reduction <maximumf>, %17, %cst_11 [2] : vector<1x16x16xf32> to vector<1x16xf32>
    %19 = vector.shape_cast %18 : vector<1x16xf32> to vector<1x16x1xf32>
    %20 = vector.broadcast %19 : vector<1x16x1xf32> to vector<1x16x16xf32>
    %21 = arith.subf %17, %20 : vector<1x16x16xf32>
    %22 = math.exp %21 : vector<1x16x16xf32>
    %cst_12 = arith.constant dense<0.000000e+00> : vector<1x16xf32>
    %23 = vector.multi_reduction <add>, %22, %cst_12 [2] : vector<1x16x16xf32> to vector<1x16xf32>
    %24 = vector.shape_cast %23 : vector<1x16xf32> to vector<1x16x1xf32>
    %25 = vector.broadcast %24 : vector<1x16x1xf32> to vector<1x16x16xf32>
    %26 = arith.divf %22, %25 : vector<1x16x16xf32>
    "tpu.trace_start"() <{level = 10 : i32, message = "bqk,bkd->bqd"}> : () -> ()
    %cst_13 = arith.constant dense<0.000000e+00> : vector<1x16x8xf32>
    %27 = tpu.matmul %26, %16, %cst_13 {dimension_numbers = #tpu.dot_dimension_numbers<[2], [1], [1], [2], [0, 0, 0, 1, 1, 2], [0], [0]>} : vector<1x16x16xf32>, vector<1x16x8xf32>, vector<1x16x8xf32> -> vector<1x16x8xf32>
    "tpu.trace_stop"() : () -> ()
    %28 = arith.addf %13, %26 : vector<1x16x16xf32>
    %29 = vector.extract_strided_slice %12 {offsets = [0, 0, 8], sizes = [1, 16, 8], strides = [1, 1, 1]} : vector<1x16x96xf32> to vector<1x16x8xf32>
    %30 = vector.extract_strided_slice %12 {offsets = [0, 0, 40], sizes = [1, 16, 8], strides = [1, 1, 1]} : vector<1x16x96xf32> to vector<1x16x8xf32>
    %31 = vector.extract_strided_slice %12 {offsets = [0, 0, 72], sizes = [1, 16, 8], strides = [1, 1, 1]} : vector<1x16x96xf32> to vector<1x16x8xf32>
    "tpu.trace_start"() <{level = 10 : i32, message = "bqd,bkd->bqk"}> : () -> ()
    %cst_14 = arith.constant dense<0.000000e+00> : vector<1x16x16xf32>
    %32 = tpu.matmul %29, %30, %cst_14 {dimension_numbers = #tpu.dot_dimension_numbers<[2], [2], [1], [1], [0, 0, 0, 1, 1, 1], [0], [0]>} : vector<1x16x8xf32>, vector<1x16x8xf32>, vector<1x16x16xf32> -> vector<1x16x16xf32>
    "tpu.trace_stop"() : () -> ()
    %cst_15 = arith.constant dense<0xFF800000> : vector<1x16xf32>
    %33 = vector.multi_reduction <maximumf>, %32, %cst_15 [2] : vector<1x16x16xf32> to vector<1x16xf32>
    %34 = vector.shape_cast %33 : vector<1x16xf32> to vector<1x16x1xf32>
    %35 = vector.broadcast %34 : vector<1x16x1xf32> to vector<1x16x16xf32>
    %36 = arith.subf %32, %35 : vector<1x16x16xf32>
    %37 = math.exp %36 : vector<1x16x16xf32>
    %cst_16 = arith.constant dense<0.000000e+00> : vector<1x16xf32>
    %38 = vector.multi_reduction <add>, %37, %cst_16 [2] : vector<1x16x16xf32> to vector<1x16xf32>
    %39 = vector.shape_cast %38 : vector<1x16xf32> to vector<1x16x1xf32>
    %40 = vector.broadcast %39 : vector<1x16x1xf32> to vector<1x16x16xf32>
    %41 = arith.divf %37, %40 : vector<1x16x16xf32>
    "tpu.trace_start"() <{level = 10 : i32, message = "bqk,bkd->bqd"}> : () -> ()
    %cst_17 = arith.constant dense<0.000000e+00> : vector<1x16x8xf32>
    %42 = tpu.matmul %41, %31, %cst_17 {dimension_numbers = #tpu.dot_dimension_numbers<[2], [1], [1], [2], [0, 0, 0, 1, 1, 2], [0], [0]>} : vector<1x16x16xf32>, vector<1x16x8xf32>, vector<1x16x8xf32> -> vector<1x16x8xf32>
    "tpu.trace_stop"() : () -> ()
    %43 = arith.addf %28, %41 : vector<1x16x16xf32>
    %44 = vector.extract_strided_slice %12 {offsets = [0, 0, 16], sizes = [1, 16, 8], strides = [1, 1, 1]} : vector<1x16x96xf32> to vector<1x16x8xf32>
    %45 = vector.extract_strided_slice %12 {offsets = [0, 0, 48], sizes = [1, 16, 8], strides = [1, 1, 1]} : vector<1x16x96xf32> to vector<1x16x8xf32>
    %46 = vector.extract_strided_slice %12 {offsets = [0, 0, 80], sizes = [1, 16, 8], strides = [1, 1, 1]} : vector<1x16x96xf32> to vector<1x16x8xf32>
    "tpu.trace_start"() <{level = 10 : i32, message = "bqd,bkd->bqk"}> : () -> ()
    %cst_18 = arith.constant dense<0.000000e+00> : vector<1x16x16xf32>
    %47 = tpu.matmul %44, %45, %cst_18 {dimension_numbers = #tpu.dot_dimension_numbers<[2], [2], [1], [1], [0, 0, 0, 1, 1, 1], [0], [0]>} : vector<1x16x8xf32>, vector<1x16x8xf32>, vector<1x16x16xf32> -> vector<1x16x16xf32>
    "tpu.trace_stop"() : () -> ()
    %cst_19 = arith.constant dense<0xFF800000> : vector<1x16xf32>
    %48 = vector.multi_reduction <maximumf>, %47, %cst_19 [2] : vector<1x16x16xf32> to vector<1x16xf32>
    %49 = vector.shape_cast %48 : vector<1x16xf32> to vector<1x16x1xf32>
    %50 = vector.broadcast %49 : vector<1x16x1xf32> to vector<1x16x16xf32>
    %51 = arith.subf %47, %50 : vector<1x16x16xf32>
    %52 = math.exp %51 : vector<1x16x16xf32>
    %cst_20 = arith.constant dense<0.000000e+00> : vector<1x16xf32>
    %53 = vector.multi_reduction <add>, %52, %cst_20 [2] : vector<1x16x16xf32> to vector<1x16xf32>
    %54 = vector.shape_cast %53 : vector<1x16xf32> to vector<1x16x1xf32>
    %55 = vector.broadcast %54 : vector<1x16x1xf32> to vector<1x16x16xf32>
    %56 = arith.divf %52, %55 : vector<1x16x16xf32>
    "tpu.trace_start"() <{level = 10 : i32, message = "bqk,bkd->bqd"}> : () -> ()
    %cst_21 = arith.constant dense<0.000000e+00> : vector<1x16x8xf32>
    %57 = tpu.matmul %56, %46, %cst_21 {dimension_numbers = #tpu.dot_dimension_numbers<[2], [1], [1], [2], [0, 0, 0, 1, 1, 2], [0], [0]>} : vector<1x16x16xf32>, vector<1x16x8xf32>, vector<1x16x8xf32> -> vector<1x16x8xf32>
    "tpu.trace_stop"() : () -> ()
    %58 = arith.addf %43, %56 : vector<1x16x16xf32>
    %59 = vector.extract_strided_slice %12 {offsets = [0, 0, 24], sizes = [1, 16, 8], strides = [1, 1, 1]} : vector<1x16x96xf32> to vector<1x16x8xf32>
    %60 = vector.extract_strided_slice %12 {offsets = [0, 0, 56], sizes = [1, 16, 8], strides = [1, 1, 1]} : vector<1x16x96xf32> to vector<1x16x8xf32>
    %61 = vector.extract_strided_slice %12 {offsets = [0, 0, 88], sizes = [1, 16, 8], strides = [1, 1, 1]} : vector<1x16x96xf32> to vector<1x16x8xf32>
    "tpu.trace_start"() <{level = 10 : i32, message = "bqd,bkd->bqk"}> : () -> ()
    %cst_22 = arith.constant dense<0.000000e+00> : vector<1x16x16xf32>
    %62 = tpu.matmul %59, %60, %cst_22 {dimension_numbers = #tpu.dot_dimension_numbers<[2], [2], [1], [1], [0, 0, 0, 1, 1, 1], [0], [0]>} : vector<1x16x8xf32>, vector<1x16x8xf32>, vector<1x16x16xf32> -> vector<1x16x16xf32>
    "tpu.trace_stop"() : () -> ()
    %cst_23 = arith.constant dense<0xFF800000> : vector<1x16xf32>
    %63 = vector.multi_reduction <maximumf>, %62, %cst_23 [2] : vector<1x16x16xf32> to vector<1x16xf32>
    %64 = vector.shape_cast %63 : vector<1x16xf32> to vector<1x16x1xf32>
    %65 = vector.broadcast %64 : vector<1x16x1xf32> to vector<1x16x16xf32>
    %66 = arith.subf %62, %65 : vector<1x16x16xf32>
    %67 = math.exp %66 : vector<1x16x16xf32>
    %cst_24 = arith.constant dense<0.000000e+00> : vector<1x16xf32>
    %68 = vector.multi_reduction <add>, %67, %cst_24 [2] : vector<1x16x16xf32> to vector<1x16xf32>
    %69 = vector.shape_cast %68 : vector<1x16xf32> to vector<1x16x1xf32>
    %70 = vector.broadcast %69 : vector<1x16x1xf32> to vector<1x16x16xf32>
    %71 = arith.divf %67, %70 : vector<1x16x16xf32>
    "tpu.trace_start"() <{level = 10 : i32, message = "bqk,bkd->bqd"}> : () -> ()
    %cst_25 = arith.constant dense<0.000000e+00> : vector<1x16x8xf32>
    %72 = tpu.matmul %71, %61, %cst_25 {dimension_numbers = #tpu.dot_dimension_numbers<[2], [1], [1], [2], [0, 0, 0, 1, 1, 2], [0], [0]>} : vector<1x16x16xf32>, vector<1x16x8xf32>, vector<1x16x8xf32> -> vector<1x16x8xf32>
    "tpu.trace_stop"() : () -> ()
    %73 = arith.addf %58, %71 : vector<1x16x16xf32>
    %74 = tpu.concatenate %27, %42, %57, %72 in 2 : vector<1x16x8xf32>, vector<1x16x8xf32>, vector<1x16x8xf32>, vector<1x16x8xf32> -> vector<1x16x32xf32>
    %75 = vector.shape_cast %74 : vector<1x16x32xf32> to vector<16x32xf32>
    %c0_26 = arith.constant 0 : index
    %c0_27 = arith.constant 0 : index
    %c0_28 = arith.constant 0 : index
    %76 = vector.load %arg5[%c0_26, %c0_27, %c0_28] : memref<1x32x32xf32, #tpu.memory_space<vmem>>, vector<1x32x32xf32>
    %77 = vector.shape_cast %76 : vector<1x32x32xf32> to vector<32x32xf32>
    %cst_29 = arith.constant dense<0.000000e+00> : vector<16x32xf32>
    %78 = tpu.matmul %75, %77, %cst_29 {dimension_numbers = #tpu.dot_dimension_numbers<[1], [0], [0], [1], [0, 0, 1, 1], [], []>} : vector<16x32xf32>, vector<32x32xf32>, vector<16x32xf32> -> vector<16x32xf32>
    %c0_30 = arith.constant 0 : index
    %c0_31 = arith.constant 0 : index
    %c0_32 = arith.constant 0 : index
    %79 = vector.load %arg6[%c0_30, %c0_31, %c0_32] : memref<1x1x32xf32, #tpu.memory_space<vmem>>, vector<1x1x32xf32>
    %80 = vector.shape_cast %79 : vector<1x1x32xf32> to vector<1x32xf32>
    %81 = vector.broadcast %80 : vector<1x32xf32> to vector<16x32xf32>
    %82 = arith.addf %78, %81 : vector<16x32xf32>
    %83 = arith.addf %4, %82 : vector<16x32xf32>
    %c0_33 = arith.constant 0 : index
    %c0_34 = arith.constant 0 : index
    %c0_35 = arith.constant 0 : index
    %84 = vector.load %arg7[%c0_33, %c0_34, %c0_35] : memref<1x1x32xf32, #tpu.memory_space<vmem>>, vector<1x1x32xf32>
    %85 = vector.shape_cast %84 : vector<1x1x32xf32> to vector<1x32xf32>
    %c0_36 = arith.constant 0 : index
    %c0_37 = arith.constant 0 : index
    %c0_38 = arith.constant 0 : index
    %86 = vector.load %arg8[%c0_36, %c0_37, %c0_38] : memref<1x1x32xf32, #tpu.memory_space<vmem>>, vector<1x1x32xf32>
    %87 = vector.shape_cast %86 : vector<1x1x32xf32> to vector<1x32xf32>
    %cst_39 = arith.constant dense<0.000000e+00> : vector<16xf32>
    %88 = vector.multi_reduction <add>, %83, %cst_39 [1] : vector<16x32xf32> to vector<16xf32>
    %89 = vector.shape_cast %88 : vector<16xf32> to vector<16x1xf32>
    %cst_40 = arith.constant 3.200000e+01 : f32
    %90 = vector.broadcast %cst_40 : f32 to vector<16x1xf32>
    %91 = arith.divf %89, %90 : vector<16x1xf32>
    %92 = vector.broadcast %91 : vector<16x1xf32> to vector<16x32xf32>
    %93 = arith.subf %83, %92 : vector<16x32xf32>
    %94 = arith.mulf %93, %93 : vector<16x32xf32>
    %cst_41 = arith.constant dense<0.000000e+00> : vector<16xf32>
    %95 = vector.multi_reduction <add>, %94, %cst_41 [1] : vector<16x32xf32> to vector<16xf32>
    %96 = vector.shape_cast %95 : vector<16xf32> to vector<16x1xf32>
    %cst_42 = arith.constant 3.200000e+01 : f32
    %97 = vector.broadcast %cst_42 : f32 to vector<16x1xf32>
    %98 = arith.divf %96, %97 : vector<16x1xf32>
    %cst_43 = arith.constant 9.99999974E-6 : f32
    %99 = vector.broadcast %cst_43 : f32 to vector<16x1xf32>
    %100 = arith.addf %98, %99 : vector<16x1xf32>
    %101 = math.rsqrt %100 : vector<16x1xf32>
    %102 = vector.broadcast %101 : vector<16x1xf32> to vector<16x32xf32>
    %103 = arith.mulf %93, %102 : vector<16x32xf32>
    %104 = vector.broadcast %85 : vector<1x32xf32> to vector<16x32xf32>
    %105 = arith.mulf %103, %104 : vector<16x32xf32>
    %106 = vector.broadcast %87 : vector<1x32xf32> to vector<16x32xf32>
    %107 = arith.addf %105, %106 : vector<16x32xf32>
    %c0_44 = arith.constant 0 : index
    %c0_45 = arith.constant 0 : index
    %c0_46 = arith.constant 0 : index
    %108 = vector.load %arg9[%c0_44, %c0_45, %c0_46] : memref<1x32x64xf32, #tpu.memory_space<vmem>>, vector<1x32x64xf32>
    %109 = vector.shape_cast %108 : vector<1x32x64xf32> to vector<32x64xf32>
    %cst_47 = arith.constant dense<0.000000e+00> : vector<16x64xf32>
    %110 = tpu.matmul %107, %109, %cst_47 {dimension_numbers = #tpu.dot_dimension_numbers<[1], [0], [0], [1], [0, 0, 1, 1], [], []>} : vector<16x32xf32>, vector<32x64xf32>, vector<16x64xf32> -> vector<16x64xf32>
    %c0_48 = arith.constant 0 : index
    %c0_49 = arith.constant 0 : index
    %c0_50 = arith.constant 0 : index
    %111 = vector.load %arg10[%c0_48, %c0_49, %c0_50] : memref<1x1x64xf32, #tpu.memory_space<vmem>>, vector<1x1x64xf32>
    %112 = vector.shape_cast %111 : vector<1x1x64xf32> to vector<1x64xf32>
    %113 = vector.broadcast %112 : vector<1x64xf32> to vector<16x64xf32>
    %114 = arith.addf %110, %113 : vector<16x64xf32>
    %cst_51 = arith.constant 0.000000e+00 : f32
    %115 = vector.broadcast %cst_51 : f32 to vector<16x64xf32>
    %116 = arith.maximumf %114, %115 : vector<16x64xf32>
    %c0_52 = arith.constant 0 : index
    %c0_53 = arith.constant 0 : index
    %c0_54 = arith.constant 0 : index
    %117 = vector.load %arg11[%c0_52, %c0_53, %c0_54] : memref<1x64x32xf32, #tpu.memory_space<vmem>>, vector<1x64x32xf32>
    %118 = vector.shape_cast %117 : vector<1x64x32xf32> to vector<64x32xf32>
    %cst_55 = arith.constant dense<0.000000e+00> : vector<16x32xf32>
    %119 = tpu.matmul %116, %118, %cst_55 {dimension_numbers = #tpu.dot_dimension_numbers<[1], [0], [0], [1], [0, 0, 1, 1], [], []>} : vector<16x64xf32>, vector<64x32xf32>, vector<16x32xf32> -> vector<16x32xf32>
    %c0_56 = arith.constant 0 : index
    %c0_57 = arith.constant 0 : index
    %c0_58 = arith.constant 0 : index
    %120 = vector.load %arg12[%c0_56, %c0_57, %c0_58] : memref<1x1x32xf32, #tpu.memory_space<vmem>>, vector<1x1x32xf32>
    %121 = vector.shape_cast %120 : vector<1x1x32xf32> to vector<1x32xf32>
    %122 = vector.broadcast %121 : vector<1x32xf32> to vector<16x32xf32>
    %123 = arith.addf %119, %122 : vector<16x32xf32>
    %124 = arith.addf %107, %123 : vector<16x32xf32>
    %c0_59 = arith.constant 0 : index
    %c0_60 = arith.constant 0 : index
    %c0_61 = arith.constant 0 : index
    %125 = vector.load %arg13[%c0_59, %c0_60, %c0_61] : memref<1x1x32xf32, #tpu.memory_space<vmem>>, vector<1x1x32xf32>
    %126 = vector.shape_cast %125 : vector<1x1x32xf32> to vector<1x32xf32>
    %c0_62 = arith.constant 0 : index
    %c0_63 = arith.constant 0 : index
    %c0_64 = arith.constant 0 : index
    %127 = vector.load %arg14[%c0_62, %c0_63, %c0_64] : memref<1x1x32xf32, #tpu.memory_space<vmem>>, vector<1x1x32xf32>
    %128 = vector.shape_cast %127 : vector<1x1x32xf32> to vector<1x32xf32>
    %cst_65 = arith.constant dense<0.000000e+00> : vector<16xf32>
    %129 = vector.multi_reduction <add>, %124, %cst_65 [1] : vector<16x32xf32> to vector<16xf32>
    %130 = vector.shape_cast %129 : vector<16xf32> to vector<16x1xf32>
    %cst_66 = arith.constant 3.200000e+01 : f32
    %131 = vector.broadcast %cst_66 : f32 to vector<16x1xf32>
    %132 = arith.divf %130, %131 : vector<16x1xf32>
    %133 = vector.broadcast %132 : vector<16x1xf32> to vector<16x32xf32>
    %134 = arith.subf %124, %133 : vector<16x32xf32>
    %135 = arith.mulf %134, %134 : vector<16x32xf32>
    %cst_67 = arith.constant dense<0.000000e+00> : vector<16xf32>
    %136 = vector.multi_reduction <add>, %135, %cst_67 [1] : vector<16x32xf32> to vector<16xf32>
    %137 = vector.shape_cast %136 : vector<16xf32> to vector<16x1xf32>
    %cst_68 = arith.constant 3.200000e+01 : f32
    %138 = vector.broadcast %cst_68 : f32 to vector<16x1xf32>
    %139 = arith.divf %137, %138 : vector<16x1xf32>
    %cst_69 = arith.constant 9.99999974E-6 : f32
    %140 = vector.broadcast %cst_69 : f32 to vector<16x1xf32>
    %141 = arith.addf %139, %140 : vector<16x1xf32>
    %142 = math.rsqrt %141 : vector<16x1xf32>
    %143 = vector.broadcast %142 : vector<16x1xf32> to vector<16x32xf32>
    %144 = arith.mulf %134, %143 : vector<16x32xf32>
    %145 = vector.broadcast %126 : vector<1x32xf32> to vector<16x32xf32>
    %146 = arith.mulf %144, %145 : vector<16x32xf32>
    %147 = vector.broadcast %128 : vector<1x32xf32> to vector<16x32xf32>
    %148 = arith.addf %146, %147 : vector<16x32xf32>
    %149 = vector.shape_cast %148 : vector<16x32xf32> to vector<1x16x32xf32>
    %c0_70 = arith.constant 0 : index
    %c0_71 = arith.constant 0 : index
    %c0_72 = arith.constant 0 : index
    %150 = vector.load %arg17[%c0_70, %c0_71, %c0_72] : memref<1x16x32xf32, #tpu.memory_space<vmem>>, vector<1x16x32xf32>
    tpu.vector_store %arg17[%c0_70, %c0_71, %c0_72], %149 {strides = array<i32>} : memref<1x16x32xf32, #tpu.memory_space<vmem>>, vector<1x16x32xf32>,
    %c1_i32 = arith.constant 1 : i32
    %151 = arith.cmpi eq, %arg1, %c1_i32 : i32
    %152 = arith.extui %151 : i1 to i32
    %c0_i32_73 = arith.constant 0 : i32
    %153 = arith.cmpi ne, %152, %c0_i32_73 : i32
    scf.if %153 {
      %c0_74 = arith.constant 0 : index
      %c0_75 = arith.constant 0 : index
      %c0_76 = arith.constant 0 : index
      %154 = vector.load %arg15[%c0_74, %c0_75, %c0_76] : memref<1x16x32xf32, #tpu.memory_space<vmem>>, vector<1x16x32xf32>
      tpu.vector_store %arg15[%c0_74, %c0_75, %c0_76], %149 {strides = array<i32>} : memref<1x16x32xf32, #tpu.memory_space<vmem>>, vector<1x16x32xf32>,
      %cst_77 = arith.constant 2.500000e-01 : f32
      %155 = vector.broadcast %cst_77 : f32 to vector<1x16x16xf32>
      %156 = arith.mulf %73, %155 : vector<1x16x16xf32>
      %c0_78 = arith.constant 0 : index
      %c0_79 = arith.constant 0 : index
      %c0_80 = arith.constant 0 : index
      %157 = vector.load %arg16[%c0_78, %c0_79, %c0_80] : memref<1x16x16xf32, #tpu.memory_space<vmem>>, vector<1x16x16xf32>
      tpu.vector_store %arg16[%c0_78, %c0_79, %c0_80], %156 {strides = array<i32>} : memref<1x16x16xf32, #tpu.memory_space<vmem>>, vector<1x16x16xf32>,
    } else {
    }
    return
  }
  func.func @transform_0(%arg0: i32, %arg1: i32) -> (i32, i32, i32) {
    %c0_i32 = arith.constant 0 : i32
    %c0_i32_0 = arith.constant 0 : i32
    %c0_i32_1 = arith.constant 0 : i32
    return %arg0, %c0_i32, %c0_i32_0 : i32, i32, i32
  }
  func.func @transform_1(%arg0: i32, %arg1: i32) -> (i32, i32, i32) {
    %c0_i32 = arith.constant 0 : i32
    %c0_i32_0 = arith.constant 0 : i32
    %c0_i32_1 = arith.constant 0 : i32
    return %arg1, %c0_i32, %c0_i32_0 : i32, i32, i32
  }
  func.func @transform_2(%arg0: i32, %arg1: i32) -> (i32, i32, i32) {
    %c0_i32 = arith.constant 0 : i32
    %c0_i32_0 = arith.constant 0 : i32
    %c0_i32_1 = arith.constant 0 : i32
    return %arg1, %c0_i32, %c0_i32_0 : i32, i32, i32
  }
  func.func @transform_3(%arg0: i32, %arg1: i32) -> (i32, i32, i32) {
    %c0_i32 = arith.constant 0 : i32
    %c0_i32_0 = arith.constant 0 : i32
    %c0_i32_1 = arith.constant 0 : i32
    return %arg1, %c0_i32, %c0_i32_0 : i32, i32, i32
  }
  func.func @transform_4(%arg0: i32, %arg1: i32) -> (i32, i32, i32) {
    %c0_i32 = arith.constant 0 : i32
    %c0_i32_0 = arith.constant 0 : i32
    %c0_i32_1 = arith.constant 0 : i32
    return %arg1, %c0_i32, %c0_i32_0 : i32, i32, i32
  }
  func.func @transform_5(%arg0: i32, %arg1: i32) -> (i32, i32, i32) {
    %c0_i32 = arith.constant 0 : i32
    %c0_i32_0 = arith.constant 0 : i32
    %c0_i32_1 = arith.constant 0 : i32
    return %arg1, %c0_i32, %c0_i32_0 : i32, i32, i32
  }
  func.func @transform_6(%arg0: i32, %arg1: i32) -> (i32, i32, i32) {
    %c0_i32 = arith.constant 0 : i32
    %c0_i32_0 = arith.constant 0 : i32
    %c0_i32_1 = arith.constant 0 : i32
    return %arg1, %c0_i32, %c0_i32_0 : i32, i32, i32
  }
  func.func @transform_7(%arg0: i32, %arg1: i32) -> (i32, i32, i32) {
    %c0_i32 = arith.constant 0 : i32
    %c0_i32_0 = arith.constant 0 : i32
    %c0_i32_1 = arith.constant 0 : i32
    return %arg1, %c0_i32, %c0_i32_0 : i32, i32, i32
  }
  func.func @transform_8(%arg0: i32, %arg1: i32) -> (i32, i32, i32) {
    %c0_i32 = arith.constant 0 : i32
    %c0_i32_0 = arith.constant 0 : i32
    %c0_i32_1 = arith.constant 0 : i32
    return %arg1, %c0_i32, %c0_i32_0 : i32, i32, i32
  }
  func.func @transform_9(%arg0: i32, %arg1: i32) -> (i32, i32, i32) {
    %c0_i32 = arith.constant 0 : i32
    %c0_i32_0 = arith.constant 0 : i32
    %c0_i32_1 = arith.constant 0 : i32
    return %arg1, %c0_i32, %c0_i32_0 : i32, i32, i32
  }
  func.func @transform_10(%arg0: i32, %arg1: i32) -> (i32, i32, i32) {
    %c0_i32 = arith.constant 0 : i32
    %c0_i32_0 = arith.constant 0 : i32
    %c0_i32_1 = arith.constant 0 : i32
    return %arg1, %c0_i32, %c0_i32_0 : i32, i32, i32
  }
  func.func @transform_11(%arg0: i32, %arg1: i32) -> (i32, i32, i32) {
    %c0_i32 = arith.constant 0 : i32
    %c0_i32_0 = arith.constant 0 : i32
    %c0_i32_1 = arith.constant 0 : i32
    return %arg1, %c0_i32, %c0_i32_0 : i32, i32, i32
  }
  func.func @transform_12(%arg0: i32, %arg1: i32) -> (i32, i32, i32) {
    %c0_i32 = arith.constant 0 : i32
    %c0_i32_0 = arith.constant 0 : i32
    %c0_i32_1 = arith.constant 0 : i32
    return %arg1, %c0_i32, %c0_i32_0 : i32, i32, i32
  }
  func.func @transform_13(%arg0: i32, %arg1: i32) -> (i32, i32, i32) {
    %c0_i32 = arith.constant 0 : i32
    %c0_i32_0 = arith.constant 0 : i32
    %c0_i32_1 = arith.constant 0 : i32
    return %arg0, %c0_i32, %c0_i32_0 : i32, i32, i32
  }
  func.func @transform_14(%arg0: i32, %arg1: i32) -> (i32, i32, i32) {
    %c0_i32 = arith.constant 0 : i32
    %c0_i32_0 = arith.constant 0 : i32
    %c0_i32_1 = arith.constant 0 : i32
    return %arg0, %c0_i32, %c0_i32_0 : i32, i32, i32
  }
}

module attributes {stable_mosaic.version = 11 : i64} {
  func.func @_class_head_kernel(%arg0: i32, %arg1: memref<1x8x32xf32, #tpu.memory_space<vmem>>, %arg2: memref<2xf32, #tpu.memory_space<smem>>, %arg3: memref<2xf32, #tpu.memory_space<smem>>, %arg4: memref<32x32xf32, #tpu.memory_space<vmem>>, %arg5: memref<1x32xf32, #tpu.memory_space<vmem>>, %arg6: memref<2xf32, #tpu.memory_space<smem>>, %arg7: memref<2xf32, #tpu.memory_space<smem>>, %arg8: memref<32x32xf32, #tpu.memory_space<vmem>>, %arg9: memref<1x32xf32, #tpu.memory_space<vmem>>, %arg10: memref<2xf32, #tpu.memory_space<smem>>, %arg11: memref<2xf32, #tpu.memory_space<smem>>, %arg12: memref<32x128xf32, #tpu.memory_space<vmem>>, %arg13: memref<1x128xf32, #tpu.memory_space<vmem>>, %arg14: memref<1x1x128xf32, #tpu.memory_space<vmem>>) attributes {dimension_semantics = [#tpu.dimension_semantics<parallel>], iteration_bounds = array<i64: 2>, scalar_prefetch = 0 : i64, scratch_operands = 0 : i64, tpu.core_type = #tpu.core_type<tc>, window_params = [{transform_indices = @transform_0, window_bounds = array<i64: 1, 8, 32>}, {transform_indices = @transform_1, window_bounds = array<i64: 2>}, {transform_indices = @transform_2, window_bounds = array<i64: 2>}, {pipeline_mode = #tpu.pipeline_mode<synchronous>, transform_indices = @transform_3, window_bounds = array<i64: 32, 32>}, {pipeline_mode = #tpu.pipeline_mode<synchronous>, transform_indices = @transform_4, window_bounds = array<i64: 1, 32>}, {transform_indices = @transform_5, window_bounds = array<i64: 2>}, {transform_indices = @transform_6, window_bounds = array<i64: 2>}, {pipeline_mode = #tpu.pipeline_mode<synchronous>, transform_indices = @transform_7, window_bounds = array<i64: 32, 32>}, {pipeline_mode = #tpu.pipeline_mode<synchronous>, transform_indices = @transform_8, window_bounds = array<i64: 1, 32>}, {transform_indices = @transform_9, window_bounds = array<i64: 2>}, {transform_indices = @transform_10, window_bounds = array<i64: 2>}, {pipeline_mode = #tpu.pipeline_mode<synchronous>, transform_indices = @transform_11, window_bounds = array<i64: 32, 128>}, {pipeline_mode = #tpu.pipeline_mode<synchronous>, transform_indices = @transform_12, window_bounds = array<i64: 1, 128>}, {transform_indices = @transform_13, window_bounds = array<i64: 1, 1, 128>}]} {
    %c1_i32 = arith.constant 1 : i32
    %0 = arith.muli %arg0, %c1_i32 : i32
    %c0_i32 = arith.constant 0 : i32
    %1 = arith.addi %0, %c0_i32 : i32
    %c0 = arith.constant 0 : index
    %c0_0 = arith.constant 0 : index
    %c0_1 = arith.constant 0 : index
    %2 = vector.load %arg1[%c0, %c0_0, %c0_1] : memref<1x8x32xf32, #tpu.memory_space<vmem>>, vector<1x8x32xf32>
    %3 = vector.shape_cast %2 : vector<1x8x32xf32> to vector<8x32xf32>
    %cst = arith.constant dense<0.000000e+00> : vector<8xf32>
    %4 = vector.multi_reduction <add>, %3, %cst [1] : vector<8x32xf32> to vector<8xf32>
    %5 = vector.shape_cast %4 : vector<8xf32> to vector<8x1xf32>
    %cst_2 = arith.constant 3.200000e+01 : f32
    %6 = vector.broadcast %cst_2 : f32 to vector<8x1xf32>
    %7 = arith.divf %5, %6 : vector<8x1xf32>
    %cst_3 = arith.constant dense<0.000000e+00> : vector<1xf32>
    %8 = vector.multi_reduction <add>, %7, %cst_3 [0] : vector<8x1xf32> to vector<1xf32>
    %9 = vector.shape_cast %8 : vector<1xf32> to vector<1x1xf32>
    %cst_4 = arith.constant 8.000000e+00 : f32
    %10 = vector.broadcast %cst_4 : f32 to vector<1x1xf32>
    %11 = arith.divf %9, %10 : vector<1x1xf32>
    %12 = vector.broadcast %11 : vector<1x1xf32> to vector<8x32xf32>
    %13 = arith.subf %3, %12 : vector<8x32xf32>
    %14 = arith.mulf %13, %13 : vector<8x32xf32>
    %cst_5 = arith.constant dense<0.000000e+00> : vector<8xf32>
    %15 = vector.multi_reduction <add>, %14, %cst_5 [1] : vector<8x32xf32> to vector<8xf32>
    %16 = vector.shape_cast %15 : vector<8xf32> to vector<8x1xf32>
    %cst_6 = arith.constant 3.200000e+01 : f32
    %17 = vector.broadcast %cst_6 : f32 to vector<8x1xf32>
    %18 = arith.divf %16, %17 : vector<8x1xf32>
    %cst_7 = arith.constant dense<0.000000e+00> : vector<1xf32>
    %19 = vector.multi_reduction <add>, %18, %cst_7 [0] : vector<8x1xf32> to vector<1xf32>
    %20 = vector.shape_cast %19 : vector<1xf32> to vector<1x1xf32>
    %cst_8 = arith.constant 8.000000e+00 : f32
    %21 = vector.broadcast %cst_8 : f32 to vector<1x1xf32>
    %22 = arith.divf %20, %21 : vector<1x1xf32>
    %23 = vector.extract_strided_slice %3 {offsets = [7, 0], sizes = [1, 32], strides = [1, 1]} : vector<8x32xf32> to vector<1x32xf32>
    %24 = vector.broadcast %11 : vector<1x1xf32> to vector<1x32xf32>
    %25 = arith.subf %23, %24 : vector<1x32xf32>
    %cst_9 = arith.constant 9.99999974E-6 : f32
    %26 = vector.broadcast %cst_9 : f32 to vector<1x1xf32>
    %27 = arith.addf %22, %26 : vector<1x1xf32>
    %28 = math.rsqrt %27 : vector<1x1xf32>
    %29 = vector.broadcast %28 : vector<1x1xf32> to vector<1x32xf32>
    %30 = arith.mulf %25, %29 : vector<1x32xf32>
    %31 = arith.index_cast %1 : i32 to index
    %32 = memref.load %arg2[%31] : memref<2xf32, #tpu.memory_space<smem>>
    %33 = vector.broadcast %32 : f32 to vector<1x32xf32>
    %34 = arith.mulf %30, %33 : vector<1x32xf32>
    %35 = arith.index_cast %1 : i32 to index
    %36 = memref.load %arg3[%35] : memref<2xf32, #tpu.memory_space<smem>>
    %37 = vector.broadcast %36 : f32 to vector<1x32xf32>
    %38 = arith.addf %34, %37 : vector<1x32xf32>
    %c0_10 = arith.constant 0 : index
    %c0_11 = arith.constant 0 : index
    %39 = vector.load %arg4[%c0_10, %c0_11] : memref<32x32xf32, #tpu.memory_space<vmem>>, vector<32x32xf32>
    %cst_12 = arith.constant dense<0.000000e+00> : vector<1x32xf32>
    %40 = tpu.matmul %38, %39, %cst_12 {dimension_numbers = #tpu.dot_dimension_numbers<[1], [0], [0], [1], [0, 0, 1, 1], [], []>} : vector<1x32xf32>, vector<32x32xf32>, vector<1x32xf32> -> vector<1x32xf32>
    %c0_13 = arith.constant 0 : index
    %c0_14 = arith.constant 0 : index
    %41 = vector.load %arg5[%c0_13, %c0_14] : memref<1x32xf32, #tpu.memory_space<vmem>>, vector<1x32xf32>
    %42 = arith.addf %40, %41 : vector<1x32xf32>
    %cst_15 = arith.constant 0.000000e+00 : f32
    %43 = vector.broadcast %cst_15 : f32 to vector<1x32xf32>
    %44 = arith.maximumf %42, %43 : vector<1x32xf32>
    %45 = arith.index_cast %1 : i32 to index
    %46 = memref.load %arg6[%45] : memref<2xf32, #tpu.memory_space<smem>>
    %47 = arith.index_cast %1 : i32 to index
    %48 = memref.load %arg7[%47] : memref<2xf32, #tpu.memory_space<smem>>
    %cst_16 = arith.constant dense<0.000000e+00> : vector<1xf32>
    %49 = vector.multi_reduction <add>, %44, %cst_16 [1] : vector<1x32xf32> to vector<1xf32>
    %50 = vector.shape_cast %49 : vector<1xf32> to vector<1x1xf32>
    %cst_17 = arith.constant 3.200000e+01 : f32
    %51 = vector.broadcast %cst_17 : f32 to vector<1x1xf32>
    %52 = arith.divf %50, %51 : vector<1x1xf32>
    %cst_18 = arith.constant dense<0.000000e+00> : vector<1xf32>
    %53 = vector.multi_reduction <add>, %52, %cst_18 [0] : vector<1x1xf32> to vector<1xf32>
    %54 = vector.shape_cast %53 : vector<1xf32> to vector<1x1xf32>
    %cst_19 = arith.constant 1.000000e+00 : f32
    %55 = vector.broadcast %cst_19 : f32 to vector<1x1xf32>
    %56 = arith.divf %54, %55 : vector<1x1xf32>
    %57 = vector.broadcast %56 : vector<1x1xf32> to vector<1x32xf32>
    %58 = arith.subf %44, %57 : vector<1x32xf32>
    %59 = arith.mulf %58, %58 : vector<1x32xf32>
    %cst_20 = arith.constant dense<0.000000e+00> : vector<1xf32>
    %60 = vector.multi_reduction <add>, %59, %cst_20 [1] : vector<1x32xf32> to vector<1xf32>
    %61 = vector.shape_cast %60 : vector<1xf32> to vector<1x1xf32>
    %cst_21 = arith.constant 3.200000e+01 : f32
    %62 = vector.broadcast %cst_21 : f32 to vector<1x1xf32>
    %63 = arith.divf %61, %62 : vector<1x1xf32>
    %cst_22 = arith.constant dense<0.000000e+00> : vector<1xf32>
    %64 = vector.multi_reduction <add>, %63, %cst_22 [0] : vector<1x1xf32> to vector<1xf32>
    %65 = vector.shape_cast %64 : vector<1xf32> to vector<1x1xf32>
    %cst_23 = arith.constant 1.000000e+00 : f32
    %66 = vector.broadcast %cst_23 : f32 to vector<1x1xf32>
    %67 = arith.divf %65, %66 : vector<1x1xf32>
    %cst_24 = arith.constant 9.99999974E-6 : f32
    %68 = vector.broadcast %cst_24 : f32 to vector<1x1xf32>
    %69 = arith.addf %67, %68 : vector<1x1xf32>
    %70 = math.rsqrt %69 : vector<1x1xf32>
    %71 = vector.broadcast %70 : vector<1x1xf32> to vector<1x32xf32>
    %72 = arith.mulf %58, %71 : vector<1x32xf32>
    %73 = vector.broadcast %46 : f32 to vector<1x32xf32>
    %74 = arith.mulf %72, %73 : vector<1x32xf32>
    %75 = vector.broadcast %48 : f32 to vector<1x32xf32>
    %76 = arith.addf %74, %75 : vector<1x32xf32>
    %c0_25 = arith.constant 0 : index
    %c0_26 = arith.constant 0 : index
    %77 = vector.load %arg8[%c0_25, %c0_26] : memref<32x32xf32, #tpu.memory_space<vmem>>, vector<32x32xf32>
    %cst_27 = arith.constant dense<0.000000e+00> : vector<1x32xf32>
    %78 = tpu.matmul %76, %77, %cst_27 {dimension_numbers = #tpu.dot_dimension_numbers<[1], [0], [0], [1], [0, 0, 1, 1], [], []>} : vector<1x32xf32>, vector<32x32xf32>, vector<1x32xf32> -> vector<1x32xf32>
    %c0_28 = arith.constant 0 : index
    %c0_29 = arith.constant 0 : index
    %79 = vector.load %arg9[%c0_28, %c0_29] : memref<1x32xf32, #tpu.memory_space<vmem>>, vector<1x32xf32>
    %80 = arith.addf %78, %79 : vector<1x32xf32>
    %cst_30 = arith.constant 0.000000e+00 : f32
    %81 = vector.broadcast %cst_30 : f32 to vector<1x32xf32>
    %82 = arith.maximumf %80, %81 : vector<1x32xf32>
    %83 = arith.index_cast %1 : i32 to index
    %84 = memref.load %arg10[%83] : memref<2xf32, #tpu.memory_space<smem>>
    %85 = arith.index_cast %1 : i32 to index
    %86 = memref.load %arg11[%85] : memref<2xf32, #tpu.memory_space<smem>>
    %cst_31 = arith.constant dense<0.000000e+00> : vector<1xf32>
    %87 = vector.multi_reduction <add>, %82, %cst_31 [1] : vector<1x32xf32> to vector<1xf32>
    %88 = vector.shape_cast %87 : vector<1xf32> to vector<1x1xf32>
    %cst_32 = arith.constant 3.200000e+01 : f32
    %89 = vector.broadcast %cst_32 : f32 to vector<1x1xf32>
    %90 = arith.divf %88, %89 : vector<1x1xf32>
    %cst_33 = arith.constant dense<0.000000e+00> : vector<1xf32>
    %91 = vector.multi_reduction <add>, %90, %cst_33 [0] : vector<1x1xf32> to vector<1xf32>
    %92 = vector.shape_cast %91 : vector<1xf32> to vector<1x1xf32>
    %cst_34 = arith.constant 1.000000e+00 : f32
    %93 = vector.broadcast %cst_34 : f32 to vector<1x1xf32>
    %94 = arith.divf %92, %93 : vector<1x1xf32>
    %95 = vector.broadcast %94 : vector<1x1xf32> to vector<1x32xf32>
    %96 = arith.subf %82, %95 : vector<1x32xf32>
    %97 = arith.mulf %96, %96 : vector<1x32xf32>
    %cst_35 = arith.constant dense<0.000000e+00> : vector<1xf32>
    %98 = vector.multi_reduction <add>, %97, %cst_35 [1] : vector<1x32xf32> to vector<1xf32>
    %99 = vector.shape_cast %98 : vector<1xf32> to vector<1x1xf32>
    %cst_36 = arith.constant 3.200000e+01 : f32
    %100 = vector.broadcast %cst_36 : f32 to vector<1x1xf32>
    %101 = arith.divf %99, %100 : vector<1x1xf32>
    %cst_37 = arith.constant dense<0.000000e+00> : vector<1xf32>
    %102 = vector.multi_reduction <add>, %101, %cst_37 [0] : vector<1x1xf32> to vector<1xf32>
    %103 = vector.shape_cast %102 : vector<1xf32> to vector<1x1xf32>
    %cst_38 = arith.constant 1.000000e+00 : f32
    %104 = vector.broadcast %cst_38 : f32 to vector<1x1xf32>
    %105 = arith.divf %103, %104 : vector<1x1xf32>
    %cst_39 = arith.constant 9.99999974E-6 : f32
    %106 = vector.broadcast %cst_39 : f32 to vector<1x1xf32>
    %107 = arith.addf %105, %106 : vector<1x1xf32>
    %108 = math.rsqrt %107 : vector<1x1xf32>
    %109 = vector.broadcast %108 : vector<1x1xf32> to vector<1x32xf32>
    %110 = arith.mulf %96, %109 : vector<1x32xf32>
    %111 = vector.broadcast %84 : f32 to vector<1x32xf32>
    %112 = arith.mulf %110, %111 : vector<1x32xf32>
    %113 = vector.broadcast %86 : f32 to vector<1x32xf32>
    %114 = arith.addf %112, %113 : vector<1x32xf32>
    %c0_40 = arith.constant 0 : index
    %c0_41 = arith.constant 0 : index
    %115 = vector.load %arg12[%c0_40, %c0_41] : memref<32x128xf32, #tpu.memory_space<vmem>>, vector<32x128xf32>
    %cst_42 = arith.constant dense<0.000000e+00> : vector<1x128xf32>
    %116 = tpu.matmul %114, %115, %cst_42 {dimension_numbers = #tpu.dot_dimension_numbers<[1], [0], [0], [1], [0, 0, 1, 1], [], []>} : vector<1x32xf32>, vector<32x128xf32>, vector<1x128xf32> -> vector<1x128xf32>
    %c0_43 = arith.constant 0 : index
    %c0_44 = arith.constant 0 : index
    %117 = vector.load %arg13[%c0_43, %c0_44] : memref<1x128xf32, #tpu.memory_space<vmem>>, vector<1x128xf32>
    %118 = arith.addf %116, %117 : vector<1x128xf32>
    %c0_45 = arith.constant 0 : index
    %c0_46 = arith.constant 0 : index
    %c0_47 = arith.constant 0 : index
    %119 = vector.load %arg14[%c0_45, %c0_46, %c0_47] : memref<1x1x128xf32, #tpu.memory_space<vmem>>, vector<1x1x128xf32>
    %120 = vector.shape_cast %119 : vector<1x1x128xf32> to vector<1x128xf32>
    %121 = vector.shape_cast %118 : vector<1x128xf32> to vector<1x1x128xf32>
    tpu.vector_store %arg14[%c0_45, %c0_46, %c0_47], %121 {strides = array<i32>} : memref<1x1x128xf32, #tpu.memory_space<vmem>>, vector<1x1x128xf32>,
    return
  }
  func.func @transform_0(%arg0: i32) -> (i32, i32, i32) {
    %c0_i32 = arith.constant 0 : i32
    %c0_i32_0 = arith.constant 0 : i32
    %c0_i32_1 = arith.constant 0 : i32
    return %arg0, %c0_i32, %c0_i32_0 : i32, i32, i32
  }
  func.func @transform_1(%arg0: i32) -> i32 {
    %c0_i32 = arith.constant 0 : i32
    %c0_i32_0 = arith.constant 0 : i32
    return %c0_i32 : i32
  }
  func.func @transform_2(%arg0: i32) -> i32 {
    %c0_i32 = arith.constant 0 : i32
    %c0_i32_0 = arith.constant 0 : i32
    return %c0_i32 : i32
  }
  func.func @transform_3(%arg0: i32) -> (i32, i32) {
    %c0_i32 = arith.constant 0 : i32
    %c0_i32_0 = arith.constant 0 : i32
    %c0_i32_1 = arith.constant 0 : i32
    return %c0_i32, %c0_i32_0 : i32, i32
  }
  func.func @transform_4(%arg0: i32) -> (i32, i32) {
    %c0_i32 = arith.constant 0 : i32
    %c0_i32_0 = arith.constant 0 : i32
    %c0_i32_1 = arith.constant 0 : i32
    return %c0_i32, %c0_i32_0 : i32, i32
  }
  func.func @transform_5(%arg0: i32) -> i32 {
    %c0_i32 = arith.constant 0 : i32
    %c0_i32_0 = arith.constant 0 : i32
    return %c0_i32 : i32
  }
  func.func @transform_6(%arg0: i32) -> i32 {
    %c0_i32 = arith.constant 0 : i32
    %c0_i32_0 = arith.constant 0 : i32
    return %c0_i32 : i32
  }
  func.func @transform_7(%arg0: i32) -> (i32, i32) {
    %c0_i32 = arith.constant 0 : i32
    %c0_i32_0 = arith.constant 0 : i32
    %c0_i32_1 = arith.constant 0 : i32
    return %c0_i32, %c0_i32_0 : i32, i32
  }
  func.func @transform_8(%arg0: i32) -> (i32, i32) {
    %c0_i32 = arith.constant 0 : i32
    %c0_i32_0 = arith.constant 0 : i32
    %c0_i32_1 = arith.constant 0 : i32
    return %c0_i32, %c0_i32_0 : i32, i32
  }
  func.func @transform_9(%arg0: i32) -> i32 {
    %c0_i32 = arith.constant 0 : i32
    %c0_i32_0 = arith.constant 0 : i32
    return %c0_i32 : i32
  }
  func.func @transform_10(%arg0: i32) -> i32 {
    %c0_i32 = arith.constant 0 : i32
    %c0_i32_0 = arith.constant 0 : i32
    return %c0_i32 : i32
  }
  func.func @transform_11(%arg0: i32) -> (i32, i32) {
    %c0_i32 = arith.constant 0 : i32
    %c0_i32_0 = arith.constant 0 : i32
    %c0_i32_1 = arith.constant 0 : i32
    return %c0_i32, %c0_i32_0 : i32, i32
  }
  func.func @transform_12(%arg0: i32) -> (i32, i32) {
    %c0_i32 = arith.constant 0 : i32
    %c0_i32_0 = arith.constant 0 : i32
    %c0_i32_1 = arith.constant 0 : i32
    return %c0_i32, %c0_i32_0 : i32, i32
  }
  func.func @transform_13(%arg0: i32) -> (i32, i32, i32) {
    %c0_i32 = arith.constant 0 : i32
    %c0_i32_0 = arith.constant 0 : i32
    %c0_i32_1 = arith.constant 0 : i32
    return %arg0, %c0_i32, %c0_i32_0 : i32, i32, i32
  }
}

</mosaic_0001>

<bundles_post_ra>
// kernel: multitask_transformer_forward.5
= control target key start
LH: loop header
LB: loop body
LE: loop exit
PB: predicated region body
PF: predicated region fallthrough
CT: control target
= control target key end

     0   :  { %13 = vsyncpa [#allocation3], 0  ;;  %s950_s0 = inlined_call_operand.vmem [shape: f32[2,8,16], index: 0, kind: input, shape index: {}]   ;;  %s951_s1 = inlined_call_operand.vmem [shape: f32[16,32], index: 1, kind: input, shape index: {}]   ;;  %s952_s2 = inlined_call_operand.vmem [shape: f32[1,32], index: 2, kind: input, shape index: {}]   ;;  %s953_s3 = inlined_call_operand.vmem [shape: f32[8,32], index: 3, kind: input, shape index: {}]   ;;  %s954_s4 = inlined_call_operand.vmem [shape: f32[2], index: 4, kind: input, shape index: {}]   ;;  %s955_s5 = inlined_call_operand.vmem [shape: f32[2], index: 5, kind: input, shape index: {}]   ;;  %s956_s6 = inlined_call_operand.vmem [shape: f32[2], index: 6, kind: input, shape index: {}]   ;;  %s957_s7 = inlined_call_operand.vmem [shape: f32[2], index: 7, kind: input, shape index: {}]   ;;  %s958_s8 = inlined_call_operand.vmem [shape: f32[2,8,32], index: 8, kind: output, shape index: {}]  }
   0x1   :  { %14 = vsyncpa [#allocation5], 0 }
   0x2   :  { %15 = vsyncpa [#allocation8], 0  ;;  %s819_s27 = smov 0  }
   0x3 LB: > { %s258_s30 = sshll.u32 %s955_s5, 4  ;;  %s828_s9 = sadd.s32 4294967295, %s766_s27   ;;  %s766_s27 = sphi %s819_s27, %s21_s27   ;;  %s259_s30 = int_to_ptr.vmem [resolvable:$true] %s258_s30 }
   0x4   : > { %p606_p0 = scmp.ge.s32.totalorder %s766_s27, 1  ;;  %p225_p1 = scmp.lt.s32.totalorder %s766_s27, 3 }
   0x5   : > { %p662_p2 = scmp.eq.s32.totalorder %s828_s9, 0  ;;  %s247_s13 = sshll.u32 %s954_s4, 4  ;;  %s840_s13 = int_to_ptr.vmem [resolvable:$true] %s247_s13 }
   0x6   : > { %p833_p3 = pnand %p606_p0, %p225_p1  ;;  %s269_s16 = sshll.u32 %s956_s6, 4  ;;  %s847_s16 = int_to_ptr.vmem [resolvable:$true] %s269_s16 }
   0x7   : > { %s280_s20 = sshll.u32 %s957_s7, 4  ;;  %s688_s21 = scalar_lea.vmem %s259_s30, 16  ;;  %s858_s20 = int_to_ptr.vmem [resolvable:$true] %s280_s20 }
   0x8   : > { %p649_p4 = pneg %p833_p3  ;;  %p689_p6 = scmp.ne.s32.totalorder %s259_s30, %s688_s21 }
   0x9   : > { %p696_p10 = scmp.lt.s32.totalorder %s259_s30, %s259_s30  ;;  %p697_p11 = scmp.lt.s32.totalorder %s688_s21, %s688_s21 }
   0xa   : > { %p851_p5 = pnand %p662_p2, %p649_p4 }
   0xb   : > { %p698_p12 = por %p697_p11, %p696_p10 }
   0xc   : > { %p690_p7 = pneg %p851_p5 }
   0xe   : > { %p691_p8 = pnand %p690_p7, %p689_p6 }
  0x10   : > { %p692_p9 = pneg %p691_p8 }
  0x12   : > { %p699_p13 = pnand %p698_p12, %p692_p9 }
  0x14   : > { %702 = shalt.err (!%p699_p13)
}
  0x15   : > { %s768_s22 = smov [#allocation4]   ;;  %s703_s23 = scalar_lea.vmem %s840_s13, 16 }
  0x16   : > { %655 = dma.vmem_to_smem (!%p851_p5), %s259_s30, 16, %s768_s22, [#allocation5]  }
  0x17   : > { %p704_p0 = scmp.ne.s32.totalorder %s840_s13, %s703_s23  ;;  %p711_p6 = scmp.lt.s32.totalorder %s840_s13, %s840_s13 }
  0x18   : > { %p712_p8 = scmp.lt.s32.totalorder %s703_s23, %s703_s23 }
  0x19   : > { %p706_p1 = pnand %p704_p0, %p690_p7 }
  0x1a   : > { %p713_p10 = por %p712_p8, %p711_p6 }
  0x1b   : > { %p707_p4 = pneg %p706_p1 }
  0x1d   : > { %p714_p9 = pnand %p713_p10, %p707_p4 }
  0x1f   : > { %717 = shalt.err (!%p714_p9)
}
  0x20   : > { %s769_s24 = smov [#allocation2]   ;;  %s718_s25 = scalar_lea.vmem %s847_s16, 16 }
  0x21   : > { %652 = dma.vmem_to_smem (!%p851_p5), %s840_s13, 16, %s769_s24, [#allocation3]  }
  0x22   : > { %p719_p11 = scmp.ne.s32.totalorder %s847_s16, %s718_s25  ;;  %p726_p0 = scmp.lt.s32.totalorder %s847_s16, %s847_s16 }
  0x23   : > { %p727_p1 = scmp.lt.s32.totalorder %s718_s25, %s718_s25 }
  0x24   : > { %p721_p12 = pnand %p719_p11, %p690_p7 }
  0x25   : > { %p728_p4 = por %p727_p1, %p726_p0 }
  0x26   : > { %p722_p13 = pneg %p721_p12 }
  0x28   : > { %p729_p6 = pnand %p728_p4, %p722_p13 }
  0x2a   : > { %732 = shalt.err (!%p729_p6)
}
  0x2b   : > { %s770_s26 = smov [#allocation6]   ;;  %s733_s28 = scalar_lea.vmem %s858_s20, 16 }
  0x2c   : > { %658 = dma.vmem_to_smem (!%p851_p5), %s847_s16, 16, %s770_s26, [#allocation5]  }
  0x2d   : > { %p734_p8 = scmp.ne.s32.totalorder %s858_s20, %s733_s28  ;;  %p741_p11 = scmp.lt.s32.totalorder %s858_s20, %s858_s20 }
  0x2e   : > { %p742_p12 = scmp.lt.s32.totalorder %s733_s28, %s733_s28 }
  0x2f   : > { %p736_p10 = pnand %p734_p8, %p690_p7 }
  0x30   : > { %p743_p13 = por %p742_p12, %p741_p11 }
  0x31   : > { %p737_p9 = pneg %p736_p10 }
  0x33   : > { %p744_p0 = pnand %p743_p13, %p737_p9 }
  0x35   : > { %747 = shalt.err (!%p744_p0)
}
  0x36   : > { %s771_s29 = smov [#allocation7]   ;;  %300 = sbr.rel (%p833_p3) target bundleno = 943 (0x3af), region = 52 }
  0x37   : > { %661 = dma.vmem_to_smem (!%p851_p5), %s858_s20, 16, %s771_s29, [#allocation8]  }
  0x3b   : > { %753 = dma.done.wait (%p662_p2), [#allocation3], 16  }
  0x3c   : > { %755 = vsyncadd (%p662_p2), [#allocation3], 4294967280 }
  0x3d   : > { %757 = dma.done.wait (%p662_p2), [#allocation5], 32  }
  0x3e   : > { %759 = vsyncadd (%p662_p2), [#allocation5], 4294967264 }
  0x3f   : > { %761 = dma.done.wait (%p662_p2), [#allocation8], 16  }
  0x40   : > { %763 = vsyncadd (%p662_p2), [#allocation8], 4294967280 }
  0x41   : > { %318 = sfence }
  0x42   : > { %v354_v0 = vld [vmem:[%s951_s1 + $0x8] sm:$0xff]  ;;  %p345_p3 = scmp.lt.s32.totalorder %s828_s9, 1  ;;  %v772_v1 = vmov 0.0   ;;  %v353_v2 = vld [vmem:[%s951_s1] sm:$0xff]  ;;  %vm773_vm0 = vmmov 0   ;;  %vm358_vm1 = vcmask 130048  }
  0x43   : > { %626 = vmatprep.subr.mxu0 %v772_v1  ;;  %630 = vmatprep.mubr.msk.f32.mxu0 %vm773_vm0, %v772_v1  ;;  %v620_v4 = vld [vmem:[%s952_s2] ss:$0 sm:$0xff]  ;;  %vm441_vm2 = vcmask 261120   ;;  %s439_s20 = sld [smem:[#allocation2 + %s828_s9]] }
  0x44   : > { %627 = vmatpush3.msra.mxu0 %v354_v0  ;;  %s919_s13 = scalar_select %p345_p3, %s828_s9, 1  ;;  %v356_v36 = vld [vmem:[%s953_s3] sm:$0xff] }
  0x45   : > { %628 = vmatprep.subr.mxu0 %v772_v1  ;;  %s440_s21 = sld [smem:[#allocation4 + %s828_s9]] }
  0x46   : > { %629 = vmatpush3.msra.mxu0 %v353_v2  ;;  %s617_s14 = sshll.u32 %s919_s13, 3  ;;  %s476_s24 = sld [smem:[#allocation6 + %s828_s9]] }
  0x47   : > { %s348_s17 = scalar_lea.vmem %s950_s0, %s617_s14  ;;  %s477_s25 = sld [smem:[#allocation7 + %s828_s9]] }
  0x48   : > { %v357_v3 = vld [vmem:[%s348_s17] sm:$0xff]  ;;  %s352_s29 = scalar_lea.vmem %s958_s8, %s617_s14 }
  0x49   : > { %631 = vmatmul.mubr.msk.f32.vlgmr.msra.gmra.mxu0 %vm358_vm1, %v357_v3  ;;  %v471_v32 = vstv %s439_s20 }
  0x4b   : > { %v473_v34 = vstv %s440_s21 }
  0x4c   : > { %v505_v63 = vstv %s476_s24 }
  0x4d   : > { %v507_v1 = vstv %s477_s25 }
 0x109   : > { %v428_v5 = vpop.f32.mrf.mxu0 }
 0x10a   : > { %v438_v6 = vadd.f32 %v620_v4, %v428_v5 }
 0x10b   : > { %v632_v7 = vpop.f32.mrf.mxu0 }
 0x10c   : > { %v442_v8 = vsel %vm441_vm2, %v438_v6, 0.0 }
 0x10d   : > { %443 = vadd.xlane.f32.xlu0 %v442_v8 }
 0x196   : > { %v444_v9 = vpop.xlane.xlu0 %443 }
 0x197   : > { %v446_v10 = vmul.f32 0.03125, %v444_v9 }
 0x199   : > { %v447_v11 = vrot.slane %v446_v10, 4 }
 0x19b   : > { %v448_v12 = vadd.f32 %v447_v11, %v446_v10 }
 0x19d   : > { %v449_v13 = vrot.slane %v448_v12, 2 }
 0x19f   : > { %v450_v14 = vadd.f32 %v449_v13, %v448_v12 }
 0x1a1   : > { %v451_v15 = vrot.slane %v450_v14, 1 }
 0x1a3   : > { %v452_v16 = vadd.f32 %v451_v15, %v450_v14 }
 0x1a5   : > { %v454_v17 = vmul.f32 0.125, %v452_v16 }
 0x1a7   : > { %v455_v18 = vsub.f32 %v438_v6, %v454_v17 }
 0x1a9   : > { %v456_v19 = vmul.f32 %v455_v18, %v455_v18 }
 0x1ab   : > { %v457_v20 = vsel %vm441_vm2, %v456_v19, 0.0 }
 0x1ac   : > { %458 = vadd.xlane.f32.xlu0 %v457_v20 }
 0x235   : > { %v459_v21 = vpop.xlane.xlu0 %458 }
 0x236   : > { %v460_v22 = vmul.f32 0.03125, %v459_v21 }
 0x238   : > { %v461_v23 = vrot.slane %v460_v22, 4 }
 0x23a   : > { %v462_v24 = vadd.f32 %v461_v23, %v460_v22 }
 0x23c   : > { %v463_v25 = vrot.slane %v462_v24, 2 }
 0x23e   : > { %v464_v26 = vadd.f32 %v463_v25, %v462_v24 }
 0x240   : > { %v465_v27 = vrot.slane %v464_v26, 1 }
 0x242   : > { %v466_v28 = vadd.f32 %v465_v27, %v464_v26 }
 0x244   : > { %v467_v29 = vmul.f32 0.125, %v466_v28 }
 0x246   : > { %v468_v30 = vadd.f32 1e-05, %v467_v29 }
 0x248   : > { %684 = vrsqrt.f32 %v468_v30 }
 0x255   : > { %v685_v31 = vpop.eup %684 }
 0x256   : > { %v470_v33 = vmul.f32 %v685_v31, %v455_v18 }
 0x258   : > { %v472_v35 = vmul.f32 %v471_v32, %v470_v33 }
 0x25a   : > { %v474_v37 = vadd.f32 %v473_v34, %v472_v35 }
 0x25c   : > { %v475_v38 = vadd.f32 %v474_v37, %v356_v36 }
 0x25e   : > { %v478_v39 = vsel %vm441_vm2, %v475_v38, 0.0 }
 0x25f   : > { %479 = vadd.xlane.f32.xlu1 %v478_v39 }
 0x2e8   : > { %v480_v40 = vpop.xlane.xlu1 %479 }
 0x2e9   : > { %v481_v41 = vmul.f32 0.03125, %v480_v40 }
 0x2eb   : > { %v482_v42 = vrot.slane %v481_v41, 4 }
 0x2ed   : > { %v483_v43 = vadd.f32 %v482_v42, %v481_v41 }
 0x2ef   : > { %v484_v44 = vrot.slane %v483_v43, 2 }
 0x2f1   : > { %v485_v45 = vadd.f32 %v484_v44, %v483_v43 }
 0x2f3   : > { %v486_v46 = vrot.slane %v485_v45, 1 }
 0x2f5   : > { %v487_v47 = vadd.f32 %v486_v46, %v485_v45 }
 0x2f7   : > { %v488_v48 = vmul.f32 0.125, %v487_v47 }
 0x2f9   : > { %v489_v49 = vsub.f32 %v475_v38, %v488_v48 }
 0x2fb   : > { %v490_v50 = vmul.f32 %v489_v49, %v489_v49 }
 0x2fd   : > { %v491_v51 = vsel %vm441_vm2, %v490_v50, 0.0 }
 0x2fe   : > { %492 = vadd.xlane.f32.xlu1 %v491_v51 }
 0x387   : > { %v493_v52 = vpop.xlane.xlu1 %492 }
 0x388   : > { %v494_v53 = vmul.f32 0.03125, %v493_v52 }
 0x38a   : > { %v495_v54 = vrot.slane %v494_v53, 4 }
 0x38c   : > { %v496_v55 = vadd.f32 %v495_v54, %v494_v53 }
 0x38e   : > { %v497_v56 = vrot.slane %v496_v55, 2 }
 0x390   : > { %v498_v57 = vadd.f32 %v497_v56, %v496_v55 }
 0x392   : > { %v499_v58 = vrot.slane %v498_v57, 1 }
 0x394   : > { %v500_v59 = vadd.f32 %v499_v58, %v498_v57 }
 0x396   : > { %v501_v60 = vmul.f32 0.125, %v500_v59 }
 0x398   : > { %v502_v61 = vadd.f32 1e-05, %v501_v60 }
 0x39a   : > { %686 = vrsqrt.f32 %v502_v61 }
 0x3a7   : > { %v687_v62 = vpop.eup %686 }
 0x3a8   : > { %v504_v0 = vmul.f32 %v687_v62, %v489_v49 }
 0x3aa   : > { %v506_v2 = vmul.f32 %v505_v63, %v504_v0 }
 0x3ac   : > { %v508_v3 = vadd.f32 %v507_v1, %v506_v2 }
 0x3ae   : > { %509 = vst.msk [vmem:[%s352_s29] sm:$0xff] %vm441_vm2, %v508_v3 }
 0x3af PF: > { %s21_s27 = sadd.s32 1, %s766_s27  }
 0x3b0   : > { %p18_p2 = scmp.ge.s32.totalorder %s21_s27, 4  }
 0x3b2   :  { %20 = sbr.rel (!%p18_p2) target bundleno = 3 (0x3), region = 99 }
 0x3b7   :  { %529 = vsyncpa [#allocation3], 1 }
 0x3b8   :  { %531 = vsyncpa [#allocation3 + $0x1], 1 }
 0x3b9   :  { %532 = vsyncpa [#allocation5], 1 }
 0x3ba   :  { %533 = vsyncpa [#allocation8], 1 }

// kernel: multitask_transformer_forward.6
= control target key start
LH: loop header
LB: loop body
LE: loop exit
PB: predicated region body
PF: predicated region fallthrough
CT: control target
= control target key end

     0   :  { %13 = vsyncpa [#allocation3], 0  ;;  %s1025_s0 = inlined_call_operand.vmem [shape: f32[2,8,16], index: 0, kind: input, shape index: {}]   ;;  %s1026_s1 = inlined_call_operand.vmem [shape: f32[8,32], index: 1, kind: input, shape index: {}]   ;;  %s1027_s2 = inlined_call_operand.vmem [shape: f32[1,32], index: 2, kind: input, shape index: {}]   ;;  %s1028_s3 = inlined_call_operand.vmem [shape: f32[16,32], index: 3, kind: input, shape index: {}]   ;;  %s1029_s4 = inlined_call_operand.vmem [shape: f32[2], index: 4, kind: input, shape index: {}]   ;;  %s1030_s5 = inlined_call_operand.vmem [shape: f32[2], index: 5, kind: input, shape index: {}]   ;;  %s1031_s6 = inlined_call_operand.vmem [shape: f32[2], index: 6, kind: input, shape index: {}]   ;;  %s1032_s7 = inlined_call_operand.vmem [shape: f32[2], index: 7, kind: input, shape index: {}]   ;;  %s1033_s8 = inlined_call_operand.vmem [shape: f32[2,16,32], index: 8, kind: output, shape index: {}]  }
   0x1   :  { %14 = vsyncpa [#allocation5], 0 }
   0x2   :  { %15 = vsyncpa [#allocation8], 0  ;;  %s892_s27 = smov 0  }
   0x3 LB: > { %s258_s30 = sshll.u32 %s1030_s5, 4  ;;  %s901_s9 = sadd.s32 4294967295, %s841_s27   ;;  %s841_s27 = sphi %s892_s27, %s21_s27   ;;  %s259_s30 = int_to_ptr.vmem [resolvable:$true] %s258_s30 }
   0x4   : > { %p681_p0 = scmp.ge.s32.totalorder %s841_s27, 1  ;;  %p225_p1 = scmp.lt.s32.totalorder %s841_s27, 3 }
   0x5   : > { %p738_p2 = scmp.eq.s32.totalorder %s901_s9, 0  ;;  %s247_s13 = sshll.u32 %s1029_s4, 4  ;;  %s913_s13 = int_to_ptr.vmem [resolvable:$true] %s247_s13 }
   0x6   : > { %p906_p3 = pnand %p681_p0, %p225_p1  ;;  %s269_s16 = sshll.u32 %s1031_s6, 4  ;;  %s920_s16 = int_to_ptr.vmem [resolvable:$true] %s269_s16 }
   0x7   : > { %s280_s20 = sshll.u32 %s1032_s7, 4  ;;  %s763_s21 = scalar_lea.vmem %s259_s30, 16  ;;  %s931_s20 = int_to_ptr.vmem [resolvable:$true] %s280_s20 }
   0x8   : > { %p725_p4 = pneg %p906_p3  ;;  %p764_p6 = scmp.ne.s32.totalorder %s259_s30, %s763_s21 }
   0x9   : > { %p771_p10 = scmp.lt.s32.totalorder %s259_s30, %s259_s30  ;;  %p772_p11 = scmp.lt.s32.totalorder %s763_s21, %s763_s21 }
   0xa   : > { %p924_p5 = pnand %p738_p2, %p725_p4 }
   0xb   : > { %p773_p12 = por %p772_p11, %p771_p10 }
   0xc   : > { %p765_p7 = pneg %p924_p5 }
   0xe   : > { %p766_p8 = pnand %p765_p7, %p764_p6 }
  0x10   : > { %p767_p9 = pneg %p766_p8 }
  0x12   : > { %p774_p13 = pnand %p773_p12, %p767_p9 }
  0x14   : > { %777 = shalt.err (!%p774_p13)
}
  0x15   : > { %s843_s22 = smov [#allocation4]   ;;  %s778_s23 = scalar_lea.vmem %s913_s13, 16 }
  0x16   : > { %731 = dma.vmem_to_smem (!%p924_p5), %s259_s30, 16, %s843_s22, [#allocation5]  }
  0x17   : > { %p779_p0 = scmp.ne.s32.totalorder %s913_s13, %s778_s23  ;;  %p786_p6 = scmp.lt.s32.totalorder %s913_s13, %s913_s13 }
  0x18   : > { %p787_p8 = scmp.lt.s32.totalorder %s778_s23, %s778_s23 }
  0x19   : > { %p781_p1 = pnand %p779_p0, %p765_p7 }
  0x1a   : > { %p788_p10 = por %p787_p8, %p786_p6 }
  0x1b   : > { %p782_p4 = pneg %p781_p1 }
  0x1d   : > { %p789_p9 = pnand %p788_p10, %p782_p4 }
  0x1f   : > { %792 = shalt.err (!%p789_p9)
}
  0x20   : > { %s844_s24 = smov [#allocation2]   ;;  %s793_s25 = scalar_lea.vmem %s920_s16, 16 }
  0x21   : > { %728 = dma.vmem_to_smem (!%p924_p5), %s913_s13, 16, %s844_s24, [#allocation3]  }
  0x22   : > { %p794_p11 = scmp.ne.s32.totalorder %s920_s16, %s793_s25  ;;  %p801_p0 = scmp.lt.s32.totalorder %s920_s16, %s920_s16 }
  0x23   : > { %p802_p1 = scmp.lt.s32.totalorder %s793_s25, %s793_s25 }
  0x24   : > { %p796_p12 = pnand %p794_p11, %p765_p7 }
  0x25   : > { %p803_p4 = por %p802_p1, %p801_p0 }
  0x26   : > { %p797_p13 = pneg %p796_p12 }
  0x28   : > { %p804_p6 = pnand %p803_p4, %p797_p13 }
  0x2a   : > { %807 = shalt.err (!%p804_p6)
}
  0x2b   : > { %s845_s26 = smov [#allocation6]   ;;  %s808_s28 = scalar_lea.vmem %s931_s20, 16 }
  0x2c   : > { %734 = dma.vmem_to_smem (!%p924_p5), %s920_s16, 16, %s845_s26, [#allocation5]  }
  0x2d   : > { %p809_p8 = scmp.ne.s32.totalorder %s931_s20, %s808_s28  ;;  %p816_p11 = scmp.lt.s32.totalorder %s931_s20, %s931_s20 }
  0x2e   : > { %p817_p12 = scmp.lt.s32.totalorder %s808_s28, %s808_s28 }
  0x2f   : > { %p811_p10 = pnand %p809_p8, %p765_p7 }
  0x30   : > { %p818_p13 = por %p817_p12, %p816_p11 }
  0x31   : > { %p812_p9 = pneg %p811_p10 }
  0x33   : > { %p819_p0 = pnand %p818_p13, %p812_p9 }
  0x35   : > { %822 = shalt.err (!%p819_p0)
}
  0x36   : > { %s846_s29 = smov [#allocation7]   ;;  %300 = sbr.rel (%p906_p3) target bundleno = 1094 (0x446), region = 52 }
  0x37   : > { %737 = dma.vmem_to_smem (!%p924_p5), %s931_s20, 16, %s846_s29, [#allocation8]  }
  0x3b   : > { %828 = dma.done.wait (%p738_p2), [#allocation3], 16  }
  0x3c   : > { %830 = vsyncadd (%p738_p2), [#allocation3], 4294967280 }
  0x3d   : > { %832 = dma.done.wait (%p738_p2), [#allocation5], 32  }
  0x3e   : > { %834 = vsyncadd (%p738_p2), [#allocation5], 4294967264 }
  0x3f   : > { %836 = dma.done.wait (%p738_p2), [#allocation8], 16  }
  0x40   : > { %838 = vsyncadd (%p738_p2), [#allocation8], 4294967280 }
  0x41   : > { %318 = sfence }
  0x42   : > { %p346_p3 = scmp.lt.s32.totalorder %s901_s9, 1  ;;  %v355_v0 = vld [vmem:[%s1026_s1] sm:$0xff]  ;;  %vm398_vm0 = vcmask 64512   ;;  %vm482_vm1 = vcmask 261120   ;;  %s480_s18 = sld [smem:[#allocation2 + %s901_s9]]  ;;  %v358_v52 = vld [vmem:[%s1028_s3 + $0x8] sm:$0xff] }
  0x43   : > { %704 = vmatprep.subr.mxu0 %v355_v0  ;;  %v695_v4 = vld [vmem:[%s1027_s2] ss:$0 sm:$0xff]  ;;  %s481_s19 = sld [smem:[#allocation4 + %s901_s9]] }
  0x44   : > { %s986_s30 = scalar_select %p346_p3, %s901_s9, 1  ;;  %705 = vmatpush3.msra.mxu0 %v355_v0  ;;  %v357_v49 = vld [vmem:[%s1028_s3] sm:$0xff] }
  0x45   : > { %s533_s24 = sld [smem:[#allocation6 + %s901_s9]] }
  0x46   : > { %s692_s10 = sshll.u32 %s986_s30, 3  ;;  %s534_s25 = sld [smem:[#allocation7 + %s901_s9]] }
  0x47   : > { %s349_s15 = scalar_lea.vmem %s1025_s0, %s692_s10  ;;  %s700_s26 = sshll.u32 %s986_s30, 4 }
  0x48   : > { %v359_v1 = vld [vmem:[%s349_s15] sm:$0xff]  ;;  %v525_v43 = vstv %s480_s18  ;;  %s354_s10 = scalar_lea.vmem %s1033_s8, %s700_s26 }
  0x49   : > { %366 = vxpose.xlu0.b32.start.end [1/1] (short) (narrow) %v359_v1, 16  ;;  %v528_v46 = vstv %s481_s19 }
  0xc5   : > { %v382_v2 = vpop.trf.xlu0 }
  0xc6   : > { %706 = vmatprep.mubr.msk.f32.mxu0 %vm398_vm0, %v382_v2 }
  0xc9   : > { %v383_v3 = vpop.trf.xlu0 }
  0xca   : > { %707 = vmatmul.mubr.msk.f32.vlgmr.msra.gmra.mxu0 %vm398_vm0, %v383_v3 }
 0x18a   : > { %v708_v5 = vpop.f32.mrf.mxu0 }
 0x18b   : > { %v477_v6 = vadd.f32 %v708_v5, %v695_v4 }
 0x18c   : > { %v471_v7 = vpop.f32.mrf.mxu0 }
 0x18d   : > { %v472_v8 = vadd.f32 %v695_v4, %v471_v7  ;;  %v486_v9 = vsel %vm482_vm1, %v477_v6, 0.0 }
 0x18e   : > { %487 = vadd.xlane.f32.xlu1 %v486_v9 }
 0x18f   : > { %v483_v10 = vsel %vm482_vm1, %v472_v8, 0.0 }
 0x190   : > { %484 = vadd.xlane.f32.xlu0 %v483_v10 }
 0x217   : > { %v488_v11 = vpop.xlane.xlu1 %487 }
 0x218   : > { %v491_v13 = vmul.f32 0.03125, %v488_v11 }
 0x219   : > { %v485_v12 = vpop.xlane.xlu0 %484 }
 0x21a   : > { %v490_v14 = vmul.f32 0.03125, %v485_v12 }
 0x21c   : > { %v492_v15 = vadd.f32 %v491_v13, %v490_v14 }
 0x21e   : > { %v493_v16 = vrot.slane %v492_v15, 4 }
 0x220   : > { %v494_v17 = vadd.f32 %v493_v16, %v492_v15 }
 0x222   : > { %v495_v18 = vrot.slane %v494_v17, 2 }
 0x224   : > { %v496_v19 = vadd.f32 %v495_v18, %v494_v17 }
 0x226   : > { %v497_v20 = vrot.slane %v496_v19, 1 }
 0x228   : > { %v498_v21 = vadd.f32 %v497_v20, %v496_v19 }
 0x22a   : > { %v500_v22 = vmul.f32 0.0625, %v498_v21 }
 0x22c   : > { %v501_v23 = vsub.f32 %v472_v8, %v500_v22  ;;  %v502_v24 = vsub.f32 %v477_v6, %v500_v22 }
 0x22e   : > { %v503_v25 = vmul.f32 %v501_v23, %v501_v23  ;;  %v504_v27 = vmul.f32 %v502_v24, %v502_v24 }
 0x230   : > { %v505_v26 = vsel %vm482_vm1, %v503_v25, 0.0  ;;  %v508_v28 = vsel %vm482_vm1, %v504_v27, 0.0  ;;  %v575_v25 = vstv %s533_s24 }
 0x231   : > { %506 = vadd.xlane.f32.xlu1 %v505_v26 }
 0x235   : > { %509 = vadd.xlane.f32.xlu1 %v508_v28  ;;  %v578_v28 = vstv %s534_s25 }
 0x2ba   : > { %v507_v29 = vpop.xlane.xlu1 %506 }
 0x2bb   : > { %v511_v31 = vmul.f32 0.03125, %v507_v29 }
 0x2be   : > { %v510_v30 = vpop.xlane.xlu1 %509 }
 0x2bf   : > { %v512_v32 = vmul.f32 0.03125, %v510_v30 }
 0x2c1   : > { %v513_v33 = vadd.f32 %v512_v32, %v511_v31 }
 0x2c3   : > { %v514_v34 = vrot.slane %v513_v33, 4 }
 0x2c5   : > { %v515_v35 = vadd.f32 %v514_v34, %v513_v33 }
 0x2c7   : > { %v516_v36 = vrot.slane %v515_v35, 2 }
 0x2c9   : > { %v517_v37 = vadd.f32 %v516_v36, %v515_v35 }
 0x2cb   : > { %v518_v38 = vrot.slane %v517_v37, 1 }
 0x2cd   : > { %v519_v39 = vadd.f32 %v518_v38, %v517_v37 }
 0x2cf   : > { %v520_v40 = vmul.f32 0.0625, %v519_v39 }
 0x2d1   : > { %v521_v41 = vadd.f32 1e-05, %v520_v40 }
 0x2d3   : > { %759 = vrsqrt.f32 %v521_v41 }
 0x2e0   : > { %v760_v42 = vpop.eup %759 }
 0x2e1   : > { %v523_v44 = vmul.f32 %v760_v42, %v501_v23  ;;  %v524_v45 = vmul.f32 %v760_v42, %v502_v24 }
 0x2e3   : > { %v526_v47 = vmul.f32 %v525_v43, %v523_v44  ;;  %v527_v48 = vmul.f32 %v525_v43, %v524_v45 }
 0x2e5   : > { %v529_v50 = vadd.f32 %v528_v46, %v526_v47  ;;  %v530_v51 = vadd.f32 %v528_v46, %v527_v48 }
 0x2e7   : > { %v531_v53 = vadd.f32 %v529_v50, %v357_v49  ;;  %v532_v55 = vadd.f32 %v530_v51, %v358_v52 }
 0x2e9   : > { %v535_v54 = vsel %vm482_vm1, %v531_v53, 0.0  ;;  %v538_v56 = vsel %vm482_vm1, %v532_v55, 0.0 }
 0x2ea   : > { %536 = vadd.xlane.f32.xlu1 %v535_v54 }
 0x2ee   : > { %539 = vadd.xlane.f32.xlu1 %v538_v56 }
 0x373   : > { %v537_v57 = vpop.xlane.xlu1 %536 }
 0x374   : > { %v541_v59 = vmul.f32 0.03125, %v537_v57 }
 0x377   : > { %v540_v58 = vpop.xlane.xlu1 %539 }
 0x378   : > { %v542_v60 = vmul.f32 0.03125, %v540_v58 }
 0x37a   : > { %v543_v61 = vadd.f32 %v542_v60, %v541_v59 }
 0x37c   : > { %v544_v62 = vrot.slane %v543_v61, 4 }
 0x37e   : > { %v545_v63 = vadd.f32 %v544_v62, %v543_v61 }
 0x380   : > { %v546_v0 = vrot.slane %v545_v63, 2 }
 0x382   : > { %v547_v1 = vadd.f32 %v546_v0, %v545_v63 }
 0x384   : > { %v548_v2 = vrot.slane %v547_v1, 1 }
 0x386   : > { %v549_v3 = vadd.f32 %v548_v2, %v547_v1 }
 0x388   : > { %v550_v4 = vmul.f32 0.0625, %v549_v3 }
 0x38a   : > { %v551_v5 = vsub.f32 %v531_v53, %v550_v4  ;;  %v552_v6 = vsub.f32 %v532_v55, %v550_v4 }
 0x38c   : > { %v553_v7 = vmul.f32 %v551_v5, %v551_v5  ;;  %v554_v9 = vmul.f32 %v552_v6, %v552_v6 }
 0x38e   : > { %v555_v8 = vsel %vm482_vm1, %v553_v7, 0.0  ;;  %v558_v10 = vsel %vm482_vm1, %v554_v9, 0.0 }
 0x38f   : > { %556 = vadd.xlane.f32.xlu1 %v555_v8 }
 0x393   : > { %559 = vadd.xlane.f32.xlu1 %v558_v10 }
 0x418   : > { %v557_v11 = vpop.xlane.xlu1 %556 }
 0x419   : > { %v561_v13 = vmul.f32 0.03125, %v557_v11 }
 0x41c   : > { %v560_v12 = vpop.xlane.xlu1 %559 }
 0x41d   : > { %v562_v14 = vmul.f32 0.03125, %v560_v12 }
 0x41f   : > { %v563_v15 = vadd.f32 %v562_v14, %v561_v13 }
 0x421   : > { %v564_v16 = vrot.slane %v563_v15, 4 }
 0x423   : > { %v565_v17 = vadd.f32 %v564_v16, %v563_v15 }
 0x425   : > { %v566_v18 = vrot.slane %v565_v17, 2 }
 0x427   : > { %v567_v19 = vadd.f32 %v566_v18, %v565_v17 }
 0x429   : > { %v568_v20 = vrot.slane %v567_v19, 1 }
 0x42b   : > { %v569_v21 = vadd.f32 %v568_v20, %v567_v19 }
 0x42d   : > { %v570_v22 = vmul.f32 0.0625, %v569_v21 }
 0x42f   : > { %v571_v23 = vadd.f32 1e-05, %v570_v22 }
 0x431   : > { %761 = vrsqrt.f32 %v571_v23 }
 0x43e   : > { %v762_v24 = vpop.eup %761 }
 0x43f   : > { %v573_v26 = vmul.f32 %v762_v24, %v551_v5  ;;  %v574_v27 = vmul.f32 %v762_v24, %v552_v6 }
 0x441   : > { %v576_v29 = vmul.f32 %v575_v25, %v573_v26  ;;  %v577_v30 = vmul.f32 %v575_v25, %v574_v27 }
 0x443   : > { %v579_v31 = vadd.f32 %v578_v28, %v576_v29  ;;  %v580_v32 = vadd.f32 %v578_v28, %v577_v30 }
 0x445   : > { %581 = vst.msk [vmem:[%s354_s10] sm:$0xff] %vm482_vm1, %v579_v31  ;;  %582 = vst.msk [vmem:[%s354_s10 + $0x8] sm:$0xff] %vm482_vm1, %v580_v32 }
 0x446 PF: > { %s21_s27 = sadd.s32 1, %s841_s27  }
 0x447   : > { %p18_p2 = scmp.ge.s32.totalorder %s21_s27, 4  }
 0x449   :  { %20 = sbr.rel (!%p18_p2) target bundleno = 3 (0x3), region = 99 }
 0x44e   :  { %604 = vsyncpa [#allocation3], 1 }
 0x44f   :  { %606 = vsyncpa [#allocation3 + $0x1], 1 }
 0x450   :  { %607 = vsyncpa [#allocation5], 1 }
 0x451   :  { %608 = vsyncpa [#allocation8], 1 }

// kernel: multitask_transformer_forward.7
= control target key start
LH: loop header
LB: loop body
LE: loop exit
PB: predicated region body
PF: predicated region fallthrough
CT: control target
= control target key end

     0   :  { %s2381_s29 = smov 0   ;;  %s2383_s30 = smov 0   ;;  %s2676_s0 = inlined_call_operand.vmem [shape: f32[2,8,32], index: 0, kind: input, shape index: {}]   ;;  %s2677_s1 = inlined_call_operand.vmem [shape: f32[2,32,96], index: 1, kind: input, shape index: {}]   ;;  %s2678_s2 = inlined_call_operand.vmem [shape: f32[2,1,96], index: 2, kind: input, shape index: {}]   ;;  %s2679_s3 = inlined_call_operand.vmem [shape: f32[2,32,32], index: 3, kind: input, shape index: {}]   ;;  %s2680_s4 = inlined_call_operand.vmem [shape: f32[2,1,32], index: 4, kind: input, shape index: {}]   ;;  %s2681_s5 = inlined_call_operand.vmem [shape: f32[2,1,32], index: 5, kind: input, shape index: {}]   ;;  %s2682_s6 = inlined_call_operand.vmem [shape: f32[2,1,32], index: 6, kind: input, shape index: {}]   ;;  %s2683_s7 = inlined_call_operand.vmem [shape: f32[2,32,64], index: 7, kind: input, shape index: {}]   ;;  %s2684_s8 = inlined_call_operand.vmem [shape: f32[2,1,64], index: 8, kind: input, shape index: {}]   ;;  %s2685_s9 = inlined_call_operand.vmem [shape: f32[2,64,32], index: 9, kind: input, shape index: {}]   ;;  %s2686_s10 = inlined_call_operand.vmem [shape: f32[2,1,32], index: 10, kind: input, shape index: {}]   ;;  %s2687_s11 = inlined_call_operand.vmem [shape: f32[2,1,32], index: 11, kind: input, shape index: {}]   ;;  %s2688_s12 = inlined_call_operand.vmem [shape: f32[2,1,32], index: 12, kind: input, shape index: {}]   ;;  %s2689_s13 = inlined_call_operand.vmem [shape: f32[2,8,32], index: 13, kind: output, shape index: {0}]   ;;  %s2690_s14 = inlined_call_operand.vmem [shape: f32[2,8,8], index: 14, kind: output, shape index: {1}]  }
   0x1   :  { %2696 = sst [smem:[#allocation10_spill]] %s2676_s0  ;;  %s2385_s15 = smov 0  }
   0x2   :  { %2697 = sst [smem:[#allocation11_spill]] %s2677_s1  ;;  %s2387_s16 = smov 0  }
   0x3   :  { %2698 = sst [smem:[#allocation12_spill]] %s2679_s3  ;;  %s2389_s17 = smov 0  }
   0x4   :  { %2699 = sst [smem:[#allocation13_spill]] %s2683_s7 }
   0x5   :  { %2700 = sst [smem:[#allocation14_spill]] %s2684_s8 }
   0x6   :  { %2701 = sst [smem:[#allocation15_spill]] %s2686_s10 }
   0x7   :  { %2702 = sst [smem:[#allocation16_spill]] %s2689_s13 }
   0x8   :  { %2703 = sst [smem:[#allocation17_spill]] %s2690_s14 }
   0x9 LB: > { %2704 = sst [smem:[#allocation3_spill]] %s2272_s29  ;;  %s34_s18 = sadd.s32 1, %s2280_s15  ;;  %s2288_s17 = sphi %s2389_s17, %s25_s17   ;;  %s2284_s16 = sphi %s2387_s16, %s2736_s16   ;;  %s2280_s15 = sphi %s2385_s15, %s2735_s15   ;;  %s2276_s30 = sphi %s2383_s30, %s2734_s30   ;;  %s2272_s29 = sphi %s2381_s29, %s2733_s29  }
   0xa   : > { %2705 = sst [smem:[#allocation4_spill]] %s2280_s15  ;;  %s37_s19 = sadd.s32 1, %s2284_s16 }
   0xb   : > { %2706 = sst [smem:[#allocation5_spill]] %s2284_s16  ;;  %p35_p0 = scmp.ge.s32.totalorder %s34_s18, 2 }
   0xc   : > { %2707 = sst [smem:[#allocation6_spill]] %s2288_s17  ;;  %p1998_p1 = scmp.ge.s32.totalorder %s2288_s17, 1 }
   0xd   : > { %p530_p2 = scmp.lt.s32.totalorder %s2288_s17, 5  ;;  %s2738_s18 = smov (%p35_p0, %s34_s18), 0 }
   0xe   : > { %2708 = sst [smem:[#allocation7_spill]] %s2738_s18  ;;  %s2740_s19 = smov (!%p35_p0, %s37_s19), %s2284_s16 }
   0xf   : > { %p531_p3 = pnand %p1998_p1, %p530_p2  ;;  %p39_p4 = scmp.ge.s32.totalorder %s2740_s19, 2 }
  0x11   : > { %s2742_s19 = smov (%p39_p4, %s2740_s19), 0  ;;  %534 = sbr.rel (%p531_p3) target bundleno = 2458 (0x99a), region = 72 }
  0x12   : > { %2709 = sst [smem:[#allocation8_spill]] %s2742_s19 }
  0x16   : > { %p622_p5 = scmp.lt.s32.totalorder %s2276_s30, 1  ;;  %p626_p6 = scmp.lt.s32.totalorder %s2272_s29, 1 }
  0x17   : > { %s2710_s0 = sld [smem:[#allocation10_spill]] }
  0x18   : > { %s2744_s30 = smov (!%p622_p5, %s2276_s30), 1  ;;  %s2711_s1 = sld [smem:[#allocation11_spill]] }
  0x19   : > { %s2415_s20 = scalar_select %p626_p6, %s2272_s29, 1 }
  0x1a   : > { %s2417_s21 = sshll.u32 %s2744_s30, 3  ;;  %s2713_s3 = sld [smem:[#allocation12_spill]] }
  0x1b   : > { %s2038_s25 = sshll.u32 %s2415_s20, 5  ;;  %s2714_s7 = sld [smem:[#allocation13_spill]] }
  0x1c   : > { %s2717_s16 = sld [smem:[#allocation16_spill]] }
  0x1d   : > { %s625_s24 = scalar_lea.vmem %s2710_s0, %s2417_s21  ;;  %s2718_s22 = sld [smem:[#allocation17_spill]] }
  0x1e   : > { %s2427_s28 = scalar_lea.vmem %s2711_s1, %s2038_s25  ;;  %s669_s1 = scalar_lea.vmem %s2688_s12, %s2415_s20 }
  0x1f   : > { %2712 = sst [smem:[#allocation9_spill]] %s2427_s28  ;;  %s666_s28 = scalar_lea.vmem %s2687_s11, %s2415_s20 }
  0x20   : > { %s2436_s17 = scalar_lea.vmem %s2713_s3, %s2038_s25  ;;  %s2041_s3 = sshll.u32 %s2415_s20, 6 }
  0x21   : > { %s2453_s19 = scalar_lea.vmem %s2714_s7, %s2038_s25  ;;  %s2467_s13 = scalar_lea.vmem %s2685_s9, %s2041_s3 }
  0x22   : > { %s673_s7 = scalar_lea.vmem %s2717_s16, %s2417_s21  ;;  %s2719_s10 = sld [smem:[#allocation3_spill]] }
  0x23   : > { %s677_s23 = scalar_lea.vmem %s2718_s22, %s2417_s21 }
  0x28   : > { %p2010_p7 = scmp.ne.s32.totalorder %s2719_s10, 0 }
  0x2a   : > { %681 = sbr.rel (%p2010_p7) target bundleno = 49 (0x31), region = 76 }
  0x2f   : > { %v682_v0 = vld [vmem:[%s625_s24] sm:$0xff]  ;;  %vm683_vm0 = vcmask 261120  }
  0x30   : > { %684 = vst.msk [vmem:[#allocation2] sm:$0xff] %vm683_vm0, %v682_v0 }
  0x31 PF: > { %s2720_s3 = sld [smem:[#allocation9_spill]]  ;;  %v2290_v2 = vmov 0.0   ;;  %vm2291_vm1 = vmmov 0   ;;  %vm697_vm2 = vcmask 261120   ;;  %s2721_s16 = scalar_lea.vmem %s2678_s2, %s2415_s20  ;;  %vm774_vm3 = vcmask 64512  }
  0x32   : > { %2082 = vmatprep.subr.mxu1 %v2290_v2  ;;  %2090 = vmatprep.mubr.msk.f32.mxu1 %vm2291_vm1, %v2290_v2  ;;  %v2011_v7 = vld [vmem:[%s2721_s16] ss:$0 sm:$0xff]  ;;  %s2292_s24 = smov 120   ;;  %s2293_s0 = smov 96   ;;  %vm1448_vm4 = vcmask 130048   ;;  %vm1450_vm5 = vcmask 195584  }
  0x33   : > { %2103 = vmatprep.subr.mxu0 %v2290_v2  ;;  %2105 = vmatprep.mubr.msk.f32.mxu0 %vm2291_vm1, %v2290_v2  ;;  %s2294_s14 = smov 80   ;;  %s2295_s26 = smov 88   ;;  %vm1667_vm6 = vcmask 523264  }
  0x34   : > { %s2296_s27 = smov 72   ;;  %s2297_s25 = smov 112  }
  0x35   : > { %s2298_s18 = smov 104   ;;  %s2299_s15 = smov 56  }
  0x36   : > { %s2300_s30 = smov 64   ;;  %s2301_s29 = smov 48  }
  0x37   : > { %v689_v1 = vld [vmem:[%s2720_s3 + $0x18] sm:$0xff]  ;;  %v688_v3 = vld [vmem:[%s2720_s3 + $0x10] sm:$0xff]  ;;  %v687_v4 = vld [vmem:[%s2720_s3 + $0x8] sm:$0xff]  ;;  %s2302_s22 = smov 40   ;;  %s2304_s8 = smov 16  }
  0x38   : > { %2083 = vmatpush3.msra.mxu1 %v689_v1  ;;  %v686_v5 = vld [vmem:[%s2720_s3] sm:$0xff]  ;;  %s2303_s3 = smov 8   ;;  %s2305_s10 = smov 24  }
  0x39   : > { %2084 = vmatprep.subr.mxu1 %v2290_v2  ;;  %v2498_v6 = vld [vmem:[#allocation2] sm:$0xff] }
  0x3a   : > { %2085 = vmatpush3.msra.mxu1 %v688_v3 }
  0x3b   : > { %2086 = vmatprep.subr.mxu1 %v2290_v2 }
  0x3c   : > { %2087 = vmatpush3.msra.mxu1 %v687_v4 }
  0x3d   : > { %2088 = vmatprep.subr.mxu1 %v2290_v2 }
  0x3e   : > { %2089 = vmatpush3.msra.mxu1 %v686_v5 }
  0x3f   : > { %2091 = vmatmul.mubr.msk.f32.vlgmr.msra.gmra.mxu1 %vm697_vm2, %v2498_v6  ;;  %2093 = vmatprep.subr.mxu1 %v2290_v2 }
  0x40   : > { %2095 = vmatprep.mubr.msk.f32.mxu1 %vm2291_vm1, %v2290_v2 }
  0xff   : > { %v767_v8 = vpop.f32.mrf.mxu1 }
 0x100   : > { %v2511_v9 = vadd.f32 %v2011_v7, %v767_v8  ;;  %v1455_v7 = vld [vmem:[%s2436_s17 + $0x18] sm:$0xff] }
 0x101   : > { %v2092_v10 = vpop.f32.mrf.mxu1 }
 0x102   : > { %937 = vrot.lane.b32.xlu1 %v2511_v9, %s2292_s24  ;;  %772 = vrot.lane.b32.xlu0 %v2511_v9, %s2293_s0  ;;  %s2722_s24 = scalar_lea.vmem %s2680_s4, %s2415_s20 }
 0x106   : > { %1105 = vrot.lane.b32.xlu1 %v2511_v9, %s2294_s14  ;;  %939 = vrot.lane.b32.xlu0 %v2511_v9, %s2295_s26  ;;  %s2723_s14 = scalar_lea.vmem %s2681_s5, %s2415_s20 }
 0x10a   : > { %1271 = vrot.lane.b32.xlu1 %v2511_v9, %s2296_s27  ;;  %1103 = vrot.lane.b32.xlu0 %v2511_v9, %s2297_s25  ;;  %s2724_s25 = scalar_lea.vmem %s2682_s6, %s2415_s20 }
 0x10e   : > { %1269 = vrot.lane.b32.xlu0 %v2511_v9, %s2298_s18 }
 0x174   : > { %v938_v11 = vpop.permute.xlu1 %937  ;;  %v773_v12 = vpop.permute.xlu0 %772 }
 0x175   : > { %2094 = vmatpush3.xpose.msk.msra.mxu1 %vm774_vm3, %v773_v12  ;;  %v1454_v12 = vld [vmem:[%s2436_s17 + $0x10] sm:$0xff] }
 0x176   : > { %2098 = vmatprep.subr.mxu1 %v2290_v2 }
 0x178   : > { %2096 = vmatmul.mubr.msk.f32.vlgmr.msra.gmra.mxu1 %vm774_vm3, %v2511_v9  ;;  %v940_v13 = vpop.permute.xlu0 %939  ;;  %v1106_v14 = vpop.permute.xlu1 %1105 }
 0x179   : > { %2104 = vmatpush3.xpose.msk.msra.mxu0 %vm774_vm3, %v940_v13  ;;  %2100 = vmatprep.mubr.msk.f32.mxu1 %vm2291_vm1, %v2290_v2  ;;  %v1453_v13 = vld [vmem:[%s2436_s17 + $0x8] sm:$0xff] }
 0x17a   : > { %2113 = vmatprep.subr.mxu0 %v2290_v2 }
 0x17c   : > { %2106 = vmatmul.mubr.msk.f32.vlgmr.msra.gmra.mxu0 %vm774_vm3, %v938_v11  ;;  %v1104_v15 = vpop.permute.xlu0 %1103  ;;  %v1272_v16 = vpop.permute.xlu1 %1271 }
 0x17d   : > { %2114 = vmatpush3.xpose.msk.msra.mxu0 %vm774_vm3, %v1106_v14  ;;  %2115 = vmatprep.mubr.msk.f32.mxu0 %vm2291_vm1, %v2290_v2  ;;  %v1452_v14 = vld [vmem:[%s2436_s17] sm:$0xff] }
 0x17e   : > { %2123 = vmatprep.subr.mxu0 %v2290_v2 }
 0x180   : > { %2116 = vmatmul.mubr.msk.f32.vlgmr.msra.gmra.mxu0 %vm774_vm3, %v1104_v15  ;;  %v1270_v17 = vpop.permute.xlu0 %1269 }
 0x181   : > { %2124 = vmatpush3.xpose.msk.msra.mxu0 %vm774_vm3, %v1272_v16  ;;  %2125 = vmatprep.mubr.msk.f32.mxu0 %vm2291_vm1, %v2290_v2 }
 0x182   : > { %2133 = vmatprep.subr.mxu0 %v2290_v2 }
 0x184   : > { %2126 = vmatmul.mubr.msk.f32.vlgmr.msra.gmra.mxu0 %vm774_vm3, %v1270_v17 }
 0x185   : > { %2141 = vmatprep.mubr.msk.f32.mxu0 %vm2291_vm1, %v2290_v2  ;;  %2134 = vmatpush3.msra.mxu0 %v1455_v7 }
 0x186   : > { %2135 = vmatprep.subr.mxu0 %v2290_v2 }
 0x187   : > { %2136 = vmatpush3.msra.mxu0 %v1454_v12 }
 0x188   : > { %2137 = vmatprep.subr.mxu0 %v2290_v2 }
 0x189   : > { %2138 = vmatpush3.msra.mxu0 %v1453_v13 }
 0x18a   : > { %2139 = vmatprep.subr.mxu0 %v2290_v2 }
 0x18b   : > { %2140 = vmatpush3.msra.mxu0 %v1452_v14  ;;  %v2033_v14 = vld [vmem:[%s666_s28] ss:$0 sm:$0xff] }
 0x18c   : > { %2155 = vmatprep.subr.mxu0 %v2290_v2 }
 0x238   : > { %v845_v18 = vpop.f32.mrf.mxu1 }
 0x239   : > { %v849_v19 = vsel %vm774_vm3, %v845_v18, -inf }
 0x23a   : > { %850 = vmax.xlane.f32.xlu1 %v849_v19  ;;  %v2097_v20 = vpop.f32.mrf.mxu1 }
 0x23c   : > { %v1011_v21 = vpop.f32.mrf.mxu0 }
 0x23d   : > { %v1015_v22 = vsel %vm774_vm3, %v1011_v21, -inf }
 0x23e   : > { %1016 = vmax.xlane.f32.xlu0 %v1015_v22  ;;  %v2107_v23 = vpop.f32.mrf.mxu0 }
 0x240   : > { %v1177_v24 = vpop.f32.mrf.mxu0 }
 0x241   : > { %v1181_v25 = vsel %vm774_vm3, %v1177_v24, -inf }
 0x242   : > { %1182 = vmax.xlane.f32.xlu0 %v1181_v25  ;;  %v2117_v26 = vpop.f32.mrf.mxu0  ;;  %v2025_v25 = vld [vmem:[%s2722_s24] ss:$0 sm:$0xff] }
 0x244   : > { %v1343_v27 = vpop.f32.mrf.mxu0 }
 0x245   : > { %v1347_v28 = vsel %vm774_vm3, %v1343_v27, -inf }
 0x246   : > { %v2127_v29 = vpop.f32.mrf.mxu0  ;;  %1348 = vmax.xlane.f32.xlu1 %v1347_v28 }
 0x257   : > { %1026 = vrot.lane.b32.xlu1 %v2511_v9, %s2299_s15 }
 0x2c3   : > { %v851_v30 = vpop.xlane.xlu1 %850 }
 0x2c4   : > { %v852_v31 = vsub.f32 %v845_v18, %v851_v30 }
 0x2c6   : > { %v853_v32 = vmul.f32 1.442695, %v852_v31 }
 0x2c7   : > { %v1017_v33 = vpop.xlane.xlu0 %1016 }
 0x2c8   : > { %2230 = vpow2.f32 %v853_v32  ;;  %v1018_v34 = vsub.f32 %v1011_v21, %v1017_v33 }
 0x2ca   : > { %v1019_v35 = vmul.f32 1.442695, %v1018_v34 }
 0x2cb   : > { %v1183_v45 = vpop.xlane.xlu0 %1182 }
 0x2cc   : > { %2232 = vpow2.f32 %v1019_v35  ;;  %v1184_v46 = vsub.f32 %v1177_v24, %v1183_v45 }
 0x2ce   : > { %v1185_v47 = vmul.f32 1.442695, %v1184_v46 }
 0x2cf   : > { %v1349_v36 = vpop.xlane.xlu1 %1348 }
 0x2d0   : > { %v1350_v37 = vsub.f32 %v1343_v27, %v1349_v36  ;;  %v1570_v36 = vld [vmem:[%s2453_s19 + $0x18] sm:$0xff] }
 0x2d2   : > { %v1351_v38 = vmul.f32 1.442695, %v1350_v37  ;;  %v1569_v37 = vld [vmem:[%s2453_s19 + $0x10] sm:$0xff] }
 0x2d3   : > { %v1027_v50 = vpop.permute.xlu1 %1026 }
 0x2d4   : > { %2234 = vpow2.f32 %v1351_v38  ;;  %v1567_v38 = vld [vmem:[%s2453_s19] sm:$0xff] }
 0x2d5   : > { %v2231_v39 = vpop.eup %2230  ;;  %2236 = vpow2.f32 %v1185_v47 }
 0x2d6   : > { %v855_v40 = vsel %vm774_vm3, %v2231_v39, 0.0 }
 0x2d7   : > { %856 = vadd.xlane.f32.xlu0 %v855_v40  ;;  %v1658_v40 = vld [vmem:[%s2467_s13 + $0x30] sm:$0xff] }
 0x2d9   : > { %v2233_v41 = vpop.eup %2232 }
 0x2da   : > { %v1021_v42 = vsel %vm774_vm3, %v2233_v41, 0.0 }
 0x2db   : > { %1022 = vadd.xlane.f32.xlu1 %v1021_v42  ;;  %v1656_v42 = vld [vmem:[%s2467_s13 + $0x20] sm:$0xff] }
 0x2e1   : > { %v2235_v43 = vpop.eup %2234 }
 0x2e2   : > { %v1353_v44 = vsel %vm774_vm3, %v2235_v43, 0.0  ;;  %v2237_v48 = vpop.eup %2236 }
 0x2e3   : > { %1354 = vadd.xlane.f32.xlu1 %v1353_v44  ;;  %v1187_v49 = vsel %vm774_vm3, %v2237_v48, 0.0 }
 0x2ed   : > { %860 = vrot.lane.b32.xlu0 %v2511_v9, %s2300_s30  ;;  %s2725_s30 = sld [smem:[#allocation14_spill]] }
 0x2f4   : > { %1192 = vrot.lane.b32.xlu1 %v2511_v9, %s2301_s29  ;;  %s2726_s29 = scalar_lea.vmem %s2725_s30, %s2415_s20 }
 0x30c   : > { %1188 = vadd.xlane.f32.xlu0 %v1187_v49 }
 0x322   : > { %1358 = vrot.lane.b32.xlu0 %v2511_v9, %s2302_s22 }
 0x360   : > { %v857_v51 = vpop.xlane.xlu0 %856 }
 0x361   : > { %2238 = vrcp.f32 %v857_v51 }
 0x364   : > { %v861_v52 = vpop.permute.xlu0 %860  ;;  %v1023_v53 = vpop.xlane.xlu1 %1022 }
 0x365   : > { %2240 = vrcp.f32 %v1023_v53  ;;  %2099 = vmatpush3.msra.mxu1 %v861_v52  ;;  %v1654_v53 = vld [vmem:[%s2467_s13 + $0x10] sm:$0xff] }
 0x366   : > { %2108 = vmatprep.subr.mxu1 %v2290_v2 }
 0x36c   : > { %v1355_v55 = vpop.xlane.xlu1 %1354 }
 0x36d   : > { %2242 = vrcp.f32 %v1355_v55  ;;  %v1652_v55 = vld [vmem:[%s2467_s13] sm:$0xff] }
 0x36e   : > { %v2239_v54 = vpop.eup %2238 }
 0x36f   : > { %v859_v56 = vmul.f32 %v2239_v54, %v2231_v39  ;;  %v1659_v39 = vld [vmem:[%s2467_s13 + $0x38] sm:$0xff]  ;;  %v1653_v54 = vld [vmem:[%s2467_s13 + $0x8] sm:$0xff] }
 0x370   : > { %v1193_v59 = vpop.permute.xlu1 %1192 }
 0x371   : > { %2101 = vmatmul.mubr.msk.f32.vlgmr.msra.gmra.mxu1 %vm774_vm3, %v859_v56 }
 0x372   : > { %v2241_v57 = vpop.eup %2240  ;;  %2109 = vmatpush3.msra.mxu1 %v1027_v50  ;;  %2110 = vmatprep.mubr.msk.f32.mxu1 %vm2291_vm1, %v2290_v2  ;;  %v2028_v50 = vld [vmem:[%s2724_s25] ss:$0 sm:$0xff] }
 0x373   : > { %2118 = vmatprep.subr.mxu1 %v2290_v2  ;;  %v1025_v58 = vmul.f32 %v2241_v57, %v2233_v41  ;;  %v1657_v41 = vld [vmem:[%s2467_s13 + $0x28] sm:$0xff] }
 0x375   : > { %2111 = vmatmul.mubr.msk.f32.vlgmr.msra.gmra.mxu1 %vm774_vm3, %v1025_v58  ;;  %v1102_v60 = vadd.f32 %v1025_v58, %v859_v56  ;;  %v2029_v56 = vld [vmem:[%s2726_s29] ss:$0 sm:$0xff] }
 0x376   : > { %2119 = vmatpush3.msra.mxu1 %v1193_v59  ;;  %2120 = vmatprep.mubr.msk.f32.mxu1 %vm2291_vm1, %v2290_v2 }
 0x377   : > { %2128 = vmatprep.subr.mxu1 %v2290_v2 }
 0x37a   : > { %v2243_v62 = vpop.eup %2242 }
 0x37b   : > { %v1357_v4 = vmul.f32 %v2243_v62, %v2235_v43  ;;  %v1655_v43 = vld [vmem:[%s2467_s13 + $0x18] sm:$0xff] }
 0x395   : > { %v1189_v61 = vpop.xlane.xlu0 %1188 }
 0x396   : > { %2244 = vrcp.f32 %v1189_v61 }
 0x399   : > { %v1359_v1 = vpop.permute.xlu0 %1358 }
 0x3a3   : > { %v2245_v63 = vpop.eup %2244 }
 0x3a4   : > { %v1191_v0 = vmul.f32 %v2245_v63, %v2237_v48  ;;  %v2027_v48 = vld [vmem:[%s2723_s14] ss:$0 sm:$0xff] }
 0x3a6   : > { %2121 = vmatmul.mubr.msk.f32.vlgmr.msra.gmra.mxu1 %vm774_vm3, %v1191_v0  ;;  %v1268_v3 = vadd.f32 %v1191_v0, %v1102_v60 }
 0x3a7   : > { %2129 = vmatpush3.msra.mxu1 %v1359_v1  ;;  %2130 = vmatprep.mubr.msk.f32.mxu1 %vm2291_vm1, %v2290_v2 }
 0x3a8   : > { %v2565_v5 = vadd.f32 %v1357_v4, %v1268_v3  ;;  %2144 = vmatprep.subr.mxu1 %v2290_v2 }
 0x3aa   : > { %2131 = vmatmul.mubr.msk.f32.vlgmr.msra.gmra.mxu1 %vm774_vm3, %v1357_v4 }
 0x3ab   : > { %2152 = vmatprep.mubr.msk.f32.mxu1 %vm2291_vm1, %v2290_v2  ;;  %2145 = vmatpush3.msra.mxu1 %v1570_v36 }
 0x3ac   : > { %2146 = vmatprep.subr.mxu1 %v2290_v2 }
 0x3ad   : > { %2147 = vmatpush3.msra.mxu1 %v1569_v37 }
 0x3ae   : > { %2148 = vmatprep.subr.mxu1 %v2290_v2 }
 0x431   : > { %v932_v8 = vpop.f32.mrf.mxu1 }
 0x433   : > { %v2102_v9 = vpop.f32.mrf.mxu1 }
 0x435   : > { %v1098_v10 = vpop.f32.mrf.mxu1 }
 0x436   : > { %1436 = vrot.lane.b32.xlu1 %v1098_v10, %s2303_s3 }
 0x437   : > { %v2112_v11 = vpop.f32.mrf.mxu1 }
 0x466   : > { %v1264_v15 = vpop.f32.mrf.mxu1 }
 0x467   : > { %1440 = vrot.lane.b32.xlu0 %v1264_v15, %s2304_s8  ;;  %s2727_s8 = sld [smem:[#allocation15_spill]] }
 0x468   : > { %v2122_v16 = vpop.f32.mrf.mxu1 }
 0x469   : > { %v2034_v16 = vld [vmem:[%s669_s1] ss:$0 sm:$0xff] }
 0x46a   : > { %v1430_v17 = vpop.f32.mrf.mxu1 }
 0x46b   : > { %1444 = vrot.lane.b32.xlu1 %v1430_v17, %s2305_s10 }
 0x46c   : > { %v2132_v18 = vpop.f32.mrf.mxu1 }
 0x46d   : > { %s2728_s10 = scalar_lea.vmem %s2727_s8, %s2415_s20 }
 0x46e   : > { %v2031_v61 = vld [vmem:[%s2728_s10] ss:$0 sm:$0xff] }
 0x4a8   : > { %v1437_v19 = vpop.permute.xlu1 %1436 }
 0x4a9   : > { %v1447_v21 = vsel %vm774_vm3, %v932_v8, %v1437_v19 }
 0x4d9   : > { %v1441_v20 = vpop.permute.xlu0 %1440 }
 0x4da   : > { %v1449_v22 = vsel %vm1448_vm4, %v1447_v21, %v1441_v20 }
 0x4dd   : > { %v1445_v23 = vpop.permute.xlu1 %1444 }
 0x4de   : > { %v1451_v24 = vsel %vm1450_vm5, %v1449_v22, %v1445_v23 }
 0x4df   : > { %2142 = vmatmul.mubr.msk.f32.vlgmr.msra.gmra.mxu0 %vm697_vm2, %v1451_v24 }
 0x4e0   : > { %2171 = vmatprep.mubr.msk.f32.mxu0 %vm2291_vm1, %v2290_v2  ;;  %2156 = vmatpush3.msra.mxu0 %v1659_v39 }
 0x4e1   : > { %2157 = vmatprep.subr.mxu0 %v2290_v2 }
 0x4e2   : > { %2158 = vmatpush3.msra.mxu0 %v1658_v40 }
 0x4e3   : > { %2159 = vmatprep.subr.mxu0 %v2290_v2 }
 0x4e4   : > { %2160 = vmatpush3.msra.mxu0 %v1657_v41 }
 0x4e5   : > { %2161 = vmatprep.subr.mxu0 %v2290_v2 }
 0x4e6   : > { %2162 = vmatpush3.msra.mxu0 %v1656_v42 }
 0x4e7   : > { %2163 = vmatprep.subr.mxu0 %v2290_v2 }
 0x4e8   : > { %2164 = vmatpush3.msra.mxu0 %v1655_v43 }
 0x4e9   : > { %2165 = vmatprep.subr.mxu0 %v2290_v2 }
 0x4ea   : > { %2166 = vmatpush3.msra.mxu0 %v1654_v53 }
 0x4eb   : > { %2167 = vmatprep.subr.mxu0 %v2290_v2 }
 0x4ec   : > { %2168 = vmatpush3.msra.mxu0 %v1653_v54 }
 0x4ed   : > { %2169 = vmatprep.subr.mxu0 %v2290_v2 }
 0x4ee   : > { %2170 = vmatpush3.msra.mxu0 %v1652_v55 }
 0x59f   : > { %v1532_v26 = vpop.f32.mrf.mxu0 }
 0x5a0   : > { %v1533_v27 = vadd.f32 %v2025_v25, %v1532_v26 }
 0x5a1   : > { %v2143_v28 = vpop.f32.mrf.mxu0 }
 0x5a2   : > { %v1536_v29 = vadd.f32 %v1533_v27, %v2498_v6  ;;  %v1568_v6 = vld [vmem:[%s2453_s19 + $0x8] sm:$0xff]  ;;  %s2729_s19 = sld [smem:[#allocation3_spill]] }
 0x5a3   : > { %2149 = vmatpush3.msra.mxu1 %v1568_v6 }
 0x5a4   : > { %v1539_v30 = vsel %vm697_vm2, %v1536_v29, 0.0  ;;  %2150 = vmatprep.subr.mxu1 %v2290_v2 }
 0x5a5   : > { %1540 = vadd.xlane.f32.xlu0 %v1539_v30  ;;  %2151 = vmatpush3.msra.mxu1 %v1567_v38 }
 0x5a8   : > { %p2035_p8 = scmp.ne.s32.totalorder %s2729_s19, 1 }
 0x62e   : > { %v1541_v31 = vpop.xlane.xlu0 %1540 }
 0x62f   : > { %v1543_v32 = vmul.f32 0.03125, %v1541_v31 }
 0x631   : > { %v1544_v33 = vsub.f32 %v1536_v29, %v1543_v32 }
 0x633   : > { %v1545_v34 = vmul.f32 %v1544_v33, %v1544_v33 }
 0x635   : > { %v1546_v35 = vsel %vm697_vm2, %v1545_v34, 0.0 }
 0x636   : > { %1547 = vadd.xlane.f32.xlu1 %v1546_v35 }
 0x6bf   : > { %v1548_v44 = vpop.xlane.xlu1 %1547 }
 0x6c0   : > { %v1549_v45 = vmul.f32 0.03125, %v1548_v44 }
 0x6c2   : > { %v1550_v46 = vadd.f32 1e-05, %v1549_v45 }
 0x6c4   : > { %2246 = vrsqrt.f32 %v1550_v46 }
 0x6d1   : > { %v2247_v47 = vpop.eup %2246 }
 0x6d2   : > { %v1552_v49 = vmul.f32 %v2247_v47, %v1544_v33 }
 0x6d4   : > { %v1559_v51 = vmul.f32 %v2027_v48, %v1552_v49 }
 0x6d6   : > { %v1566_v52 = vadd.f32 %v2028_v50, %v1559_v51 }
 0x6d8   : > { %2153 = vmatmul.mubr.msk.f32.vlgmr.msra.gmra.mxu1 %vm697_vm2, %v1566_v52 }
 0x798   : > { %v1647_v57 = vpop.f32.mrf.mxu1 }
 0x799   : > { %v1648_v58 = vadd.f32 %v2029_v56, %v1647_v57 }
 0x79a   : > { %v2154_v59 = vpop.f32.mrf.mxu1 }
 0x79b   : > { %v1651_v60 = vmax.f32 %v1648_v58, 0.0 }
 0x79d   : > { %2172 = vmatmul.mubr.msk.f32.vlgmr.msra.gmra.mxu0 %vm1667_vm6, %v1651_v60 }
 0x85d   : > { %v1737_v62 = vpop.f32.mrf.mxu0 }
 0x85e   : > { %v1738_v63 = vadd.f32 %v2031_v61, %v1737_v62 }
 0x85f   : > { %v2173_v2 = vpop.f32.mrf.mxu0 }
 0x860   : > { %v1741_v0 = vadd.f32 %v1738_v63, %v1566_v52 }
 0x862   : > { %v1744_v1 = vsel %vm697_vm2, %v1741_v0, 0.0 }
 0x863   : > { %1745 = vadd.xlane.f32.xlu0 %v1744_v1 }
 0x8ec   : > { %v1746_v3 = vpop.xlane.xlu0 %1745 }
 0x8ed   : > { %v1747_v4 = vmul.f32 0.03125, %v1746_v3 }
 0x8ef   : > { %v1748_v7 = vsub.f32 %v1741_v0, %v1747_v4 }
 0x8f1   : > { %v1749_v8 = vmul.f32 %v1748_v7, %v1748_v7 }
 0x8f3   : > { %v1750_v9 = vsel %vm697_vm2, %v1749_v8, 0.0 }
 0x8f4   : > { %1751 = vadd.xlane.f32.xlu0 %v1750_v9 }
 0x97d   : > { %v1752_v10 = vpop.xlane.xlu0 %1751 }
 0x97e   : > { %v1753_v11 = vmul.f32 0.03125, %v1752_v10 }
 0x980   : > { %v1754_v12 = vadd.f32 1e-05, %v1753_v11 }
 0x982   : > { %2248 = vrsqrt.f32 %v1754_v12 }
 0x98f   : > { %v2249_v13 = vpop.eup %2248 }
 0x990   : > { %v1756_v15 = vmul.f32 %v2249_v13, %v1748_v7 }
 0x992   : > { %v1763_v17 = vmul.f32 %v2033_v14, %v1756_v15  ;;  %1775 = sbr.rel (%p2035_p8) target bundleno = 2458 (0x99a), region = 80 }
 0x994   : > { %v1770_v18 = vadd.f32 %v2034_v16, %v1763_v17 }
 0x996   : > { %1771 = vst.msk [vmem:[#allocation2] sm:$0xff] %vm697_vm2, %v1770_v18 }
 0x997   : > { %1776 = vst.msk [vmem:[%s673_s7] sm:$0xff] %vm697_vm2, %v1770_v18  ;;  %v1777_v19 = vmul.f32 0.25, %v2565_v5 }
 0x999   : > { %1778 = vst.msk [vmem:[%s677_s23] sm:$0xff] %vm774_vm3, %v1777_v19 }
 0x99a PF: > { %s2732_s27 = sld [smem:[#allocation6_spill]] }
 0x99b   : > { %s2733_s29 = sld [smem:[#allocation4_spill]] }
 0x99c   : > { %s2734_s30 = sld [smem:[#allocation5_spill]] }
 0x99d   : > { %s2735_s15 = sld [smem:[#allocation7_spill]] }
 0x99e   : > { %s2736_s16 = sld [smem:[#allocation8_spill]] }
 0x9a0   : > { %s25_s17 = sadd.s32 1, %s2732_s27  }
 0x9a1   : > { %p22_p9 = scmp.ge.s32.totalorder %s25_s17, 6  }
 0x9a3   :  { %24 = sbr.rel (!%p22_p9) target bundleno = 9 (0x9), region = 158 }

// kernel: multitask_transformer_forward.8
= control target key start
LH: loop header
LB: loop body
LE: loop exit
PB: predicated region body
PF: predicated region fallthrough
CT: control target
= control target key end

     0   :  { %s3207_s0 = inlined_call_operand.vmem [shape: f32[2,16,32], index: 0, kind: input, shape index: {}]   ;;  %s3208_s1 = inlined_call_operand.vmem [shape: f32[2,32,96], index: 1, kind: input, shape index: {}]   ;;  %s3209_s2 = inlined_call_operand.vmem [shape: f32[2,1,96], index: 2, kind: input, shape index: {}]   ;;  %s3210_s3 = inlined_call_operand.vmem [shape: f32[2,32,32], index: 3, kind: input, shape index: {}]   ;;  %s3211_s4 = inlined_call_operand.vmem [shape: f32[2,1,32], index: 4, kind: input, shape index: {}]   ;;  %s3212_s5 = inlined_call_operand.vmem [shape: f32[2,1,32], index: 5, kind: input, shape index: {}]   ;;  %s3213_s6 = inlined_call_operand.vmem [shape: f32[2,1,32], index: 6, kind: input, shape index: {}]   ;;  %s3214_s7 = inlined_call_operand.vmem [shape: f32[2,32,64], index: 7, kind: input, shape index: {}]   ;;  %s3215_s8 = inlined_call_operand.vmem [shape: f32[2,1,64], index: 8, kind: input, shape index: {}]   ;;  %s3216_s9 = inlined_call_operand.vmem [shape: f32[2,64,32], index: 9, kind: input, shape index: {}]   ;;  %s3217_s10 = inlined_call_operand.vmem [shape: f32[2,1,32], index: 10, kind: input, shape index: {}]   ;;  %s3218_s11 = inlined_call_operand.vmem [shape: f32[2,1,32], index: 11, kind: input, shape index: {}]   ;;  %s3219_s12 = inlined_call_operand.vmem [shape: f32[2,1,32], index: 12, kind: input, shape index: {}]   ;;  %s3220_s13 = inlined_call_operand.hbm [shape: f32[2,16,32], index: 13, kind: output, shape index: {0}]   ;;  %s3221_s14 = inlined_call_operand.vmem [shape: f32[2,16,16], index: 14, kind: output, shape index: {1}]  }
   0x1   :  { %3238 = sst [smem:[#allocation20_spill]] %s3207_s0 }
   0x2   :  { %3239 = sst [smem:[#allocation21_spill]] %s3208_s1 }
   0x3   :  { %3240 = sst [smem:[#allocation22_spill]] %s3210_s3 }
   0x4   :  { %3241 = sst [smem:[#allocation23_spill]] %s3214_s7 }
   0x5   :  { %3242 = sst [smem:[#allocation24_spill]] %s3215_s8 }
   0x6   :  { %3243 = sst [smem:[#allocation25_spill]] %s3219_s12 }
   0x7   :  { %3244 = sst [smem:[#allocation26_spill]] %s3220_s13 }
   0x8   :  { %3245 = sst [smem:[#allocation27_spill]] %s3221_s14 }
   0x9   :  { %20 = vsyncpa [#allocation4], 0 }
   0xa   :  { %22 = vsyncpa [#allocation4 + $0x1], 0  ;;  %s2805_s29 = smov 0   ;;  %s2807_s30 = smov 0  }
   0xb   :  { %s2809_s15 = smov 0   ;;  %s2811_s16 = smov 0  }
   0xc   :  { %s2813_s17 = smov 0   ;;  %s2815_s18 = smov 0  }
   0xd   :  { %s2817_s19 = smov 0   ;;  %s2819_s20 = smov 0  }
   0xe LB: > { %3246 = sst [smem:[#allocation6_spill]] %s2684_s29  ;;  %s2254_s21 = sadd.s32 4294967295, %s2712_s20   ;;  %s2712_s20 = sphi %s2819_s20, %s28_s20   ;;  %s2708_s19 = sphi %s2817_s19, %s3293_s19   ;;  %s2704_s18 = sphi %s2815_s18, %s3292_s18   ;;  %s2700_s17 = sphi %s2813_s17, %s3291_s17   ;;  %s2696_s16 = sphi %s2811_s16, %s3290_s16   ;;  %s2692_s15 = sphi %s2809_s15, %s3289_s15   ;;  %s2688_s30 = sphi %s2807_s30, %s3288_s30   ;;  %s2684_s29 = sphi %s2805_s29, %s3287_s29  }
   0xf   : > { %3247 = sst [smem:[#allocation7_spill]] %s2688_s30  ;;  %s2255_s22 = sadd.s32 4294967294, %s2712_s20  }
  0x10   : > { %3248 = sst [smem:[#allocation8_spill]] %s2692_s15  ;;  %s37_s23 = sadd.s32 1, %s2704_s18 }
  0x11   : > { %3249 = sst [smem:[#allocation9_spill]] %s2696_s16  ;;  %p38_p0 = scmp.ge.s32.totalorder %s37_s23, 2 }
  0x12   : > { %3250 = sst [smem:[#allocation10_spill]] %s2700_s17  ;;  %s40_s24 = sadd.s32 1, %s2708_s19 }
  0x13   : > { %3251 = sst [smem:[#allocation11_spill]] %s2704_s18  ;;  %p395_p1 = scmp.ne.s32.totalorder %s2692_s15, %s2688_s30 }
  0x14   : > { %3252 = sst [smem:[#allocation12_spill]] %s2708_s19  ;;  %p396_p2 = scmp.eq.s32.totalorder %s2254_s21, 3 }
  0x15   : > { %3253 = sst [smem:[#allocation13_spill]] %s2712_s20  ;;  %s3295_s23 = smov (%p38_p0, %s37_s23), 0 }
  0x16   : > { %3254 = sst [smem:[#allocation14_spill]] %s3295_s23  ;;  %s3297_s24 = smov (!%p38_p0, %s40_s24), %s2708_s19 }
  0x17   : > { %p2854_p3 = por %p396_p2, %p395_p1  ;;  %p401_p4 = scmp.ne.s32.totalorder %s2688_s30, %s2684_s29 }
  0x18   : > { %p42_p5 = scmp.ge.s32.totalorder %s3297_s24, 2  ;;  %p402_p6 = scmp.eq.s32.totalorder %s2255_s22, 3 }
  0x19   : > { %s3255_s25 = scalar_select %p2854_p3, 1, 0 }
  0x1a   : > { %p2258_p7 = scmp.ge.s32.totalorder %s2712_s20, 1  ;;  %p534_p8 = scmp.lt.s32.totalorder %s2712_s20, 5 }
  0x1b   : > { %3256 = sst [smem:[#allocation15_spill]] %s3255_s25  ;;  %s3299_s24 = smov (%p42_p5, %s3297_s24), 0 }
  0x1c   : > { %3257 = sst [smem:[#allocation16_spill]] %s3299_s24  ;;  %p2864_p9 = por %p402_p6, %p401_p4 }
  0x1d   : > { %p535_p10 = pnand %p2258_p7, %p534_p8  ;;  %s382_s27 = ssub.s32 %s2708_s19, %s3299_s24 }
  0x1e   : > { %s3258_s26 = scalar_select %p2864_p9, 1, 0 }
  0x1f   : > { %s385_s28 = sadd.s32 1, %s2692_s15  ;;  %p383_p11 = scmp.eq.s32.totalorder %s382_s27, 0 }
  0x20   : > { %3259 = sst [smem:[#allocation17_spill]] %s3258_s26  ;;  %538 = sbr.rel (%p535_p10) target bundleno = 3551 (0xddf), region = 72 }
  0x21   : > { %s2872_s21 = scalar_select %p383_p11, %s2692_s15, %s385_s28  }
  0x23   : > { %3260 = sst [smem:[#allocation18_spill]] %s2872_s21 }
  0x25   : > { %s3226_s22 = sand.u32 1, %s2688_s30   ;;  %p629_p12 = scmp.lt.s32.totalorder %s2700_s17, 1 }
  0x26   : > { %s2259_s23 = sshll.u32 %s3226_s22, 4  ;;  %p634_p13 = scmp.lt.s32.totalorder %s2696_s16, 1 }
  0x27   : > { %s630_s18 = scalar_select %p629_p12, %s2700_s17, 1 }
  0x28   : > { %s2881_s26 = scalar_select %p634_p13, %s2696_s16, 1 }
  0x29   : > { %s2319_s27 = sshll.u32 %s630_s18, 4  ;;  %s3261_s0 = sld [smem:[#allocation20_spill]] }
  0x2a   : > { %s2320_s22 = sshll.u32 %s2881_s26, 5  ;;  %s3262_s1 = sld [smem:[#allocation21_spill]] }
  0x2b   : > { %s3264_s3 = sld [smem:[#allocation22_spill]]  ;;  %s671_s24 = scalar_lea.vmem %s3217_s10, %s2881_s26 }
  0x2c   : > { %s3265_s7 = sld [smem:[#allocation23_spill]]  ;;  %s2945_s14 = scalar_lea.vmem [#allocation3], %s2259_s23 }
  0x2d   : > { %s3268_s25 = sld [smem:[#allocation27_spill]] }
  0x2e   : > { %s3269_s18 = sld [smem:[#allocation9_spill]] }
  0x2f   : > { %s633_s19 = scalar_lea.vmem %s3261_s0, %s2319_s27 }
  0x30   : > { %s2890_s29 = scalar_lea.vmem %s3262_s1, %s2320_s22  ;;  %s3267_s1 = sld [smem:[#allocation25_spill]] }
  0x31   : > { %3263 = sst [smem:[#allocation19_spill]] %s2890_s29  ;;  %s2899_s16 = scalar_lea.vmem %s3264_s3, %s2320_s22 }
  0x32   : > { %s2916_s20 = scalar_lea.vmem %s3265_s7, %s2320_s22  ;;  %s2323_s3 = sshll.u32 %s2881_s26, 6 }
  0x33   : > { %s2930_s12 = scalar_lea.vmem %s3216_s9, %s2323_s3  ;;  %s674_s29 = scalar_lea.vmem %s3218_s11, %s2881_s26 }
  0x34   : > { %s2943_s8 = scalar_lea.vmem %s3268_s25, %s2319_s27  ;;  %p2272_p0 = scmp.ne.s32.totalorder %s3269_s18, 0 }
  0x36   : > { %s677_s7 = scalar_lea.vmem %s3267_s1, %s2881_s26  ;;  %686 = sbr.rel (%p2272_p0) target bundleno = 61 (0x3d), region = 76 }
  0x3b   : > { %v687_v0 = vld [vmem:[%s633_s19] sm:$0xff]  ;;  %vm689_vm0 = vcmask 261120   ;;  %v688_v1 = vld [vmem:[%s633_s19 + $0x8] sm:$0xff] }
  0x3c   : > { %690 = vst.msk [vmem:[#allocation2] sm:$0xff] %vm689_vm0, %v687_v0  ;;  %691 = vst.msk [vmem:[#allocation2 + $0x8] sm:$0xff] %vm689_vm0, %v688_v1 }
  0x3d PF: > { %s3270_s3 = sld [smem:[#allocation19_spill]]  ;;  %vm705_vm1 = vcmask 261120   ;;  %s3271_s23 = scalar_lea.vmem %s3209_s2, %s2881_s26  ;;  %vm793_vm2 = vcmask 64512   ;;  %vm877_vm3 = vcmask 130048   ;;  %vm1623_vm4 = vcmask 195584  }
  0x3e   : > { %v2273_v8 = vld [vmem:[%s3271_s23] ss:$0 sm:$0xff]  ;;  %s2714_s25 = smov 88   ;;  %s2715_s27 = smov 96   ;;  %vm1874_vm5 = vcmask 523264  }
  0x3f   : > { %s2716_s0 = smov 120   ;;  %s2717_s28 = smov 64  }
  0x40   : > { %s2718_s15 = smov 56   ;;  %s2719_s21 = smov 80  }
  0x41   : > { %s2720_s22 = smov 112   ;;  %s2721_s13 = smov 48  }
  0x42   : > { %s2722_s30 = smov 72   ;;  %s2723_s17 = smov 104  }
  0x43   : > { %v697_v2 = vld [vmem:[%s3270_s3 + $0x18] sm:$0xff]  ;;  %v696_v3 = vld [vmem:[%s3270_s3 + $0x10] sm:$0xff]  ;;  %v2950_v4 = vld [vmem:[#allocation2] sm:$0xff]  ;;  %s2724_s18 = smov 40   ;;  %s2726_s1 = smov 16  }
  0x44   : > { %2386 = vmatprep.subr.mxu1 %v697_v2  ;;  %v695_v5 = vld [vmem:[%s3270_s3 + $0x8] sm:$0xff]  ;;  %2394 = vmatprep.mubr.msk.f32.mxu1 %vm705_vm1, %v2950_v4  ;;  %v694_v6 = vld [vmem:[%s3270_s3] sm:$0xff]  ;;  %s2725_s3 = smov 8   ;;  %s2727_s19 = smov 24  }
  0x45   : > { %2387 = vmatpush3.msra.mxu1 %v697_v2  ;;  %v2956_v7 = vld [vmem:[#allocation2 + $0x8] sm:$0xff] }
  0x46   : > { %2388 = vmatprep.subr.mxu1 %v696_v3 }
  0x47   : > { %2389 = vmatpush3.msra.mxu1 %v696_v3 }
  0x48   : > { %2390 = vmatprep.subr.mxu1 %v695_v5 }
  0x49   : > { %2391 = vmatpush3.msra.mxu1 %v695_v5 }
  0x4a   : > { %2392 = vmatprep.subr.mxu1 %v694_v6 }
  0x4b   : > { %2393 = vmatpush3.msra.mxu1 %v694_v6 }
  0x4c   : > { %2395 = vmatmul.mubr.msk.f32.vlgmr.msra.gmra.mxu1 %vm705_vm1, %v2956_v7 }
 0x10c   : > { %v2396_v9 = vpop.f32.mrf.mxu1 }
 0x10d   : > { %v2965_v10 = vadd.f32 %v2396_v9, %v2273_v8 }
 0x10e   : > { %v778_v11 = vpop.f32.mrf.mxu1 }
 0x10f   : > { %v2967_v12 = vadd.f32 %v2273_v8, %v778_v11  ;;  %995 = vrot.lane.b32.xlu1 %v2965_v10, %s2714_s25  ;;  %791 = vrot.lane.b32.xlu0 %v2965_v10, %s2715_s27 }
 0x111   : > { %2401 = vmatprep.mubr.msk.f32.mxu1 %vm793_vm2, %v2967_v12 }
 0x113   : > { %993 = vrot.lane.b32.xlu1 %v2967_v12, %s2714_s25  ;;  %789 = vrot.lane.b32.xlu0 %v2967_v12, %s2715_s27  ;;  %s3272_s25 = scalar_lea.vmem %s3211_s4, %s2881_s26 }
 0x117   : > { %991 = vrot.lane.b32.xlu1 %v2965_v10, %s2716_s0  ;;  %989 = vrot.lane.b32.xlu0 %v2967_v12, %s2716_s0  ;;  %s3273_s0 = scalar_lea.vmem %s3212_s5, %s2881_s26 }
 0x181   : > { %v792_v13 = vpop.permute.xlu0 %791  ;;  %v996_v14 = vpop.permute.xlu1 %995 }
 0x182   : > { %2397 = vmatprep.subr.msk.mxu1 %vm793_vm2, %v792_v13 }
 0x183   : > { %2398 = vmatpush3.xpose.msk.msra.mxu1 %vm793_vm2, %v792_v13 }
 0x185   : > { %v790_v15 = vpop.permute.xlu0 %789  ;;  %v994_v17 = vpop.permute.xlu1 %993 }
 0x186   : > { %2399 = vmatprep.subr.msk.mxu1 %vm793_vm2, %v790_v15 }
 0x187   : > { %2400 = vmatpush3.xpose.msk.msra.mxu1 %vm793_vm2, %v790_v15 }
 0x188   : > { %2411 = vmatprep.subr.msk.mxu1 %vm793_vm2, %v996_v14 }
 0x189   : > { %v990_v16 = vpop.permute.xlu0 %989  ;;  %v992_v18 = vpop.permute.xlu1 %991 }
 0x18a   : > { %2402 = vmatmul.mubr.msk.f32.vlgmr.msra.gmra.mxu1 %vm793_vm2, %v2965_v10 }
 0x18b   : > { %2412 = vmatpush3.xpose.msk.msra.mxu1 %vm793_vm2, %v996_v14  ;;  %2415 = vmatprep.mubr.msk.f32.mxu1 %vm793_vm2, %v990_v16 }
 0x18c   : > { %2413 = vmatprep.subr.msk.mxu1 %vm793_vm2, %v994_v17 }
 0x18f   : > { %2414 = vmatpush3.xpose.msk.msra.mxu1 %vm793_vm2, %v994_v17 }
 0x192   : > { %2416 = vmatmul.mubr.msk.f32.vlgmr.msra.gmra.mxu1 %vm793_vm2, %v992_v18 }
 0x24a   : > { %v2403_v19 = vpop.f32.mrf.mxu1 }
 0x24b   : > { %v881_v20 = vsel %vm877_vm3, %v2403_v19, -inf }
 0x24c   : > { %882 = vmax.xlane.f32.xlu1 %v881_v20  ;;  %v868_v21 = vpop.f32.mrf.mxu1 }
 0x24d   : > { %v878_v22 = vsel %vm877_vm3, %v868_v21, -inf }
 0x24e   : > { %879 = vmax.xlane.f32.xlu0 %v878_v22 }
 0x252   : > { %v2417_v23 = vpop.f32.mrf.mxu1 }
 0x253   : > { %v1083_v26 = vsel %vm877_vm3, %v2417_v23, -inf }
 0x254   : > { %v1071_v24 = vpop.f32.mrf.mxu1 }
 0x255   : > { %v1080_v25 = vsel %vm877_vm3, %v1071_v24, -inf }
 0x256   : > { %1081 = vmax.xlane.f32.xlu0 %v1080_v25 }
 0x25a   : > { %1084 = vmax.xlane.f32.xlu0 %v1083_v26 }
 0x25d   : > { %902 = vrot.lane.b32.xlu1 %v2965_v10, %s2717_s28 }
 0x261   : > { %1104 = vrot.lane.b32.xlu1 %v2965_v10, %s2718_s15 }
 0x265   : > { %1102 = vrot.lane.b32.xlu1 %v2967_v12, %s2718_s15 }
 0x270   : > { %900 = vrot.lane.b32.xlu0 %v2967_v12, %s2717_s28 }
 0x2d5   : > { %v883_v27 = vpop.xlane.xlu1 %882 }
 0x2d6   : > { %v885_v28 = vsub.f32 %v2403_v19, %v883_v27 }
 0x2d7   : > { %v880_v29 = vpop.xlane.xlu0 %879 }
 0x2d8   : > { %v888_v30 = vmul.f32 1.442695, %v885_v28  ;;  %v884_v31 = vsub.f32 %v868_v21, %v880_v29 }
 0x2d9   : > { %v903_v32 = vpop.permute.xlu1 %902 }
 0x2da   : > { %2580 = vpow2.f32 %v888_v30  ;;  %v886_v33 = vmul.f32 1.442695, %v884_v31  ;;  %2404 = vmatprep.subr.mxu0 %v903_v32 }
 0x2db   : > { %2405 = vmatpush3.msra.mxu0 %v903_v32 }
 0x2dc   : > { %2582 = vpow2.f32 %v886_v33 }
 0x2dd   : > { %v1105_v42 = vpop.permute.xlu1 %1104 }
 0x2df   : > { %v1082_v34 = vpop.xlane.xlu0 %1081 }
 0x2e0   : > { %v1086_v46 = vsub.f32 %v1071_v24, %v1082_v34 }
 0x2e1   : > { %v1103_v50 = vpop.permute.xlu1 %1102 }
 0x2e2   : > { %v1088_v47 = vmul.f32 1.442695, %v1086_v46 }
 0x2e3   : > { %v1085_v35 = vpop.xlane.xlu0 %1084 }
 0x2e4   : > { %v1087_v36 = vsub.f32 %v2417_v23, %v1085_v35 }
 0x2e6   : > { %v1090_v37 = vmul.f32 1.442695, %v1087_v36 }
 0x2e7   : > { %v2581_v38 = vpop.eup %2580  ;;  %v901_v39 = vpop.permute.xlu0 %900 }
 0x2e8   : > { %2584 = vpow2.f32 %v1090_v37  ;;  %2406 = vmatprep.subr.mxu0 %v901_v39  ;;  %v893_v40 = vsel %vm877_vm3, %v2581_v38, 0.0 }
 0x2e9   : > { %v2583_v41 = vpop.eup %2582  ;;  %894 = vadd.xlane.f32.xlu0 %v893_v40  ;;  %2407 = vmatpush3.msra.mxu0 %v901_v39  ;;  %2586 = vpow2.f32 %v1088_v47 }
 0x2ea   : > { %2418 = vmatprep.subr.mxu0 %v1105_v42  ;;  %v890_v43 = vsel %vm877_vm3, %v2583_v41, 0.0 }
 0x2eb   : > { %891 = vadd.xlane.f32.xlu1 %v890_v43 }
 0x2f5   : > { %v2585_v44 = vpop.eup %2584 }
 0x2f6   : > { %v1095_v45 = vsel %vm877_vm3, %v2585_v44, 0.0  ;;  %v2587_v48 = vpop.eup %2586 }
 0x2f7   : > { %1096 = vadd.xlane.f32.xlu0 %v1095_v45  ;;  %v1092_v49 = vsel %vm877_vm3, %v2587_v48, 0.0 }
 0x2fc   : > { %1195 = vrot.lane.b32.xlu1 %v2967_v12, %s2719_s21 }
 0x30d   : > { %1197 = vrot.lane.b32.xlu0 %v2965_v10, %s2719_s21  ;;  %s3274_s21 = scalar_lea.vmem %s3213_s6, %s2881_s26 }
 0x311   : > { %1191 = vrot.lane.b32.xlu0 %v2967_v12, %s2720_s22 }
 0x320   : > { %1093 = vadd.xlane.f32.xlu1 %v1092_v49 }
 0x331   : > { %1193 = vrot.lane.b32.xlu1 %v2965_v10, %s2720_s22 }
 0x372   : > { %v895_v51 = vpop.xlane.xlu0 %894 }
 0x373   : > { %2588 = vrcp.f32 %v895_v51 }
 0x374   : > { %v892_v52 = vpop.xlane.xlu1 %891 }
 0x375   : > { %2590 = vrcp.f32 %v892_v52 }
 0x378   : > { %v1196_v62 = vpop.permute.xlu1 %1195 }
 0x380   : > { %v1097_v53 = vpop.xlane.xlu0 %1096  ;;  %v2589_v54 = vpop.eup %2588 }
 0x381   : > { %2592 = vrcp.f32 %v1097_v53  ;;  %v899_v57 = vmul.f32 %v2589_v54, %v2581_v38 }
 0x382   : > { %v2591_v55 = vpop.eup %2590 }
 0x383   : > { %v897_v56 = vmul.f32 %v2591_v55, %v2583_v41 }
 0x384   : > { %v1198_v58 = vpop.permute.xlu0 %1197 }
 0x385   : > { %2408 = vmatprep.mubr.msk.f32.mxu0 %vm877_vm3, %v897_v56 }
 0x386   : > { %2409 = vmatmul.mubr.msk.f32.vlgmr.msra.gmra.mxu0 %vm877_vm3, %v899_v57 }
 0x387   : > { %2419 = vmatpush3.msra.mxu0 %v1105_v42 }
 0x388   : > { %2420 = vmatprep.subr.mxu0 %v1103_v50  ;;  %v1192_v3 = vpop.permute.xlu0 %1191 }
 0x389   : > { %2421 = vmatpush3.msra.mxu0 %v1103_v50 }
 0x38a   : > { %2425 = vmatprep.subr.msk.mxu0 %vm793_vm2, %v1198_v58 }
 0x38e   : > { %v2593_v59 = vpop.eup %2592 }
 0x38f   : > { %v1101_v60 = vmul.f32 %v2593_v59, %v2585_v44 }
 0x391   : > { %v3008_v61 = vadd.f32 %v1101_v60, %v899_v57 }
 0x3a9   : > { %v1094_v63 = vpop.xlane.xlu1 %1093 }
 0x3aa   : > { %2594 = vrcp.f32 %v1094_v63 }
 0x3ad   : > { %v1194_v5 = vpop.permute.xlu1 %1193 }
 0x3b7   : > { %v2595_v0 = vpop.eup %2594 }
 0x3b8   : > { %v1099_v1 = vmul.f32 %v2595_v0, %v2587_v48 }
 0x3ba   : > { %2422 = vmatprep.mubr.msk.f32.mxu0 %vm877_vm3, %v1099_v1  ;;  %v1189_v2 = vadd.f32 %v1099_v1, %v897_v56  ;;  %v1629_v1 = vld [vmem:[%s2899_s16 + $0x18] sm:$0xff] }
 0x3bb   : > { %2423 = vmatmul.mubr.msk.f32.vlgmr.msra.gmra.mxu0 %vm877_vm3, %v1101_v60 }
 0x3bc   : > { %2426 = vmatpush3.xpose.msk.msra.mxu0 %vm793_vm2, %v1198_v58  ;;  %2429 = vmatprep.mubr.msk.f32.mxu0 %vm793_vm2, %v1192_v3  ;;  %v1627_v3 = vld [vmem:[%s2899_s16 + $0x8] sm:$0xff] }
 0x3bd   : > { %2427 = vmatprep.subr.msk.mxu0 %vm793_vm2, %v1196_v62 }
 0x3c0   : > { %2428 = vmatpush3.xpose.msk.msra.mxu0 %vm793_vm2, %v1196_v62 }
 0x3c3   : > { %2430 = vmatmul.mubr.msk.f32.vlgmr.msra.gmra.mxu0 %vm793_vm2, %v1194_v5  ;;  %v1626_v5 = vld [vmem:[%s2899_s16] sm:$0xff] }
 0x446   : > { %v3017_v6 = vpop.f32.mrf.mxu0 }
 0x448   : > { %v3019_v8 = vpop.f32.mrf.mxu0 }
 0x47b   : > { %v3021_v9 = vpop.f32.mrf.mxu0 }
 0x47d   : > { %v3023_v11 = vpop.f32.mrf.mxu0 }
 0x483   : > { %v2431_v13 = vpop.f32.mrf.mxu0 }
 0x484   : > { %v1285_v14 = vsel %vm877_vm3, %v2431_v13, -inf }
 0x485   : > { %1286 = vmax.xlane.f32.xlu1 %v1285_v14  ;;  %v1273_v15 = vpop.f32.mrf.mxu0 }
 0x486   : > { %v1282_v16 = vsel %vm877_vm3, %v1273_v15, -inf }
 0x487   : > { %1283 = vmax.xlane.f32.xlu0 %v1282_v16 }
 0x496   : > { %1306 = vrot.lane.b32.xlu1 %v2965_v10, %s2721_s13 }
 0x49a   : > { %1399 = vrot.lane.b32.xlu1 %v2965_v10, %s2722_s30 }
 0x49e   : > { %1397 = vrot.lane.b32.xlu1 %v2967_v12, %s2722_s30  ;;  %s3275_s30 = sld [smem:[#allocation24_spill]] }
 0x4a2   : > { %1395 = vrot.lane.b32.xlu1 %v2965_v10, %s2723_s17 }
 0x50e   : > { %v1287_v17 = vpop.xlane.xlu1 %1286 }
 0x50f   : > { %v1289_v18 = vsub.f32 %v2431_v13, %v1287_v17 }
 0x510   : > { %v1284_v19 = vpop.xlane.xlu0 %1283 }
 0x511   : > { %v1292_v20 = vmul.f32 1.442695, %v1289_v18  ;;  %v1288_v21 = vsub.f32 %v1273_v15, %v1284_v19 }
 0x512   : > { %v1307_v22 = vpop.permute.xlu1 %1306 }
 0x513   : > { %2596 = vpow2.f32 %v1292_v20  ;;  %v1290_v23 = vmul.f32 1.442695, %v1288_v21  ;;  %2432 = vmatprep.subr.mxu1 %v1307_v22 }
 0x514   : > { %2433 = vmatpush3.msra.mxu1 %v1307_v22 }
 0x515   : > { %2598 = vpow2.f32 %v1290_v23 }
 0x516   : > { %v1400_v31 = vpop.permute.xlu1 %1399 }
 0x51a   : > { %v1398_v39 = vpop.permute.xlu1 %1397 }
 0x51e   : > { %v1396_v40 = vpop.permute.xlu1 %1395 }
 0x520   : > { %v2597_v24 = vpop.eup %2596 }
 0x521   : > { %v1297_v25 = vsel %vm877_vm3, %v2597_v24, 0.0 }
 0x522   : > { %v2599_v26 = vpop.eup %2598  ;;  %1298 = vadd.xlane.f32.xlu0 %v1297_v25 }
 0x523   : > { %v1294_v27 = vsel %vm877_vm3, %v2599_v26, 0.0 }
 0x526   : > { %1295 = vadd.xlane.f32.xlu0 %v1294_v27 }
 0x53c   : > { %1304 = vrot.lane.b32.xlu0 %v2967_v12, %s2721_s13 }
 0x540   : > { %1393 = vrot.lane.b32.xlu0 %v2967_v12, %s2723_s17  ;;  %s3276_s17 = scalar_lea.vmem %s3275_s30, %s2881_s26 }
 0x5ab   : > { %v1299_v28 = vpop.xlane.xlu0 %1298 }
 0x5ac   : > { %2600 = vrcp.f32 %v1299_v28 }
 0x5af   : > { %v1296_v29 = vpop.xlane.xlu0 %1295 }
 0x5b0   : > { %2602 = vrcp.f32 %v1296_v29 }
 0x5b3   : > { %v1305_v30 = vpop.permute.xlu0 %1304 }
 0x5b4   : > { %2434 = vmatprep.subr.mxu1 %v1305_v30 }
 0x5b5   : > { %2435 = vmatpush3.msra.mxu1 %v1305_v30 }
 0x5b6   : > { %2439 = vmatprep.subr.msk.mxu1 %vm793_vm2, %v1400_v31 }
 0x5b7   : > { %v1394_v38 = vpop.permute.xlu0 %1393 }
 0x5b9   : > { %v2601_v32 = vpop.eup %2600 }
 0x5ba   : > { %v1303_v33 = vmul.f32 %v2601_v32, %v2597_v24 }
 0x5bc   : > { %v1392_v34 = vadd.f32 %v1303_v33, %v3008_v61 }
 0x5bd   : > { %v2603_v35 = vpop.eup %2602 }
 0x5be   : > { %v1301_v36 = vmul.f32 %v2603_v35, %v2599_v26 }
 0x5c0   : > { %2436 = vmatprep.mubr.msk.f32.mxu1 %vm877_vm3, %v1301_v36  ;;  %v1391_v37 = vadd.f32 %v1301_v36, %v1189_v2  ;;  %v1628_v2 = vld [vmem:[%s2899_s16 + $0x10] sm:$0xff] }
 0x5c1   : > { %2437 = vmatmul.mubr.msk.f32.vlgmr.msra.gmra.mxu1 %vm877_vm3, %v1303_v33 }
 0x5c2   : > { %2440 = vmatpush3.xpose.msk.msra.mxu1 %vm793_vm2, %v1400_v31  ;;  %2443 = vmatprep.mubr.msk.f32.mxu1 %vm793_vm2, %v1394_v38 }
 0x5c3   : > { %2441 = vmatprep.subr.msk.mxu1 %vm793_vm2, %v1398_v39 }
 0x5c6   : > { %2442 = vmatpush3.xpose.msk.msra.mxu1 %vm793_vm2, %v1398_v39 }
 0x5c9   : > { %2444 = vmatmul.mubr.msk.f32.vlgmr.msra.gmra.mxu1 %vm793_vm2, %v1396_v40  ;;  %v1768_v40 = vld [vmem:[%s2916_s20 + $0x18] sm:$0xff] }
 0x5ca   : > { %2464 = vmatprep.subr.mxu1 %v1768_v40 }
 0x5cb   : > { %2465 = vmatpush3.msra.mxu1 %v1768_v40 }
 0x681   : > { %v2438_v41 = vpop.f32.mrf.mxu1 }
 0x683   : > { %v1382_v42 = vpop.f32.mrf.mxu1 }
 0x689   : > { %v2445_v43 = vpop.f32.mrf.mxu1 }
 0x68a   : > { %v1487_v44 = vsel %vm877_vm3, %v2445_v43, -inf }
 0x68b   : > { %1488 = vmax.xlane.f32.xlu1 %v1487_v44  ;;  %v1475_v45 = vpop.f32.mrf.mxu1  ;;  %v1866_v44 = vld [vmem:[%s2930_s12 + $0x38] sm:$0xff] }
 0x68c   : > { %v1484_v46 = vsel %vm877_vm3, %v1475_v45, -inf }
 0x68d   : > { %1485 = vmax.xlane.f32.xlu0 %v1484_v46  ;;  %v1864_v46 = vld [vmem:[%s2930_s12 + $0x28] sm:$0xff] }
 0x69c   : > { %1508 = vrot.lane.b32.xlu1 %v2965_v10, %s2724_s18 }
 0x6a0   : > { %1597 = vrot.lane.b32.xlu1 %v3023_v11, %s2725_s3 }
 0x6a4   : > { %1599 = vrot.lane.b32.xlu1 %v3021_v9, %s2725_s3 }
 0x6a8   : > { %1607 = vrot.lane.b32.xlu1 %v2438_v41, %s2726_s1  ;;  %v1767_v41 = vld [vmem:[%s2916_s20 + $0x10] sm:$0xff] }
 0x6a9   : > { %2466 = vmatprep.subr.mxu1 %v1767_v41 }
 0x6aa   : > { %2467 = vmatpush3.msra.mxu1 %v1767_v41 }
 0x714   : > { %v1489_v47 = vpop.xlane.xlu1 %1488 }
 0x715   : > { %v1491_v48 = vsub.f32 %v2445_v43, %v1489_v47  ;;  %v1765_v43 = vld [vmem:[%s2916_s20] sm:$0xff] }
 0x716   : > { %v1486_v49 = vpop.xlane.xlu0 %1485  ;;  %v1863_v47 = vld [vmem:[%s2930_s12 + $0x20] sm:$0xff] }
 0x717   : > { %v1494_v50 = vmul.f32 1.442695, %v1491_v48  ;;  %v1490_v51 = vsub.f32 %v1475_v45, %v1486_v49  ;;  %v1865_v45 = vld [vmem:[%s2930_s12 + $0x30] sm:$0xff] }
 0x718   : > { %v1509_v52 = vpop.permute.xlu1 %1508 }
 0x719   : > { %2604 = vpow2.f32 %v1494_v50  ;;  %v1492_v53 = vmul.f32 1.442695, %v1490_v51  ;;  %2446 = vmatprep.subr.mxu0 %v1509_v52 }
 0x71a   : > { %2447 = vmatpush3.msra.mxu0 %v1509_v52 }
 0x71b   : > { %2606 = vpow2.f32 %v1492_v53 }
 0x71c   : > { %v1598_v13 = vpop.permute.xlu1 %1597 }
 0x71d   : > { %v1619_v17 = vsel %vm793_vm2, %v3019_v8, %v1598_v13  ;;  %v2300_v8 = vld [vmem:[%s3272_s25] ss:$0 sm:$0xff]  ;;  %s3278_s25 = sld [smem:[#allocation9_spill]] }
 0x720   : > { %v1600_v14 = vpop.permute.xlu1 %1599 }
 0x721   : > { %v1620_v19 = vsel %vm793_vm2, %v3017_v6, %v1600_v14 }
 0x723   : > { %p2313_p1 = scmp.ne.s32.totalorder %s3278_s25, 1 }
 0x724   : > { %v1608_v15 = vpop.permute.xlu1 %1607 }
 0x725   : > { %v1622_v22 = vsel %vm877_vm3, %v1620_v19, %v1608_v15 }
 0x726   : > { %v2605_v10 = vpop.eup %2604 }
 0x727   : > { %v1499_v54 = vsel %vm877_vm3, %v2605_v10, 0.0 }
 0x728   : > { %v2607_v55 = vpop.eup %2606  ;;  %1500 = vadd.xlane.f32.xlu0 %v1499_v54  ;;  %v2303_v54 = vld [vmem:[%s3273_s0] ss:$0 sm:$0xff] }
 0x729   : > { %v1496_v56 = vsel %vm877_vm3, %v2607_v55, 0.0 }
 0x72c   : > { %1497 = vadd.xlane.f32.xlu0 %v1496_v56  ;;  %v2304_v56 = vld [vmem:[%s3274_s21] ss:$0 sm:$0xff] }
 0x742   : > { %1506 = vrot.lane.b32.xlu0 %v2967_v12, %s2724_s18 }
 0x746   : > { %1605 = vrot.lane.b32.xlu0 %v1382_v42, %s2726_s1  ;;  %v1766_v42 = vld [vmem:[%s2916_s20 + $0x8] sm:$0xff] }
 0x747   : > { %2468 = vmatprep.subr.mxu1 %v1766_v42 }
 0x748   : > { %2469 = vmatpush3.msra.mxu1 %v1766_v42  ;;  %v2312_v42 = vld [vmem:[%s677_s7] ss:$0 sm:$0xff] }
 0x749   : > { %2470 = vmatprep.subr.mxu1 %v1765_v43 }
 0x74a   : > { %2471 = vmatpush3.msra.mxu1 %v1765_v43 }
 0x7b1   : > { %v1501_v57 = vpop.xlane.xlu0 %1500 }
 0x7b2   : > { %2608 = vrcp.f32 %v1501_v57 }
 0x7b5   : > { %v1498_v58 = vpop.xlane.xlu0 %1497 }
 0x7b6   : > { %2610 = vrcp.f32 %v1498_v58 }
 0x7b9   : > { %v1507_v59 = vpop.permute.xlu0 %1506 }
 0x7ba   : > { %2448 = vmatprep.subr.mxu0 %v1507_v59 }
 0x7bb   : > { %2449 = vmatpush3.msra.mxu0 %v1507_v59 }
 0x7bc   : > { %2453 = vmatprep.subr.mxu0 %v1629_v1 }
 0x7bd   : > { %v1606_v16 = vpop.permute.xlu0 %1605 }
 0x7be   : > { %v1621_v20 = vsel %vm877_vm3, %v1619_v17, %v1606_v16  ;;  %v2308_v17 = vld [vmem:[%s671_s24] ss:$0 sm:$0xff] }
 0x7bf   : > { %v2609_v60 = vpop.eup %2608 }
 0x7c0   : > { %v1505_v61 = vmul.f32 %v2609_v60, %v2605_v10 }
 0x7c2   : > { %v3054_v62 = vadd.f32 %v1505_v61, %v1392_v34 }
 0x7c3   : > { %v2611_v63 = vpop.eup %2610 }
 0x7c4   : > { %v1503_v0 = vmul.f32 %v2611_v63, %v2607_v55 }
 0x7c6   : > { %2450 = vmatprep.mubr.msk.f32.mxu0 %vm877_vm3, %v1503_v0  ;;  %v3057_v12 = vadd.f32 %v1503_v0, %v1391_v37  ;;  %v1862_v0 = vld [vmem:[%s2930_s12 + $0x18] sm:$0xff] }
 0x7c7   : > { %2451 = vmatmul.mubr.msk.f32.vlgmr.msra.gmra.mxu0 %vm877_vm3, %v1505_v61 }
 0x7c8   : > { %2454 = vmatpush3.msra.mxu0 %v1629_v1  ;;  %v1861_v1 = vld [vmem:[%s2930_s12 + $0x10] sm:$0xff] }
 0x7c9   : > { %2455 = vmatprep.subr.mxu0 %v1628_v2 }
 0x7ca   : > { %2456 = vmatpush3.msra.mxu0 %v1628_v2  ;;  %v1860_v2 = vld [vmem:[%s2930_s12 + $0x8] sm:$0xff] }
 0x7cb   : > { %2457 = vmatprep.subr.mxu0 %v1627_v3 }
 0x7cc   : > { %2458 = vmatpush3.msra.mxu0 %v1627_v3  ;;  %v1859_v3 = vld [vmem:[%s2930_s12] sm:$0xff] }
 0x7cd   : > { %2459 = vmatprep.subr.mxu0 %v1626_v5 }
 0x7ce   : > { %2460 = vmatpush3.msra.mxu0 %v1626_v5  ;;  %v2305_v5 = vld [vmem:[%s3276_s17] ss:$0 sm:$0xff] }
 0x7cf   : > { %2475 = vmatprep.subr.mxu0 %v1866_v44 }
 0x887   : > { %v2452_v9 = vpop.f32.mrf.mxu0 }
 0x888   : > { %1615 = vrot.lane.b32.xlu1 %v2452_v9, %s2727_s19 }
 0x889   : > { %v1584_v11 = vpop.f32.mrf.mxu0 }
 0x88a   : > { %1613 = vrot.lane.b32.xlu0 %v1584_v11, %s2727_s19 }
 0x8fa   : > { %v1616_v18 = vpop.permute.xlu1 %1615 }
 0x8fb   : > { %v1625_v24 = vsel %vm1623_vm4, %v1622_v22, %v1616_v18 }
 0x8fc   : > { %v1614_v21 = vpop.permute.xlu0 %1613 }
 0x8fd   : > { %v1624_v23 = vsel %vm1623_vm4, %v1621_v20, %v1614_v21 }
 0x8fe   : > { %2461 = vmatprep.mubr.msk.f32.mxu0 %vm705_vm1, %v1624_v23 }
 0x8ff   : > { %2462 = vmatmul.mubr.msk.f32.vlgmr.msra.gmra.mxu0 %vm705_vm1, %v1625_v24 }
 0x900   : > { %2476 = vmatpush3.msra.mxu0 %v1866_v44 }
 0x901   : > { %2477 = vmatprep.subr.mxu0 %v1865_v45 }
 0x902   : > { %2478 = vmatpush3.msra.mxu0 %v1865_v45 }
 0x903   : > { %2479 = vmatprep.subr.mxu0 %v1864_v46 }
 0x904   : > { %2480 = vmatpush3.msra.mxu0 %v1864_v46 }
 0x905   : > { %2481 = vmatprep.subr.mxu0 %v1863_v47 }
 0x906   : > { %2482 = vmatpush3.msra.mxu0 %v1863_v47 }
 0x907   : > { %2483 = vmatprep.subr.mxu0 %v1862_v0 }
 0x908   : > { %2484 = vmatpush3.msra.mxu0 %v1862_v0 }
 0x909   : > { %2485 = vmatprep.subr.mxu0 %v1861_v1 }
 0x90a   : > { %2486 = vmatpush3.msra.mxu0 %v1861_v1 }
 0x90b   : > { %2487 = vmatprep.subr.mxu0 %v1860_v2 }
 0x90c   : > { %2488 = vmatpush3.msra.mxu0 %v1860_v2 }
 0x90d   : > { %2489 = vmatprep.subr.mxu0 %v1859_v3 }
 0x90e   : > { %2490 = vmatpush3.msra.mxu0 %v1859_v3 }
 0x9bf   : > { %v2463_v25 = vpop.f32.mrf.mxu0 }
 0x9c0   : > { %v1715_v26 = vadd.f32 %v2463_v25, %v2300_v8 }
 0x9c1   : > { %v1709_v27 = vpop.f32.mrf.mxu0 }
 0x9c2   : > { %v1710_v6 = vadd.f32 %v2300_v8, %v1709_v27  ;;  %v1719_v28 = vadd.f32 %v1715_v26, %v2956_v7 }
 0x9c4   : > { %v1725_v29 = vsel %vm705_vm1, %v1719_v28, 0.0  ;;  %v1718_v30 = vadd.f32 %v1710_v6, %v2950_v4 }
 0x9c5   : > { %1726 = vadd.xlane.f32.xlu1 %v1725_v29 }
 0x9c6   : > { %v1722_v31 = vsel %vm705_vm1, %v1718_v30, 0.0 }
 0x9c7   : > { %1723 = vadd.xlane.f32.xlu0 %v1722_v31 }
 0xa4e   : > { %v1727_v32 = vpop.xlane.xlu1 %1726 }
 0xa4f   : > { %v1730_v33 = vmul.f32 0.03125, %v1727_v32 }
 0xa50   : > { %v1724_v34 = vpop.xlane.xlu0 %1723 }
 0xa51   : > { %v1729_v35 = vmul.f32 0.03125, %v1724_v34  ;;  %v1732_v36 = vsub.f32 %v1719_v28, %v1730_v33 }
 0xa53   : > { %v1731_v37 = vsub.f32 %v1718_v30, %v1729_v35  ;;  %v1734_v39 = vmul.f32 %v1732_v36, %v1732_v36 }
 0xa55   : > { %v1733_v38 = vmul.f32 %v1731_v37, %v1731_v37  ;;  %v1738_v4 = vsel %vm705_vm1, %v1734_v39, 0.0 }
 0xa57   : > { %v1735_v7 = vsel %vm705_vm1, %v1733_v38, 0.0 }
 0xa58   : > { %1736 = vadd.xlane.f32.xlu0 %v1735_v7 }
 0xa5c   : > { %1739 = vadd.xlane.f32.xlu0 %v1738_v4  ;;  %v2311_v4 = vld [vmem:[%s674_s29] ss:$0 sm:$0xff] }
 0xae1   : > { %v1737_v48 = vpop.xlane.xlu0 %1736 }
 0xae2   : > { %v1741_v49 = vmul.f32 0.03125, %v1737_v48 }
 0xae4   : > { %v1743_v50 = vadd.f32 1e-05, %v1741_v49 }
 0xae5   : > { %v1740_v51 = vpop.xlane.xlu0 %1739 }
 0xae6   : > { %2612 = vrsqrt.f32 %v1743_v50  ;;  %v1742_v52 = vmul.f32 0.03125, %v1740_v51 }
 0xae8   : > { %v1744_v53 = vadd.f32 1e-05, %v1742_v52 }
 0xaea   : > { %2614 = vrsqrt.f32 %v1744_v53 }
 0xaf3   : > { %v2613_v10 = vpop.eup %2612 }
 0xaf4   : > { %v1747_v55 = vmul.f32 %v2613_v10, %v1731_v37 }
 0xaf6   : > { %v1755_v57 = vmul.f32 %v2303_v54, %v1747_v55 }
 0xaf7   : > { %v2615_v58 = vpop.eup %2614 }
 0xaf8   : > { %v1748_v59 = vmul.f32 %v2615_v58, %v1732_v36  ;;  %v1763_v60 = vadd.f32 %v2304_v56, %v1755_v57 }
 0xafa   : > { %v1756_v61 = vmul.f32 %v2303_v54, %v1748_v59  ;;  %2472 = vmatprep.mubr.msk.f32.mxu1 %vm705_vm1, %v1763_v60 }
 0xafc   : > { %v1764_v63 = vadd.f32 %v2304_v56, %v1756_v61 }
 0xafe   : > { %2473 = vmatmul.mubr.msk.f32.vlgmr.msra.gmra.mxu1 %vm705_vm1, %v1764_v63 }
 0xbbe   : > { %v2474_v9 = vpop.f32.mrf.mxu1 }
 0xbbf   : > { %v1854_v11 = vadd.f32 %v2474_v9, %v2305_v5 }
 0xbc0   : > { %v1848_v13 = vpop.f32.mrf.mxu1 }
 0xbc1   : > { %v1849_v14 = vadd.f32 %v2305_v5, %v1848_v13  ;;  %v1858_v16 = vmax.f32 %v1854_v11, 0.0 }
 0xbc3   : > { %v1857_v15 = vmax.f32 %v1849_v14, 0.0 }
 0xbc5   : > { %2491 = vmatprep.mubr.msk.f32.mxu0 %vm1874_vm5, %v1857_v15 }
 0xbc6   : > { %2492 = vmatmul.mubr.msk.f32.vlgmr.msra.gmra.mxu0 %vm1874_vm5, %v1858_v16 }
 0xc86   : > { %v2493_v18 = vpop.f32.mrf.mxu0 }
 0xc87   : > { %v1953_v19 = vadd.f32 %v2493_v18, %v2308_v17 }
 0xc88   : > { %v1947_v20 = vpop.f32.mrf.mxu0 }
 0xc89   : > { %v1948_v21 = vadd.f32 %v2308_v17, %v1947_v20  ;;  %v1957_v22 = vadd.f32 %v1953_v19, %v1764_v63 }
 0xc8b   : > { %v1963_v23 = vsel %vm705_vm1, %v1957_v22, 0.0  ;;  %v1956_v24 = vadd.f32 %v1948_v21, %v1763_v60 }
 0xc8c   : > { %1964 = vadd.xlane.f32.xlu0 %v1963_v23 }
 0xc8d   : > { %v1960_v8 = vsel %vm705_vm1, %v1956_v24, 0.0 }
 0xc8e   : > { %1961 = vadd.xlane.f32.xlu1 %v1960_v8 }
 0xd15   : > { %v1965_v25 = vpop.xlane.xlu0 %1964 }
 0xd16   : > { %v1967_v26 = vmul.f32 0.03125, %v1965_v25 }
 0xd17   : > { %v1962_v27 = vpop.xlane.xlu1 %1961 }
 0xd18   : > { %v1969_v6 = vsub.f32 %v1957_v22, %v1967_v26  ;;  %v1966_v28 = vmul.f32 0.03125, %v1962_v27 }
 0xd1a   : > { %v1968_v29 = vsub.f32 %v1956_v24, %v1966_v28  ;;  %v1971_v30 = vmul.f32 %v1969_v6, %v1969_v6 }
 0xd1c   : > { %v1975_v31 = vsel %vm705_vm1, %v1971_v30, 0.0  ;;  %v1970_v32 = vmul.f32 %v1968_v29, %v1968_v29 }
 0xd1d   : > { %1976 = vadd.xlane.f32.xlu0 %v1975_v31 }
 0xd1e   : > { %v1972_v33 = vsel %vm705_vm1, %v1970_v32, 0.0 }
 0xd1f   : > { %1973 = vadd.xlane.f32.xlu1 %v1972_v33 }
 0xda6   : > { %v1977_v34 = vpop.xlane.xlu0 %1976 }
 0xda7   : > { %v1979_v35 = vmul.f32 0.03125, %v1977_v34 }
 0xda8   : > { %v1974_v36 = vpop.xlane.xlu1 %1973 }
 0xda9   : > { %v1981_v37 = vadd.f32 1e-05, %v1979_v35  ;;  %v1978_v38 = vmul.f32 0.03125, %v1974_v36 }
 0xdab   : > { %2616 = vrsqrt.f32 %v1981_v37  ;;  %v1980_v7 = vadd.f32 1e-05, %v1978_v38 }
 0xdad   : > { %2618 = vrsqrt.f32 %v1980_v7 }
 0xdb8   : > { %v2617_v39 = vpop.eup %2616 }
 0xdb9   : > { %v1985_v40 = vmul.f32 %v2617_v39, %v1969_v6 }
 0xdba   : > { %v2619_v41 = vpop.eup %2618 }
 0xdbb   : > { %v1993_v43 = vmul.f32 %v2311_v4, %v1985_v40  ;;  %v1984_v44 = vmul.f32 %v2619_v41, %v1968_v29 }
 0xdbd   : > { %v2001_v45 = vadd.f32 %v2312_v42, %v1993_v43  ;;  %v1992_v46 = vmul.f32 %v2311_v4, %v1984_v44  ;;  %2007 = sbr.rel (%p2313_p1) target bundleno = 3525 (0xdc5), region = 80 }
 0xdbf   : > { %2003 = vst.msk [vmem:[#allocation2 + $0x8] sm:$0xff] %vm705_vm1, %v2001_v45  ;;  %v2000_v47 = vadd.f32 %v2312_v42, %v1992_v46 }
 0xdc1   : > { %2002 = vst.msk [vmem:[#allocation2] sm:$0xff] %vm705_vm1, %v2000_v47 }
 0xdc2   : > { %2008 = vst.msk [vmem:[%s2945_s14] sm:$0xff] %vm705_vm1, %v2000_v47  ;;  %2009 = vst.msk [vmem:[%s2945_s14 + $0x8] sm:$0xff] %vm705_vm1, %v2001_v45  ;;  %v2010_v48 = vmul.f32 0.25, %v3057_v12  ;;  %v2011_v49 = vmul.f32 0.25, %v3054_v62 }
 0xdc4   : > { %2012 = vst.msk [vmem:[%s2943_s8] sm:$0xff] %vm877_vm3, %v2010_v48  ;;  %2013 = vst.msk [vmem:[%s2943_s8 + $0x8] sm:$0xff] %vm877_vm3, %v2011_v49 }
 0xdc5 PF: > { %s3279_s7 = sld [smem:[#allocation10_spill]]  ;;  %s2033_s21 = sshll.u32 %s2945_s14, 4  ;;  %s3151_s21 = int_to_ptr.vmem [resolvable:$true] %s2033_s21 }
 0xdc6   : > { %s3280_s26 = sld [smem:[#allocation7_spill]]  ;;  %s2620_s8 = scalar_lea.vmem %s3151_s21, 256 }
 0xdc7   : > { %s3282_s28 = sld [smem:[#allocation26_spill]]  ;;  %p2621_p2 = scmp.ne.s32.totalorder %s3151_s21, %s2620_s8 }
 0xdc8   : > { %s2728_s30 = smov [#allocation3]  }
 0xdc9   : > { %p2622_p4 = pnand %p2621_p2, %p2854_p3  ;;  %s2624_s17 = sshll.u32 %s2728_s30, 4  ;;  %s2625_s17 = int_to_ptr.vmem [resolvable:$false] %s2624_s17 }
 0xdca   : > { %s2626_s18 = scalar_lea.vmem %s2625_s17, 512  ;;  %p2627_p6 = scmp.lt.s32.totalorder %s3151_s21, %s2625_s17 }
 0xdcb   : > { %s2325_s20 = sshll.u32 %s3279_s7, 8  ;;  %p2623_p5 = pneg %p2622_p4 }
 0xdcc   : > { %s3283_s22 = sand.u32 1, %s3280_s26   ;;  %p2628_p7 = scmp.lt.s32.totalorder %s2626_s18, %s2620_s8 }
 0xdcd   : > { %s3148_s15 = scalar_lea.hbm %s3282_s28, %s2325_s20  ;;  %s3155_s13 = scalar_lea.sflag [#allocation4], %s3283_s22 }
 0xdce   : > { %p2629_p8 = por %p2628_p7, %p2627_p6 }
 0xdd0   : > { %p2630_p10 = pnand %p2629_p8, %p2623_p5 }
 0xdd2   : > { %2633 = shalt.err (!%p2630_p10)
}
 0xdd3   : > { %s2634_s14 = scalar_lea.hbm %s3148_s15, 256  ;;  %s2638_s24 = scalar_lea.hbm %s3282_s28, 512 }
 0xdd4   : > { %p2635_p11 = scmp.ne.s32.totalorder %s3148_s15, %s2634_s14  ;;  %p2639_p0 = scmp.lt.s32.totalorder %s3148_s15, %s3282_s28 }
 0xdd5   : > { %p2640_p1 = scmp.lt.s32.totalorder %s2638_s24, %s2634_s14 }
 0xdd6   : > { %p2636_p12 = pnand %p2635_p11, %p2854_p3 }
 0xdd7   : > { %p2641_p2 = por %p2640_p1, %p2639_p0 }
 0xdd8   : > { %p2637_p13 = pneg %p2636_p12 }
 0xdda   : > { %p2642_p4 = pnand %p2641_p2, %p2637_p13 }
 0xddc   : > { %2645 = shalt.err (!%p2642_p4)
}
 0xddd   : > { %s2729_s23 = smov 128  }
 0xdde   : > { %2494 = dma.vmem_to_hbm [thread:$0]  (%p2854_p3), %s3151_s21, 256, %s3148_s15, %s3155_s13, %s2729_s23, %s2729_s23, %s2725_s3  }
 0xddf PF: > { %s3284_s25 = sld [smem:[#allocation13_spill]] }
 0xde0   : > { %s3285_s7 = sld [smem:[#allocation6_spill]] }
 0xde5   : > { %p2500_p5 = scmp.ge.s32.totalorder %s3284_s25, 2 }
 0xde6   : > { %s2051_s20 = sand.u32 1, %s3285_s7  }
 0xde7   : > { %p2497_p6 = pnand %p2500_p5, %p2864_p9  ;;  %s2052_s27 = scalar_lea.sflag [#allocation4], %s2051_s20 }
 0xde9   : > { %p2498_p7 = pneg %p2497_p6 }
 0xdeb   : > { %2679 = dma.done.wait (%p2498_p7), %s2052_s27, 256  }
 0xdec   : > { %2681 = vsyncadd (%p2498_p7), %s2052_s27, 4294967040  ;;  %s28_s20 = sadd.s32 1, %s3284_s25   ;;  %s3287_s29 = sld [smem:[#allocation7_spill]] }
 0xded   : > { %p25_p8 = scmp.ge.s32.totalorder %s28_s20, 6   ;;  %s3288_s30 = sld [smem:[#allocation8_spill]] }
 0xdee   : > { %s3289_s15 = sld [smem:[#allocation18_spill]] }
 0xdef   : > { %s3290_s16 = sld [smem:[#allocation11_spill]]  ;;  %27 = sbr.rel (!%p25_p8) target bundleno = 14 (0xe), region = 163 }
 0xdf0   : > { %s3291_s17 = sld [smem:[#allocation12_spill]] }
 0xdf1   : > { %s3292_s18 = sld [smem:[#allocation14_spill]] }
 0xdf2   : > { %s3293_s19 = sld [smem:[#allocation16_spill]] }
 0xdf4   :  { %2065 = vsyncpa [#allocation4], 1 }
 0xdf5   :  { %2067 = vsyncpa [#allocation4 + $0x1], 1 }

// kernel: multitask_transformer_forward.9
= control target key start
LH: loop header
LB: loop body
LE: loop exit
PB: predicated region body
PF: predicated region fallthrough
CT: control target
= control target key end

     0   :  { %s1645_s0 = inlined_call_operand.vmem [shape: f32[2,8,32], index: 0, kind: input, shape index: {}]   ;;  %s1646_s1 = inlined_call_operand.vmem [shape: f32[2], index: 1, kind: input, shape index: {}]   ;;  %s1647_s2 = inlined_call_operand.vmem [shape: f32[2], index: 2, kind: input, shape index: {}]   ;;  %s1648_s3 = inlined_call_operand.vmem [shape: f32[32,32], index: 3, kind: input, shape index: {}]   ;;  %s1649_s4 = inlined_call_operand.vmem [shape: f32[1,32], index: 4, kind: input, shape index: {}]   ;;  %s1650_s5 = inlined_call_operand.vmem [shape: f32[2], index: 5, kind: input, shape index: {}]   ;;  %s1651_s6 = inlined_call_operand.vmem [shape: f32[2], index: 6, kind: input, shape index: {}]   ;;  %s1652_s7 = inlined_call_operand.vmem [shape: f32[32,32], index: 7, kind: input, shape index: {}]   ;;  %s1653_s8 = inlined_call_operand.vmem [shape: f32[1,32], index: 8, kind: input, shape index: {}]   ;;  %s1654_s9 = inlined_call_operand.vmem [shape: f32[2], index: 9, kind: input, shape index: {}]   ;;  %s1655_s10 = inlined_call_operand.vmem [shape: f32[2], index: 10, kind: input, shape index: {}]   ;;  %s1656_s11 = inlined_call_operand.vmem [shape: f32[32,128], index: 11, kind: input, shape index: {}]   ;;  %s1657_s12 = inlined_call_operand.vmem [shape: f32[1,128], index: 12, kind: input, shape index: {}]   ;;  %s1658_s13 = inlined_call_operand.hbm [shape: f32[2,1,128], index: 13, kind: output, shape index: {}]  }
   0x1   :  { %1666 = sst [smem:[#allocation23_spill]] %s1647_s2 }
   0x2   :  { %18 = vsyncpa [#allocation4], 0 }
   0x3   :  { %19 = vsyncpa [#allocation6], 0 }
   0x4   :  { %20 = vsyncpa [#allocation9], 0 }
   0x5   :  { %21 = vsyncpa [#allocation12], 0 }
   0x6   :  { %22 = vsyncpa [#allocation3], 0 }
   0x7   :  { %24 = vsyncpa [#allocation3 + $0x1], 0  ;;  %s1384_s25 = smov 0   ;;  %s1386_s26 = smov 0  }
   0x8   :  { %s1388_s27 = smov 0   ;;  %s1390_s28 = smov 0  }
   0x9 LB: > { %1667 = sst [smem:[#allocation19_spill]] %s1299_s27  ;;  %s1405_s29 = sadd.s32 4294967295, %s1303_s28   ;;  %s1303_s28 = sphi %s1390_s28, %s1689_s28   ;;  %s1299_s27 = sphi %s1388_s27, %s1691_s27   ;;  %s1295_s26 = sphi %s1386_s26, %s1693_s26   ;;  %s1291_s25 = sphi %s1384_s25, %s1692_s25  }
   0xa   : > { %s958_s30 = sadd.s32 4294967294, %s1303_s28   ;;  %s1409_s14 = sadd.s32 1, %s1303_s28  }
   0xb   : > { %1668 = sst [smem:[#allocation20_spill]] %s1409_s14  ;;  %s315_s15 = sadd.s32 1, %s1299_s27 }
   0xc   : > { %s312_s16 = ssub.s32 %s1303_s28, %s1409_s14  ;;  %p325_p0 = scmp.ne.s32.totalorder %s1299_s27, %s1295_s26 }
   0xd   : > { %p313_p1 = scmp.eq.s32.totalorder %s312_s16, 0  ;;  %p326_p2 = scmp.eq.s32.totalorder %s1405_s29, 1 }
   0xe   : > { %p331_p3 = scmp.ne.s32.totalorder %s1295_s26, %s1291_s25  ;;  %p332_p4 = scmp.eq.s32.totalorder %s958_s30, 1 }
   0xf   : > { %s1420_s17 = scalar_select %p313_p1, %s1299_s27, %s315_s15  }
  0x10   : > { %p1422_p5 = por %p326_p2, %p325_p0  ;;  %p1426_p6 = por %p332_p4, %p331_p3 }
  0x11   : > { %1669 = sst [smem:[#allocation21_spill]] %s1420_s17  ;;  %p959_p7 = scmp.ge.s32.totalorder %s1303_s28, 1 }
  0x12   : > { %s1670_s18 = scalar_select %p1422_p5, 1, 0 }
  0x13   : > { %s1671_s19 = scalar_select %p1426_p6, 1, 0 }
  0x14   : > { %p339_p8 = scmp.lt.s32.totalorder %s1303_s28, 3  ;;  %p1663_p9 = scmp.eq.s32.totalorder %s1405_s29, 0 }
  0x15   : > { %1672 = sst [smem:[#allocation22_spill]] %s1671_s19  ;;  %s391_s15 = sshll.u32 %s1651_s6, 4  ;;  %s392_s15 = int_to_ptr.vmem [resolvable:$true] %s391_s15 }
  0x16   : > { %p1433_p10 = pnand %p959_p7, %p339_p8  ;;  %s1674_s2 = sld [smem:[#allocation23_spill]] }
  0x17   : > { %s352_s21 = sshll.u32 %s1646_s1, 4  ;;  %s380_s14 = sshll.u32 %s1650_s5, 4  ;;  %s1454_s21 = int_to_ptr.vmem [resolvable:$true] %s352_s21  ;;  %s381_s14 = int_to_ptr.vmem [resolvable:$true] %s380_s14 }
  0x18   : > { %s1673_s20 = scalar_select %p1433_p10, 1, 0 }
  0x19   : > { %p1055_p11 = pneg %p1433_p10 }
  0x1b   : > { %p1447_p12 = pnand %p1663_p9, %p1055_p11 }
  0x1c   : > { %s363_s23 = sshll.u32 %s1674_s2, 4  ;;  %s364_s23 = int_to_ptr.vmem [resolvable:$true] %s363_s23 }
  0x1d   : > { %s1137_s19 = scalar_lea.vmem %s364_s23, 16  ;;  %p1461_p0 = pneg %p1447_p12 }
  0x1e   : > { %p1138_p13 = scmp.ne.s32.totalorder %s364_s23, %s1137_s19  ;;  %p1145_p3 = scmp.lt.s32.totalorder %s364_s23, %s364_s23 }
  0x1f   : > { %p1146_p4 = scmp.lt.s32.totalorder %s1137_s19, %s1137_s19 }
  0x20   : > { %p1140_p1 = pnand %p1461_p0, %p1138_p13 }
  0x21   : > { %p1147_p7 = por %p1146_p4, %p1145_p3 }
  0x22   : > { %p1141_p2 = pneg %p1140_p1 }
  0x24   : > { %p1148_p8 = pnand %p1147_p7, %p1141_p2 }
  0x26   : > { %1151 = shalt.err (!%p1148_p8)
}
  0x27   : > { %s1305_s27 = smov [#allocation5]   ;;  %s1152_s2 = scalar_lea.vmem %s392_s15, 16 }
  0x28   : > { %1061 = dma.vmem_to_smem (!%p1447_p12), %s364_s23, 16, %s1305_s27, [#allocation6]  }
  0x29   : > { %p1153_p11 = scmp.ne.s32.totalorder %s392_s15, %s1152_s2  ;;  %p1160_p5 = scmp.lt.s32.totalorder %s392_s15, %s392_s15 }
  0x2a   : > { %p1161_p10 = scmp.lt.s32.totalorder %s1152_s2, %s1152_s2 }
  0x2b   : > { %p1155_p9 = pnand %p1153_p11, %p1461_p0 }
  0x2c   : > { %p1162_p13 = por %p1161_p10, %p1160_p5 }
  0x2d   : > { %p1156_p6 = pneg %p1155_p9 }
  0x2f   : > { %p1163_p1 = pnand %p1162_p13, %p1156_p6 }
  0x31   : > { %1166 = shalt.err (!%p1163_p1)
}
  0x32   : > { %s1306_s17 = smov [#allocation8]   ;;  %s1167_s19 = scalar_lea.vmem %s1454_s21, 16 }
  0x33   : > { %1067 = dma.vmem_to_smem (!%p1447_p12), %s392_s15, 16, %s1306_s17, [#allocation9]  }
  0x34   : > { %p1168_p2 = scmp.ne.s32.totalorder %s1454_s21, %s1167_s19  ;;  %p1175_p9 = scmp.lt.s32.totalorder %s1454_s21, %s1454_s21 }
  0x35   : > { %p1176_p7 = scmp.lt.s32.totalorder %s1167_s19, %s1167_s19 }
  0x36   : > { %p1170_p3 = pnand %p1168_p2, %p1461_p0 }
  0x37   : > { %p1177_p8 = por %p1176_p7, %p1175_p9 }
  0x38   : > { %p1171_p4 = pneg %p1170_p3 }
  0x3a   : > { %p1178_p5 = pnand %p1177_p8, %p1171_p4 }
  0x3c   : > { %1181 = shalt.err (!%p1178_p5)
}
  0x3d   : > { %s1307_s23 = smov [#allocation2]   ;;  %s1182_s15 = scalar_lea.vmem %s381_s14, 16 }
  0x3e   : > { %1058 = dma.vmem_to_smem (!%p1447_p12), %s1454_s21, 16, %s1307_s23, [#allocation4]  }
  0x3f   : > { %p1183_p6 = scmp.ne.s32.totalorder %s381_s14, %s1182_s15  ;;  %p1190_p13 = scmp.lt.s32.totalorder %s381_s14, %s381_s14 }
  0x40   : > { %p1191_p1 = scmp.lt.s32.totalorder %s1182_s15, %s1182_s15 }
  0x41   : > { %p1185_p10 = pnand %p1183_p6, %p1461_p0 }
  0x42   : > { %p1192_p2 = por %p1191_p1, %p1190_p13 }
  0x43   : > { %p1186_p11 = pneg %p1185_p10 }
  0x45   : > { %p1193_p3 = pnand %p1192_p2, %p1186_p11 }
  0x47   : > { %1196 = shalt.err (!%p1193_p3)
}
  0x48   : > { %s1308_s27 = smov [#allocation7]   ;;  %s408_s17 = sshll.u32 %s1654_s9, 4  ;;  %s409_s17 = int_to_ptr.vmem [resolvable:$true] %s408_s17 }
  0x49   : > { %1064 = dma.vmem_to_smem (!%p1447_p12), %s381_s14, 16, %s1308_s27, [#allocation6]  }
  0x4a   : > { %s419_s30 = sshll.u32 %s1655_s10, 4  ;;  %s1197_s22 = scalar_lea.vmem %s409_s17, 16  ;;  %s420_s30 = int_to_ptr.vmem [resolvable:$true] %s419_s30 }
  0x4b   : > { %p1198_p4 = scmp.ne.s32.totalorder %s409_s17, %s1197_s22  ;;  %p1205_p8 = scmp.lt.s32.totalorder %s409_s17, %s409_s17 }
  0x4c   : > { %p1206_p5 = scmp.lt.s32.totalorder %s1197_s22, %s1197_s22 }
  0x4d   : > { %p1200_p9 = pnand %p1198_p4, %p1461_p0 }
  0x4e   : > { %p1207_p6 = por %p1206_p5, %p1205_p8 }
  0x4f   : > { %p1201_p7 = pneg %p1200_p9 }
  0x51   : > { %p1208_p10 = pnand %p1207_p6, %p1201_p7 }
  0x53   : > { %1211 = shalt.err (!%p1208_p10)
}
  0x54   : > { %s1309_s14 = smov [#allocation10]   ;;  %s1212_s15 = scalar_lea.vmem %s420_s30, 16 }
  0x55   : > { %1070 = dma.vmem_to_smem (!%p1447_p12), %s409_s17, 16, %s1309_s14, [#allocation9]  }
  0x56   : > { %p1213_p11 = scmp.ne.s32.totalorder %s420_s30, %s1212_s15  ;;  %p1220_p2 = scmp.lt.s32.totalorder %s420_s30, %s420_s30 }
  0x57   : > { %p1221_p3 = scmp.lt.s32.totalorder %s1212_s15, %s1212_s15 }
  0x58   : > { %p1215_p13 = pnand %p1213_p11, %p1461_p0 }
  0x59   : > { %p1222_p4 = por %p1221_p3, %p1220_p2 }
  0x5a   : > { %p1216_p1 = pneg %p1215_p13 }
  0x5c   : > { %p1223_p9 = pnand %p1222_p4, %p1216_p1 }
  0x5e   : > { %1226 = shalt.err (!%p1223_p9)
}
  0x5f   : > { %s1310_s27 = smov [#allocation11]   ;;  %p1677_p7 = scmp.ne.s32.totalorder %s1673_s20, 0 }
  0x60   : > { %1073 = dma.vmem_to_smem (!%p1447_p12), %s420_s30, 16, %s1310_s27, [#allocation12]  }
  0x61   : > { %445 = sbr.rel (%p1677_p7) target bundleno = 1679 (0x68f), region = 72  ;;  %p1678_p8 = scmp.eq.s32.totalorder (!%p1677_p7), %s1405_s29, 0 }
  0x66   : > { %1270 = dma.done.wait (%p1678_p8), [#allocation4], 16   ;;  %p1679_p5 = pmov %p1678_p8 }
  0x68   : > { %1272 = vsyncadd (%p1679_p5), [#allocation4], 4294967280  ;;  %p1680_p0 = pmov %p1679_p5 }
  0x6a   : > { %1274 = dma.done.wait (%p1680_p0), [#allocation6], 32   ;;  %p1681_p6 = pmov %p1680_p0 }
  0x6b   : > { %p1682_p10 = pmov %p1680_p0 }
  0x6c   : > { %1276 = vsyncadd (%p1681_p6), [#allocation6], 4294967264 }
  0x6d   : > { %1278 = dma.done.wait (%p1682_p10), [#allocation9], 32   ;;  %p1683_p12 = pmov %p1680_p0 }
  0x6e   : > { %p1684_p11 = pmov %p1680_p0 }
  0x6f   : > { %1280 = vsyncadd (%p1683_p12), [#allocation9], 4294967264 }
  0x70   : > { %1282 = dma.done.wait (%p1684_p11), [#allocation12], 16   ;;  %p1685_p13 = pmov %p1680_p0 }
  0x72   : > { %1284 = vsyncadd (%p1685_p13), [#allocation12], 4294967280 }
  0x73   : > { %471 = sfence }
  0x74   : > { %p508_p1 = scmp.lt.s32.totalorder %s1405_s29, 1  ;;  %vm513_vm0 = vcmask 261120   ;;  %v552_v14 = vld [vmem:[%s1648_s3 + $0x18] sm:$0xff]  ;;  %v1311_v15 = vmov 0.0   ;;  %v551_v16 = vld [vmem:[%s1648_s3 + $0x10] sm:$0xff]  ;;  %vm1312_vm1 = vmmov 0  }
  0x75   : > { %996 = vmatprep.subr.mxu0 %v1311_v15  ;;  %1004 = vmatprep.mubr.msk.f32.mxu0 %vm1312_vm1, %v1311_v15  ;;  %v550_v17 = vld [vmem:[%s1648_s3 + $0x8] sm:$0xff]  ;;  %v549_v18 = vld [vmem:[%s1648_s3] sm:$0xff]  ;;  %vm631_vm2 = vcmask 253952   ;;  %v654_v47 = vld [vmem:[%s1652_s7 + $0x18] sm:$0xff]  ;;  %s629_s27 = sld [smem:[#allocation7 + %s1405_s29]]  ;;  %s978_s21 = sshll.u32 %s1405_s29, 4 }
  0x76   : > { %s509_s20 = scalar_select %p508_p1, %s1405_s29, 1  ;;  %997 = vmatpush3.msra.mxu0 %v552_v14  ;;  %1007 = vmatprep.subr.mxu1 %v1311_v15  ;;  %v553_v36 = vld [vmem:[%s1649_s4] sm:$0x1]  ;;  %v653_v48 = vld [vmem:[%s1652_s7 + $0x10] sm:$0xff]  ;;  %v652_v49 = vld [vmem:[%s1652_s7 + $0x8] sm:$0xff] }
  0x77   : > { %998 = vmatprep.subr.mxu0 %v1311_v15  ;;  %1015 = vmatprep.mubr.msk.f32.mxu1 %vm1312_vm1, %v1311_v15  ;;  %v651_v50 = vld [vmem:[%s1652_s7] sm:$0xff]  ;;  %s730_s15 = sld [smem:[#allocation10 + %s1405_s29]]  ;;  %s1610_s30 = scalar_lea.hbm %s1658_s13, %s978_s21 }
  0x78   : > { %s974_s16 = sshll.u32 %s509_s20, 3  ;;  %999 = vmatpush3.msra.mxu0 %v551_v16  ;;  %s543_s20 = sld [smem:[#allocation2 + %s1405_s29]]  ;;  %1008 = vmatpush3.msra.mxu1 %v654_v47  ;;  %v655_v60 = vld [vmem:[%s1653_s8] sm:$0x1] }
  0x79   : > { %s511_s2 = scalar_lea.vmem %s1645_s0, %s974_s16  ;;  %1000 = vmatprep.subr.mxu0 %v1311_v15  ;;  %s546_s16 = sld [smem:[#allocation5 + %s1405_s29]]  ;;  %1009 = vmatprep.subr.mxu1 %v1311_v15 }
  0x7a   : > { %v512_v0 = vld [vmem:[%s511_s2] sm:$0xff]  ;;  %1001 = vmatpush3.msra.mxu0 %v550_v17  ;;  %1010 = vmatpush3.msra.mxu1 %v653_v48  ;;  %p1686_p3 = scmp.ne.s32.totalorder %s1670_s18, 0 }
  0x7b   : > { %v514_v1 = vsel %vm513_vm0, %v512_v0, 0.0  ;;  %1002 = vmatprep.subr.mxu0 %v1311_v15  ;;  %1011 = vmatprep.subr.mxu1 %v1311_v15  ;;  %v647_v55 = vstv %s629_s27  ;;  %s731_s27 = sld [smem:[#allocation11 + %s1405_s29]] }
  0x7c   : > { %515 = vadd.xlane.f32.xlu0 %v514_v1  ;;  %1003 = vmatpush3.msra.mxu0 %v549_v18 }
  0x7d   : > { %1018 = vmatprep.subr.mxu0 %v1311_v15  ;;  %1012 = vmatpush3.msra.mxu1 %v652_v49  ;;  %v747_v16 = vstv %s730_s15  ;;  %s1313_s15 = smov [#allocation13]  }
  0x7e   : > { %v544_v30 = vstv %s543_s20  ;;  %1013 = vmatprep.subr.mxu1 %v1311_v15  ;;  %s630_s20 = sld [smem:[#allocation8 + %s1405_s29]]  ;;  %s1231_s29 = sshll.u32 %s1313_s15, 4  ;;  %s1232_s29 = int_to_ptr.vmem [resolvable:$false] %s1231_s29 }
  0x7f   : > { %v547_v32 = vstv %s546_s16  ;;  %1014 = vmatpush3.msra.mxu1 %v651_v50 }
  0x81   : > { %v749_v18 = vstv %s731_s27  ;;  %s1233_s27 = scalar_lea.vmem %s1232_s29, 32 }
  0x84   : > { %v649_v57 = vstv %s630_s20  ;;  %s506_s20 = sand.u32 1, %s1295_s26  }
  0x85   : > { %s507_s2 = scalar_lea.vmem [#allocation13], %s506_s20  ;;  %s831_s22 = scalar_lea.sflag [#allocation3], %s506_s20 }
  0x86   : > { %s843_s17 = sshll.u32 %s507_s2, 4  ;;  %s844_s17 = int_to_ptr.vmem [resolvable:$true] %s843_s17 }
  0x87   : > { %s1227_s14 = scalar_lea.vmem %s844_s17, 16  ;;  %p1234_p7 = scmp.lt.s32.totalorder %s844_s17, %s1232_s29 }
  0x88   : > { %p1228_p2 = scmp.ne.s32.totalorder %s844_s17, %s1227_s14  ;;  %p1235_p8 = scmp.lt.s32.totalorder %s1233_s27, %s1227_s14 }
  0x8a   : > { %p1229_p4 = pnand %p1228_p2, %p1686_p3  ;;  %p1236_p5 = por %p1235_p8, %p1234_p7 }
  0x8c   : > { %p1230_p9 = pneg %p1229_p4 }
  0x8e   : > { %p1237_p0 = pnand %p1236_p5, %p1230_p9 }
 0x105   : > { %v516_v2 = vpop.xlane.xlu0 %515 }
 0x106   : > { %v518_v3 = vmul.f32 0.03125, %v516_v2 }
 0x108   : > { %v519_v4 = vrot.slane %v518_v3, 4 }
 0x10a   : > { %v520_v5 = vadd.f32 %v519_v4, %v518_v3 }
 0x10c   : > { %v521_v6 = vrot.slane %v520_v5, 2 }
 0x10e   : > { %v522_v7 = vadd.f32 %v521_v6, %v520_v5 }
 0x110   : > { %v523_v8 = vrot.slane %v522_v7, 1 }
 0x112   : > { %v524_v9 = vadd.f32 %v523_v8, %v522_v7  ;;  %v754_v7 = vld [vmem:[%s1656_s11 + $0x18] sm:$0xff]  ;;  %v753_v8 = vld [vmem:[%s1656_s11 + $0x10] sm:$0xff] }
 0x114   : > { %v526_v10 = vmul.f32 0.125, %v524_v9  ;;  %v752_v9 = vld [vmem:[%s1656_s11 + $0x8] sm:$0xff] }
 0x116   : > { %v527_v11 = vsub.f32 %v512_v0, %v526_v10  ;;  %v751_v10 = vld [vmem:[%s1656_s11] sm:$0xff] }
 0x118   : > { %v528_v12 = vmul.f32 %v527_v11, %v527_v11 }
 0x11a   : > { %v529_v13 = vsel %vm513_vm0, %v528_v12, 0.0 }
 0x11b   : > { %530 = vadd.xlane.f32.xlu0 %v529_v13 }
 0x1a4   : > { %v531_v19 = vpop.xlane.xlu0 %530 }
 0x1a5   : > { %v532_v20 = vmul.f32 0.03125, %v531_v19 }
 0x1a7   : > { %v533_v21 = vrot.slane %v532_v20, 4 }
 0x1a9   : > { %v534_v22 = vadd.f32 %v533_v21, %v532_v20 }
 0x1ab   : > { %v535_v23 = vrot.slane %v534_v22, 2 }
 0x1ad   : > { %v536_v24 = vadd.f32 %v535_v23, %v534_v22 }
 0x1af   : > { %v537_v25 = vrot.slane %v536_v24, 1 }
 0x1b1   : > { %v538_v26 = vadd.f32 %v537_v25, %v536_v24 }
 0x1b3   : > { %v539_v27 = vmul.f32 0.125, %v538_v26 }
 0x1b5   : > { %v540_v28 = vadd.f32 1e-05, %v539_v27 }
 0x1b7   : > { %1131 = vrsqrt.f32 %v540_v28 }
 0x1c4   : > { %v1132_v29 = vpop.eup %1131 }
 0x1c5   : > { %v542_v31 = vmul.f32 %v1132_v29, %v527_v11 }
 0x1c7   : > { %v545_v33 = vmul.f32 %v544_v30, %v542_v31 }
 0x1c9   : > { %v548_v34 = vadd.f32 %v547_v32, %v545_v33 }
 0x1cb   : > { %v555_v35 = vrot.slane %v548_v34, 7 }
 0x1cd   : > { %1005 = vmatmul.mubr.msk.f32.vlgmr.msra.gmra.mxu0 %vm513_vm0, %v555_v35 }
 0x1ce   : > { %1026 = vmatprep.mubr.msk.f32.mxu0 %vm1312_vm1, %v1311_v15  ;;  %1019 = vmatpush3.msra.mxu0 %v754_v7 }
 0x1cf   : > { %1020 = vmatprep.subr.mxu0 %v1311_v15 }
 0x1d0   : > { %1021 = vmatpush3.msra.mxu0 %v753_v8 }
 0x1d1   : > { %1022 = vmatprep.subr.mxu0 %v1311_v15 }
 0x1d2   : > { %1023 = vmatpush3.msra.mxu0 %v752_v9 }
 0x1d3   : > { %1024 = vmatprep.subr.mxu0 %v1311_v15  ;;  %v755_v15 = vld [vmem:[%s1657_s12] sm:$0x1] }
 0x1d4   : > { %1025 = vmatpush3.msra.mxu0 %v751_v10 }
 0x28d   : > { %v624_v37 = vpop.f32.mrf.mxu0 }
 0x28e   : > { %v625_v38 = vadd.f32 %v624_v37, %v553_v36 }
 0x28f   : > { %v1006_v39 = vpop.f32.mrf.mxu0 }
 0x290   : > { %v628_v40 = vmax.f32 %v625_v38, 0.0 }
 0x292   : > { %v632_v41 = vsel %vm631_vm2, %v628_v40, 0.0 }
 0x293   : > { %633 = vadd.xlane.f32.xlu1 %v632_v41 }
 0x31c   : > { %v634_v42 = vpop.xlane.xlu1 %633 }
 0x31d   : > { %v635_v43 = vmul.f32 0.03125, %v634_v42 }
 0x31f   : > { %v637_v44 = vsub.f32 %v628_v40, %v635_v43 }
 0x321   : > { %v638_v45 = vmul.f32 %v637_v44, %v637_v44 }
 0x323   : > { %v639_v46 = vsel %vm631_vm2, %v638_v45, 0.0 }
 0x324   : > { %640 = vadd.xlane.f32.xlu1 %v639_v46 }
 0x3ad   : > { %v641_v51 = vpop.xlane.xlu1 %640 }
 0x3ae   : > { %v642_v52 = vmul.f32 0.03125, %v641_v51 }
 0x3b0   : > { %v644_v53 = vadd.f32 1e-05, %v642_v52 }
 0x3b2   : > { %1133 = vrsqrt.f32 %v644_v53 }
 0x3bf   : > { %v1134_v54 = vpop.eup %1133 }
 0x3c0   : > { %v646_v56 = vmul.f32 %v1134_v54, %v637_v44 }
 0x3c2   : > { %v648_v58 = vmul.f32 %v647_v55, %v646_v56 }
 0x3c4   : > { %v650_v59 = vadd.f32 %v649_v57, %v648_v58 }
 0x3c6   : > { %1016 = vmatmul.mubr.msk.f32.vlgmr.msra.gmra.mxu1 %vm513_vm0, %v650_v59 }
 0x486   : > { %v725_v61 = vpop.f32.mrf.mxu1 }
 0x487   : > { %v726_v62 = vadd.f32 %v725_v61, %v655_v60 }
 0x488   : > { %v1017_v63 = vpop.f32.mrf.mxu1 }
 0x489   : > { %v729_v0 = vmax.f32 %v726_v62, 0.0 }
 0x48b   : > { %v732_v1 = vsel %vm631_vm2, %v729_v0, 0.0 }
 0x48c   : > { %733 = vadd.xlane.f32.xlu0 %v732_v1 }
 0x515   : > { %v734_v2 = vpop.xlane.xlu0 %733 }
 0x516   : > { %v735_v3 = vmul.f32 0.03125, %v734_v2 }
 0x518   : > { %v737_v4 = vsub.f32 %v729_v0, %v735_v3 }
 0x51a   : > { %v738_v5 = vmul.f32 %v737_v4, %v737_v4 }
 0x51c   : > { %v739_v6 = vsel %vm631_vm2, %v738_v5, 0.0 }
 0x51d   : > { %740 = vadd.xlane.f32.xlu1 %v739_v6 }
 0x5a6   : > { %v741_v11 = vpop.xlane.xlu1 %740 }
 0x5a7   : > { %v742_v12 = vmul.f32 0.03125, %v741_v11 }
 0x5a9   : > { %v744_v13 = vadd.f32 1e-05, %v742_v12 }
 0x5ab   : > { %1135 = vrsqrt.f32 %v744_v13 }
 0x5b8   : > { %v1136_v14 = vpop.eup %1135 }
 0x5b9   : > { %v746_v17 = vmul.f32 %v1136_v14, %v737_v4 }
 0x5bb   : > { %v748_v19 = vmul.f32 %v747_v16, %v746_v17 }
 0x5bd   : > { %v750_v20 = vadd.f32 %v749_v18, %v748_v19 }
 0x5bf   : > { %1027 = vmatmul.mubr.msk.f32.vlgmr.msra.gmra.mxu0 %vm513_vm0, %v750_v20 }
 0x67f   : > { %v825_v21 = vpop.f32.mrf.mxu0 }
 0x680   : > { %v826_v22 = vadd.f32 %v825_v21, %v755_v15 }
 0x681   : > { %v1028_v23 = vpop.f32.mrf.mxu0 }
 0x682   : > { %829 = vst [vmem:[%s507_s2] sm:$0x1] %v826_v22 }
 0x683   : > { %1240 = shalt.err (!%p1237_p0)
}
 0x684   : > { %s1241_s16 = scalar_lea.hbm %s1610_s30, 16  ;;  %s1245_s21 = scalar_lea.hbm %s1658_s13, 32 }
 0x685   : > { %p1242_p6 = scmp.ne.s32.totalorder %s1610_s30, %s1241_s16  ;;  %p1246_p11 = scmp.lt.s32.totalorder %s1610_s30, %s1658_s13 }
 0x686   : > { %p1247_p13 = scmp.lt.s32.totalorder %s1245_s21, %s1241_s16 }
 0x687   : > { %p1243_p10 = pnand %p1242_p6, %p1686_p3 }
 0x688   : > { %p1248_p1 = por %p1247_p13, %p1246_p11 }
 0x689   : > { %p1244_p12 = pneg %p1243_p10 }
 0x68b   : > { %p1249_p2 = pnand %p1248_p1, %p1244_p12 }
 0x68d   : > { %1252 = shalt.err (!%p1249_p2)
}
 0x68e   : > { %1053 = dma.vmem_to_hbm [thread:$0]  (%p1686_p3), %s844_s17, 16, %s1610_s30, %s831_s22  }
 0x68f PF: > { %s1687_s23 = sld [smem:[#allocation22_spill]]  ;;  %p1090_p4 = scmp.ge.s32.totalorder %s1303_s28, 2 }
 0x690   : > { %s855_s14 = sand.u32 1, %s1291_s25  }
 0x691   : > { %s856_s15 = scalar_lea.sflag [#allocation3], %s855_s14 }
 0x695   : > { %p1688_p9 = scmp.ne.s32.totalorder %s1687_s23, 0 }
 0x697   : > { %p1075_p7 = pnand %p1090_p4, %p1688_p9 }
 0x699   : > { %p1076_p8 = pneg %p1075_p7 }
 0x69b   : > { %1286 = dma.done.wait (%p1076_p8), %s856_s15, 16  }
 0x69c   : > { %1288 = vsyncadd (%p1076_p8), %s856_s15, 4294967280  ;;  %s1689_s28 = sld [smem:[#allocation20_spill]]  ;;  %s1692_s25 = smov %s1295_s26 }
 0x69d   : > { %s1690_s29 = sld [smem:[#allocation19_spill]] }
 0x69e   : > { %s1691_s27 = sld [smem:[#allocation21_spill]] }
 0x6a2   : > { %p27_p5 = scmp.ge.s32.totalorder %s1689_s28, 4  }
 0x6a3   : > { %s1693_s26 = smov %s1690_s29 }
 0x6a4   :  { %29 = sbr.rel (!%p27_p5) target bundleno = 9 (0x9), region = 132 }
 0x6a9   :  { %860 = vsyncpa [#allocation3], 1 }
 0x6aa   :  { %862 = vsyncpa [#allocation3 + $0x1], 1 }
 0x6ab   :  { %863 = vsyncpa [#allocation4], 1 }
 0x6ac   :  { %865 = vsyncpa [#allocation4 + $0x1], 1 }
 0x6ad   :  { %866 = vsyncpa [#allocation6], 1 }
 0x6ae   :  { %867 = vsyncpa [#allocation9], 1 }
 0x6af   :  { %868 = vsyncpa [#allocation12], 1 }

</bundles_post_ra>
